<compile_context>
chip_gen: v7x
topology: tpu7x:2x2x1
jax: 0.10.0
libtpu: 0.0.40
codegen_flags: <defaults>
</compile_context>

<pallas_src>
import functools

import jax
import jax.numpy as jnp
from jax.experimental import pallas as pl
from jax.experimental.pallas import tpu as pltpu


# ----------------------------------------------------------------------------
# Fused tower kernel.  grid = (B,).  One grid step = full TowerModel forward
# for one batch element (both stages, summed in registers).
# ----------------------------------------------------------------------------
def _tower_kernel(x_ref, m_ref, in_w_ref, in_b_ref, wd_ref, bd_ref,
                  w1_ref, b1_ref, out_w_ref, out_b_ref,
                  out_ref, final_ref, xpad_ref, *, T, F, L, S, Kmax, pad_max):
    Cp = out_w_ref.shape[-1]                       # lane-padded class dim

    x = x_ref[0]                                   # (T, dim) f32
    xb = x.astype(jnp.bfloat16)
    m = m_ref[0]                                   # (T, 1)   f32

    # Zero only the halo rows once; halos are never written again, the center
    # rows [pad_max : pad_max+T) get rewritten with each layer's activation.
    xpad_ref[0:pad_max, :] = jnp.zeros((pad_max, F), xpad_ref.dtype)
    xpad_ref[pad_max + T:pad_max + T + pad_max, :] = jnp.zeros(
        (pad_max, F), xpad_ref.dtype)

    out_acc = jnp.zeros((T, F), jnp.float32)
    final_acc = jnp.zeros((T, Cp), jnp.float32)

    for s in range(S):                             # static stage unroll
        # Input 1x1 conv:  (T, dim) @ (dim, F) + b  (bf16 in, f32 accumulate)
        h = jnp.dot(xb, in_w_ref[s],
                    preferred_element_type=jnp.float32) + in_b_ref[s]

        # Dilated residual layers: one im2col matmul per layer.
        for l in range(L):
            d = 2 ** l
            pad = (Kmax - 1) // 2 * d              # "same" padding on the Kmax grid
            idx = s * L + l

            xpad_ref[pad_max:pad_max + T, :] = h   # rewrite center rows
            taps = [xpad_ref[pad_max - pad + j * d: pad_max - pad + j * d + T, :]
                    for j in range(Kmax)]          # static sublane-shifted slices
            im2col = jnp.concatenate(taps, axis=-1).astype(jnp.bfloat16)  # (T, Kmax*F)

            acc = jnp.dot(im2col, wd_ref[idx],
                          preferred_element_type=jnp.float32) + bd_ref[idx]
            hidden = jnp.maximum(acc, 0.0)         # ReLU (f32, VPU)
            y = jnp.dot(hidden.astype(jnp.bfloat16), w1_ref[idx],
                        preferred_element_type=jnp.float32) + b1_ref[idx]
            # TODO(synk): nn.Dropout is identity in eval mode; train-mode RNG
            # dropout is not modeled.
            h = (h + y) * m                        # residual + mask (f32)

        # Output 1x1 conv (lane-padded classes), masked.
        final = (jnp.dot(h.astype(jnp.bfloat16), out_w_ref[s],
                         preferred_element_type=jnp.float32) + out_b_ref[s]) * m

        out_acc = out_acc + h                      # stage sum in registers
        final_acc = final_acc + final

    out_ref[0] = out_acc.astype(out_ref.dtype)
    final_ref[0] = final_acc.astype(final_ref.dtype)


# ----------------------------------------------------------------------------
# Wrapper: one pallas_call for the whole TowerModel forward.
# ----------------------------------------------------------------------------
@functools.partial(jax.jit, static_argnames=("num_layers", "kmax", "num_classes"))
def tower_forward(x_nct, mask_nct, stacked, num_layers, kmax, num_classes):
    """x_nct: (B, dim, T), mask_nct: (B, C, T).  Returns (out1+out2, final1+final2) in NCT."""
    B, dim, T = x_nct.shape
    S, _, F = stacked["in_w"].shape
    Cp = stacked["out_w"].shape[-1]                # lane-padded classes (128)
    L = num_layers
    Kmax = kmax
    pad_max = (Kmax - 1) // 2 * 2 ** (L - 1)

    x = jnp.transpose(x_nct, (0, 2, 1))                     # (B, T, dim)
    m = jnp.transpose(mask_nct[:, 0:1, :], (0, 2, 1))       # (B, T, 1)

    kernel = functools.partial(_tower_kernel, T=T, F=F, L=L, S=S, Kmax=Kmax,
                               pad_max=pad_max)
    out_sum, final_pad = pl.pallas_call(
        kernel,
        out_shape=(jax.ShapeDtypeStruct((B, T, F), jnp.float32),
                   jax.ShapeDtypeStruct((B, T, Cp), jnp.float32)),
        grid_spec=pltpu.PrefetchScalarGridSpec(
            num_scalar_prefetch=0,
            grid=(B,),
            in_specs=[
                pl.BlockSpec((1, T, dim), lambda b: (b, 0, 0)),              # x
                pl.BlockSpec((1, T, 1), lambda b: (b, 0, 0)),                # mask
                pl.BlockSpec((S, dim, F), lambda b: (0, 0, 0)),              # in_w (resident)
                pl.BlockSpec((S, 1, F), lambda b: (0, 0, 0)),                # in_b
                pl.BlockSpec((S * L, Kmax * F, F), lambda b: (0, 0, 0)),     # wd (im2col weights)
                pl.BlockSpec((S * L, 1, F), lambda b: (0, 0, 0)),            # bd
                pl.BlockSpec((S * L, F, F), lambda b: (0, 0, 0)),            # w1
                pl.BlockSpec((S * L, 1, F), lambda b: (0, 0, 0)),            # b1
                pl.BlockSpec((S, F, Cp), lambda b: (0, 0, 0)),               # out_w
                pl.BlockSpec((S, 1, Cp), lambda b: (0, 0, 0)),               # out_b
            ],
            out_specs=[
                pl.BlockSpec((1, T, F), lambda b: (b, 0, 0)),
                pl.BlockSpec((1, T, Cp), lambda b: (b, 0, 0)),
            ],
            scratch_shapes=[pltpu.VMEM((T + 2 * pad_max, F), jnp.float32)],
        ),
        compiler_params=pltpu.CompilerParams(
            dimension_semantics=("parallel",)),
    )(x, m, stacked["in_w"], stacked["in_b"], stacked["wd"], stacked["bd"],
      stacked["w1"], stacked["b1"], stacked["out_w"], stacked["out_b"])

    out = jnp.transpose(out_sum, (0, 2, 1))                          # (B, F, T)
    final = jnp.transpose(final_pad[:, :, :num_classes], (0, 2, 1))  # (B, C, T)
    return out, final


# ----------------------------------------------------------------------------
# Parameter construction / stacking.
# ----------------------------------------------------------------------------
def init_params(key, num_layers, num_f_maps, dim, num_classes, kernel_size):
    """Deterministic synthetic parameters in (Cin, Cout)/(K, Cin, Cout) layout."""
    keys = jax.random.split(key, 4 + 4 * num_layers)
    s = 0.1
    params = {
        "in_w": s * jax.random.normal(keys[0], (dim, num_f_maps), jnp.float32),
        "in_b": s * jax.random.normal(keys[1], (1, num_f_maps), jnp.float32),
        "out_w": s * jax.random.normal(keys[2], (num_f_maps, num_classes), jnp.float32),
        "out_b": s * jax.random.normal(keys[3], (1, num_classes), jnp.float32),
        "layers": [],
    }
    for i in range(num_layers):
        k0, k1, k2, k3 = keys[4 + 4 * i: 8 + 4 * i]
        params["layers"].append({
            "wd": s * jax.random.normal(k0, (kernel_size, num_f_maps, num_f_maps), jnp.float32),
            "bd": s * jax.random.normal(k1, (1, num_f_maps), jnp.float32),
            "w1": s * jax.random.normal(k2, (num_f_maps, num_f_maps), jnp.float32),
            "b1": s * jax.random.normal(k3, (1, num_f_maps), jnp.float32),
        })
    return params


def stack_tower_params(stage_params, kernel_sizes, kmax, c_pad):
    """Stack both stages; zero-embed K taps into Kmax; reshape taps for im2col.

    For odd K with torch padding d*(K-1)/2, centering the K taps inside the Kmax
    grid (padding d*(Kmax-1)/2) is mathematically identical.  Matrix weights are
    stored bf16 (cast once here); biases stay f32.
    """
    F = stage_params[0]["in_w"].shape[-1]
    C = stage_params[0]["out_w"].shape[-1]
    wd, bd, w1, b1 = [], [], [], []
    for p, k in zip(stage_params, kernel_sizes):
        off = (kmax - k) // 2
        for lp in p["layers"]:
            wpad = jnp.zeros((kmax, F, F), jnp.float32).at[off:off + k].set(lp["wd"])
            wd.append(wpad.reshape(kmax * F, F))    # (Kmax*F, F): tap-major rows
            bd.append(lp["bd"])                     # (1, F)
            w1.append(lp["w1"])                     # (F, F)
            b1.append(lp["b1"])                     # (1, F)
    out_w = jnp.stack([p["out_w"] for p in stage_params])            # (S, F, C)
    out_b = jnp.stack([p["out_b"] for p in stage_params])            # (S, 1, C)
    out_w = jnp.pad(out_w, ((0, 0), (0, 0), (0, c_pad - C)))         # lane-dense classes
    out_b = jnp.pad(out_b, ((0, 0), (0, 0), (0, c_pad - C)))
    return {
        "in_w": jnp.stack([p["in_w"] for p in stage_params]).astype(jnp.bfloat16),  # (S, dim, F)
        "in_b": jnp.stack([p["in_b"] for p in stage_params]),                       # (S, 1, F) f32
        "wd": jnp.stack(wd).astype(jnp.bfloat16),                                   # (S*L, Kmax*F, F)
        "bd": jnp.stack(bd),                                                        # (S*L, 1, F) f32
        "w1": jnp.stack(w1).astype(jnp.bfloat16),                                   # (S*L, F, F)
        "b1": jnp.stack(b1),                                                        # (S*L, 1, F) f32
        "out_w": out_w.astype(jnp.bfloat16),                                        # (S, F, Cp)
        "out_b": out_b,                                                             # (S, 1, Cp) f32
    }


# ----------------------------------------------------------------------------
# Pure-jnp reference (no Pallas), stage-by-stage with each stage's native K.
# ----------------------------------------------------------------------------
def _stage_reference(x_nct, mask_nct, p, kernel_size, num_layers):
    x = jnp.transpose(x_nct, (0, 2, 1))
    m = jnp.transpose(mask_nct[:, 0:1, :], (0, 2, 1))

    def pw(a, w, b):
        return jnp.einsum("btc,cd->btd", a, w) + b[None]

    out = pw(x, p["in_w"], p["in_b"])
    T = out.shape[1]
    K = kernel_size
    for i in range(num_layers):
        d = 2 ** i
        pad = int(d + d * (K - 3) / 2)            # same formula as the torch module
        xpad = jnp.pad(out, ((0, 0), (pad, pad), (0, 0)))
        acc = jnp.zeros_like(out) + p["layers"][i]["bd"][None]
        for j in range(K):
            acc = acc + jnp.einsum("btc,cd->btd",
                                   xpad[:, j * d:j * d + T, :],
                                   p["layers"][i]["wd"][j])
        h = jnp.maximum(acc, 0.0)
        y = pw(h, p["layers"][i]["w1"], p["layers"][i]["b1"])
        out = (out + y) * m
    final = pw(out, p["out_w"], p["out_b"]) * m
    return out, final


def tower_reference(x_nct, mask_nct, stage_params, kernel_sizes, num_layers):
    o1, f1 = _stage_reference(x_nct, mask_nct, stage_params[0], kernel_sizes[0], num_layers)
    o2, f2 = _stage_reference(x_nct, mask_nct, stage_params[1], kernel_sizes[1], num_layers)
    return (jnp.transpose(o1 + o2, (0, 2, 1)), jnp.transpose(f1 + f2, (0, 2, 1)))


if __name__ == "__main__":
    # Small shapes consistent with the module's forward.
    B, T = 2, 64
    num_layers, num_f_maps, dim, num_classes = 3, 32, 8, 10
    kernel_sizes = (3, 5)           # TowerModel: stage1 K=3, stage2 K=5
    kmax = max(kernel_sizes)
    c_pad = ((num_classes + 127) // 128) * 128     # lane-dense class padding

    key = jax.random.PRNGKey(0)
    kx, kp1, kp2 = jax.random.split(key, 3)

    x = jax.random.normal(kx, (B, dim, T), jnp.float32)                 # NCT, like torch
    # Binary sequence mask (B, num_classes, T); only channel 0 is used in forward.
    lengths = jnp.array([T, 48])
    t_idx = jnp.arange(T)[None, :]                                      # (1, T)
    mask = (t_idx < lengths[:, None]).astype(jnp.float32)               # (B, T)
    mask = jnp.broadcast_to(mask[:, None, :], (B, num_classes, T))      # (B, C, T)

    p1 = init_params(kp1, num_layers, num_f_maps, dim, num_classes, kernel_sizes[0])
    p2 = init_params(kp2, num_layers, num_f_maps, dim, num_classes, kernel_sizes[1])
    stacked = stack_tower_params([p1, p2], kernel_sizes, kmax, c_pad)

    out, final_out = tower_forward(x, mask, stacked, num_layers=num_layers,
                                   kmax=kmax, num_classes=num_classes)
    out = jax.block_until_ready(out)
    final_out = jax.block_until_ready(final_out)

    assert out.shape == (B, num_f_maps, T)
    assert final_out.shape == (B, num_classes, T)

    # Sanity check against a pure-jnp f32 reference (kernel matmuls are bf16).
    ref_out, ref_final = tower_reference(x, mask, [p1, p2], kernel_sizes, num_layers)
    assert jnp.allclose(out, ref_out, rtol=5e-2, atol=5e-2)
    assert jnp.allclose(final_out, ref_final, rtol=5e-2, atol=5e-2)

    print("KERNEL_OK")
</pallas_src>

<mosaic_0001>
module attributes {stable_mosaic.version = 11 : i64} {
  func.func @_tower_kernel(%arg0: i32, %arg1: memref<1x64x8xf32, #tpu.memory_space<vmem>>, %arg2: memref<1x64x1xf32, #tpu.memory_space<vmem>>, %arg3: memref<2x8x32xbf16, #tpu.memory_space<vmem>>, %arg4: memref<2x1x32xf32, #tpu.memory_space<vmem>>, %arg5: memref<6x160x32xbf16, #tpu.memory_space<vmem>>, %arg6: memref<6x1x32xf32, #tpu.memory_space<vmem>>, %arg7: memref<6x32x32xbf16, #tpu.memory_space<vmem>>, %arg8: memref<6x1x32xf32, #tpu.memory_space<vmem>>, %arg9: memref<2x32x128xbf16, #tpu.memory_space<vmem>>, %arg10: memref<2x1x128xf32, #tpu.memory_space<vmem>>, %arg11: memref<1x64x32xf32, #tpu.memory_space<vmem>>, %arg12: memref<1x64x128xf32, #tpu.memory_space<vmem>>, %arg13: memref<80x32xf32, #tpu.memory_space<vmem>>) attributes {dimension_semantics = [#tpu.dimension_semantics<parallel>], iteration_bounds = array<i64: 2>, scalar_prefetch = 0 : i64, scratch_operands = 1 : i64, tpu.core_type = #tpu.core_type<tc>, window_params = [{transform_indices = @transform_0, window_bounds = array<i64: 1, 64, 8>}, {transform_indices = @transform_1, window_bounds = array<i64: 1, 64, 1>}, {pipeline_mode = #tpu.pipeline_mode<synchronous>, transform_indices = @transform_2, window_bounds = array<i64: 2, 8, 32>}, {pipeline_mode = #tpu.pipeline_mode<synchronous>, transform_indices = @transform_3, window_bounds = array<i64: 2, 1, 32>}, {pipeline_mode = #tpu.pipeline_mode<synchronous>, transform_indices = @transform_4, window_bounds = array<i64: 6, 160, 32>}, {pipeline_mode = #tpu.pipeline_mode<synchronous>, transform_indices = @transform_5, window_bounds = array<i64: 6, 1, 32>}, {pipeline_mode = #tpu.pipeline_mode<synchronous>, transform_indices = @transform_6, window_bounds = array<i64: 6, 32, 32>}, {pipeline_mode = #tpu.pipeline_mode<synchronous>, transform_indices = @transform_7, window_bounds = array<i64: 6, 1, 32>}, {pipeline_mode = #tpu.pipeline_mode<synchronous>, transform_indices = @transform_8, window_bounds = array<i64: 2, 32, 128>}, {pipeline_mode = #tpu.pipeline_mode<synchronous>, transform_indices = @transform_9, window_bounds = array<i64: 2, 1, 128>}, {transform_indices = @transform_10, window_bounds = array<i64: 1, 64, 32>}, {transform_indices = @transform_11, window_bounds = array<i64: 1, 64, 128>}]} {
    %c0 = arith.constant 0 : index
    %c0_0 = arith.constant 0 : index
    %c0_1 = arith.constant 0 : index
    %0 = vector.load %arg1[%c0, %c0_0, %c0_1] : memref<1x64x8xf32, #tpu.memory_space<vmem>>, vector<1x64x8xf32>
    %1 = vector.shape_cast %0 : vector<1x64x8xf32> to vector<64x8xf32>
    %2 = arith.truncf %1 : vector<64x8xf32> to vector<64x8xbf16>
    %c0_2 = arith.constant 0 : index
    %c0_3 = arith.constant 0 : index
    %c0_4 = arith.constant 0 : index
    %3 = vector.load %arg2[%c0_2, %c0_3, %c0_4] : memref<1x64x1xf32, #tpu.memory_space<vmem>>, vector<1x64x1xf32>
    %4 = vector.shape_cast %3 : vector<1x64x1xf32> to vector<64x1xf32>
    %cst = arith.constant 0.000000e+00 : f32
    %5 = vector.broadcast %cst : f32 to vector<8x32xf32>
    %c0_5 = arith.constant 0 : index
    %c0_6 = arith.constant 0 : index
    %6 = vector.load %arg13[%c0_5, %c0_6] : memref<80x32xf32, #tpu.memory_space<vmem>>, vector<8x32xf32>
    tpu.vector_store %arg13[%c0_5, %c0_6], %5 {strides = array<i32>} : memref<80x32xf32, #tpu.memory_space<vmem>>, vector<8x32xf32>,
    %cst_7 = arith.constant 0.000000e+00 : f32
    %7 = vector.broadcast %cst_7 : f32 to vector<8x32xf32>
    %c72 = arith.constant 72 : index
    %c0_8 = arith.constant 0 : index
    %8 = vector.load %arg13[%c72, %c0_8] : memref<80x32xf32, #tpu.memory_space<vmem>>, vector<8x32xf32>
    tpu.vector_store %arg13[%c72, %c0_8], %7 {strides = array<i32>} : memref<80x32xf32, #tpu.memory_space<vmem>>, vector<8x32xf32>,
    %cst_9 = arith.constant 0.000000e+00 : f32
    %9 = vector.broadcast %cst_9 : f32 to vector<64x32xf32>
    %cst_10 = arith.constant 0.000000e+00 : f32
    %10 = vector.broadcast %cst_10 : f32 to vector<64x128xf32>
    %c0_11 = arith.constant 0 : index
    %c0_12 = arith.constant 0 : index
    %c0_13 = arith.constant 0 : index
    %11 = vector.load %arg3[%c0_11, %c0_12, %c0_13] : memref<2x8x32xbf16, #tpu.memory_space<vmem>>, vector<1x8x32xbf16>
    %12 = vector.shape_cast %11 : vector<1x8x32xbf16> to vector<8x32xbf16>
    %cst_14 = arith.constant dense<0.000000e+00> : vector<64x32xf32>
    %13 = tpu.matmul %2, %12, %cst_14 {dimension_numbers = #tpu.dot_dimension_numbers<[1], [0], [0], [1], [0, 0, 1, 1], [], []>} : vector<64x8xbf16>, vector<8x32xbf16>, vector<64x32xf32> -> vector<64x32xf32>
    %c0_15 = arith.constant 0 : index
    %c0_16 = arith.constant 0 : index
    %c0_17 = arith.constant 0 : index
    %14 = vector.load %arg4[%c0_15, %c0_16, %c0_17] : memref<2x1x32xf32, #tpu.memory_space<vmem>>, vector<1x1x32xf32>
    %15 = vector.shape_cast %14 : vector<1x1x32xf32> to vector<1x32xf32>
    %16 = vector.broadcast %15 : vector<1x32xf32> to vector<64x32xf32>
    %17 = arith.addf %13, %16 : vector<64x32xf32>
    %c8 = arith.constant 8 : index
    %c0_18 = arith.constant 0 : index
    %18 = vector.load %arg13[%c8, %c0_18] : memref<80x32xf32, #tpu.memory_space<vmem>>, vector<64x32xf32>
    tpu.vector_store %arg13[%c8, %c0_18], %17 {strides = array<i32>} : memref<80x32xf32, #tpu.memory_space<vmem>>, vector<64x32xf32>,
    %c6 = arith.constant 6 : index
    %c0_19 = arith.constant 0 : index
    %19 = vector.load %arg13[%c6, %c0_19] : memref<80x32xf32, #tpu.memory_space<vmem>>, vector<64x32xf32>
    %c7 = arith.constant 7 : index
    %c0_20 = arith.constant 0 : index
    %20 = vector.load %arg13[%c7, %c0_20] : memref<80x32xf32, #tpu.memory_space<vmem>>, vector<64x32xf32>
    %c8_21 = arith.constant 8 : index
    %c0_22 = arith.constant 0 : index
    %21 = vector.load %arg13[%c8_21, %c0_22] : memref<80x32xf32, #tpu.memory_space<vmem>>, vector<64x32xf32>
    %c9 = arith.constant 9 : index
    %c0_23 = arith.constant 0 : index
    %22 = vector.load %arg13[%c9, %c0_23] : memref<80x32xf32, #tpu.memory_space<vmem>>, vector<64x32xf32>
    %c10 = arith.constant 10 : index
    %c0_24 = arith.constant 0 : index
    %23 = vector.load %arg13[%c10, %c0_24] : memref<80x32xf32, #tpu.memory_space<vmem>>, vector<64x32xf32>
    %24 = tpu.concatenate %19, %20, %21, %22, %23 in 1 : vector<64x32xf32>, vector<64x32xf32>, vector<64x32xf32>, vector<64x32xf32>, vector<64x32xf32> -> vector<64x160xf32>
    %25 = arith.truncf %24 : vector<64x160xf32> to vector<64x160xbf16>
    %c0_25 = arith.constant 0 : index
    %c0_26 = arith.constant 0 : index
    %c0_27 = arith.constant 0 : index
    %26 = vector.load %arg5[%c0_25, %c0_26, %c0_27] : memref<6x160x32xbf16, #tpu.memory_space<vmem>>, vector<1x160x32xbf16>
    %27 = vector.shape_cast %26 : vector<1x160x32xbf16> to vector<160x32xbf16>
    %cst_28 = arith.constant dense<0.000000e+00> : vector<64x32xf32>
    %28 = tpu.matmul %25, %27, %cst_28 {dimension_numbers = #tpu.dot_dimension_numbers<[1], [0], [0], [1], [0, 0, 1, 1], [], []>} : vector<64x160xbf16>, vector<160x32xbf16>, vector<64x32xf32> -> vector<64x32xf32>
    %c0_29 = arith.constant 0 : index
    %c0_30 = arith.constant 0 : index
    %c0_31 = arith.constant 0 : index
    %29 = vector.load %arg6[%c0_29, %c0_30, %c0_31] : memref<6x1x32xf32, #tpu.memory_space<vmem>>, vector<1x1x32xf32>
    %30 = vector.shape_cast %29 : vector<1x1x32xf32> to vector<1x32xf32>
    %31 = vector.broadcast %30 : vector<1x32xf32> to vector<64x32xf32>
    %32 = arith.addf %28, %31 : vector<64x32xf32>
    %cst_32 = arith.constant 0.000000e+00 : f32
    %33 = vector.broadcast %cst_32 : f32 to vector<64x32xf32>
    %34 = arith.maximumf %32, %33 : vector<64x32xf32>
    %35 = arith.truncf %34 : vector<64x32xf32> to vector<64x32xbf16>
    %c0_33 = arith.constant 0 : index
    %c0_34 = arith.constant 0 : index
    %c0_35 = arith.constant 0 : index
    %36 = vector.load %arg7[%c0_33, %c0_34, %c0_35] : memref<6x32x32xbf16, #tpu.memory_space<vmem>>, vector<1x32x32xbf16>
    %37 = vector.shape_cast %36 : vector<1x32x32xbf16> to vector<32x32xbf16>
    %cst_36 = arith.constant dense<0.000000e+00> : vector<64x32xf32>
    %38 = tpu.matmul %35, %37, %cst_36 {dimension_numbers = #tpu.dot_dimension_numbers<[1], [0], [0], [1], [0, 0, 1, 1], [], []>} : vector<64x32xbf16>, vector<32x32xbf16>, vector<64x32xf32> -> vector<64x32xf32>
    %c0_37 = arith.constant 0 : index
    %c0_38 = arith.constant 0 : index
    %c0_39 = arith.constant 0 : index
    %39 = vector.load %arg8[%c0_37, %c0_38, %c0_39] : memref<6x1x32xf32, #tpu.memory_space<vmem>>, vector<1x1x32xf32>
    %40 = vector.shape_cast %39 : vector<1x1x32xf32> to vector<1x32xf32>
    %41 = vector.broadcast %40 : vector<1x32xf32> to vector<64x32xf32>
    %42 = arith.addf %38, %41 : vector<64x32xf32>
    %43 = arith.addf %17, %42 : vector<64x32xf32>
    %44 = vector.broadcast %4 : vector<64x1xf32> to vector<64x32xf32>
    %45 = arith.mulf %43, %44 : vector<64x32xf32>
    %c8_40 = arith.constant 8 : index
    %c0_41 = arith.constant 0 : index
    %46 = vector.load %arg13[%c8_40, %c0_41] : memref<80x32xf32, #tpu.memory_space<vmem>>, vector<64x32xf32>
    tpu.vector_store %arg13[%c8_40, %c0_41], %45 {strides = array<i32>} : memref<80x32xf32, #tpu.memory_space<vmem>>, vector<64x32xf32>,
    %c4 = arith.constant 4 : index
    %c0_42 = arith.constant 0 : index
    %47 = vector.load %arg13[%c4, %c0_42] : memref<80x32xf32, #tpu.memory_space<vmem>>, vector<64x32xf32>
    %c6_43 = arith.constant 6 : index
    %c0_44 = arith.constant 0 : index
    %48 = vector.load %arg13[%c6_43, %c0_44] : memref<80x32xf32, #tpu.memory_space<vmem>>, vector<64x32xf32>
    %c8_45 = arith.constant 8 : index
    %c0_46 = arith.constant 0 : index
    %49 = vector.load %arg13[%c8_45, %c0_46] : memref<80x32xf32, #tpu.memory_space<vmem>>, vector<64x32xf32>
    %c10_47 = arith.constant 10 : index
    %c0_48 = arith.constant 0 : index
    %50 = vector.load %arg13[%c10_47, %c0_48] : memref<80x32xf32, #tpu.memory_space<vmem>>, vector<64x32xf32>
    %c12 = arith.constant 12 : index
    %c0_49 = arith.constant 0 : index
    %51 = vector.load %arg13[%c12, %c0_49] : memref<80x32xf32, #tpu.memory_space<vmem>>, vector<64x32xf32>
    %52 = tpu.concatenate %47, %48, %49, %50, %51 in 1 : vector<64x32xf32>, vector<64x32xf32>, vector<64x32xf32>, vector<64x32xf32>, vector<64x32xf32> -> vector<64x160xf32>
    %53 = arith.truncf %52 : vector<64x160xf32> to vector<64x160xbf16>
    %c1 = arith.constant 1 : index
    %c0_50 = arith.constant 0 : index
    %c0_51 = arith.constant 0 : index
    %54 = vector.load %arg5[%c1, %c0_50, %c0_51] : memref<6x160x32xbf16, #tpu.memory_space<vmem>>, vector<1x160x32xbf16>
    %55 = vector.shape_cast %54 : vector<1x160x32xbf16> to vector<160x32xbf16>
    %cst_52 = arith.constant dense<0.000000e+00> : vector<64x32xf32>
    %56 = tpu.matmul %53, %55, %cst_52 {dimension_numbers = #tpu.dot_dimension_numbers<[1], [0], [0], [1], [0, 0, 1, 1], [], []>} : vector<64x160xbf16>, vector<160x32xbf16>, vector<64x32xf32> -> vector<64x32xf32>
    %c1_53 = arith.constant 1 : index
    %c0_54 = arith.constant 0 : index
    %c0_55 = arith.constant 0 : index
    %57 = vector.load %arg6[%c1_53, %c0_54, %c0_55] : memref<6x1x32xf32, #tpu.memory_space<vmem>>, vector<1x1x32xf32>
    %58 = vector.shape_cast %57 : vector<1x1x32xf32> to vector<1x32xf32>
    %59 = vector.broadcast %58 : vector<1x32xf32> to vector<64x32xf32>
    %60 = arith.addf %56, %59 : vector<64x32xf32>
    %cst_56 = arith.constant 0.000000e+00 : f32
    %61 = vector.broadcast %cst_56 : f32 to vector<64x32xf32>
    %62 = arith.maximumf %60, %61 : vector<64x32xf32>
    %63 = arith.truncf %62 : vector<64x32xf32> to vector<64x32xbf16>
    %c1_57 = arith.constant 1 : index
    %c0_58 = arith.constant 0 : index
    %c0_59 = arith.constant 0 : index
    %64 = vector.load %arg7[%c1_57, %c0_58, %c0_59] : memref<6x32x32xbf16, #tpu.memory_space<vmem>>, vector<1x32x32xbf16>
    %65 = vector.shape_cast %64 : vector<1x32x32xbf16> to vector<32x32xbf16>
    %cst_60 = arith.constant dense<0.000000e+00> : vector<64x32xf32>
    %66 = tpu.matmul %63, %65, %cst_60 {dimension_numbers = #tpu.dot_dimension_numbers<[1], [0], [0], [1], [0, 0, 1, 1], [], []>} : vector<64x32xbf16>, vector<32x32xbf16>, vector<64x32xf32> -> vector<64x32xf32>
    %c1_61 = arith.constant 1 : index
    %c0_62 = arith.constant 0 : index
    %c0_63 = arith.constant 0 : index
    %67 = vector.load %arg8[%c1_61, %c0_62, %c0_63] : memref<6x1x32xf32, #tpu.memory_space<vmem>>, vector<1x1x32xf32>
    %68 = vector.shape_cast %67 : vector<1x1x32xf32> to vector<1x32xf32>
    %69 = vector.broadcast %68 : vector<1x32xf32> to vector<64x32xf32>
    %70 = arith.addf %66, %69 : vector<64x32xf32>
    %71 = arith.addf %45, %70 : vector<64x32xf32>
    %72 = vector.broadcast %4 : vector<64x1xf32> to vector<64x32xf32>
    %73 = arith.mulf %71, %72 : vector<64x32xf32>
    %c8_64 = arith.constant 8 : index
    %c0_65 = arith.constant 0 : index
    %74 = vector.load %arg13[%c8_64, %c0_65] : memref<80x32xf32, #tpu.memory_space<vmem>>, vector<64x32xf32>
    tpu.vector_store %arg13[%c8_64, %c0_65], %73 {strides = array<i32>} : memref<80x32xf32, #tpu.memory_space<vmem>>, vector<64x32xf32>,
    %c0_66 = arith.constant 0 : index
    %c0_67 = arith.constant 0 : index
    %75 = vector.load %arg13[%c0_66, %c0_67] : memref<80x32xf32, #tpu.memory_space<vmem>>, vector<64x32xf32>
    %c4_68 = arith.constant 4 : index
    %c0_69 = arith.constant 0 : index
    %76 = vector.load %arg13[%c4_68, %c0_69] : memref<80x32xf32, #tpu.memory_space<vmem>>, vector<64x32xf32>
    %c8_70 = arith.constant 8 : index
    %c0_71 = arith.constant 0 : index
    %77 = vector.load %arg13[%c8_70, %c0_71] : memref<80x32xf32, #tpu.memory_space<vmem>>, vector<64x32xf32>
    %c12_72 = arith.constant 12 : index
    %c0_73 = arith.constant 0 : index
    %78 = vector.load %arg13[%c12_72, %c0_73] : memref<80x32xf32, #tpu.memory_space<vmem>>, vector<64x32xf32>
    %c16 = arith.constant 16 : index
    %c0_74 = arith.constant 0 : index
    %79 = vector.load %arg13[%c16, %c0_74] : memref<80x32xf32, #tpu.memory_space<vmem>>, vector<64x32xf32>
    %80 = tpu.concatenate %75, %76, %77, %78, %79 in 1 : vector<64x32xf32>, vector<64x32xf32>, vector<64x32xf32>, vector<64x32xf32>, vector<64x32xf32> -> vector<64x160xf32>
    %81 = arith.truncf %80 : vector<64x160xf32> to vector<64x160xbf16>
    %c2 = arith.constant 2 : index
    %c0_75 = arith.constant 0 : index
    %c0_76 = arith.constant 0 : index
    %82 = vector.load %arg5[%c2, %c0_75, %c0_76] : memref<6x160x32xbf16, #tpu.memory_space<vmem>>, vector<1x160x32xbf16>
    %83 = vector.shape_cast %82 : vector<1x160x32xbf16> to vector<160x32xbf16>
    %cst_77 = arith.constant dense<0.000000e+00> : vector<64x32xf32>
    %84 = tpu.matmul %81, %83, %cst_77 {dimension_numbers = #tpu.dot_dimension_numbers<[1], [0], [0], [1], [0, 0, 1, 1], [], []>} : vector<64x160xbf16>, vector<160x32xbf16>, vector<64x32xf32> -> vector<64x32xf32>
    %c2_78 = arith.constant 2 : index
    %c0_79 = arith.constant 0 : index
    %c0_80 = arith.constant 0 : index
    %85 = vector.load %arg6[%c2_78, %c0_79, %c0_80] : memref<6x1x32xf32, #tpu.memory_space<vmem>>, vector<1x1x32xf32>
    %86 = vector.shape_cast %85 : vector<1x1x32xf32> to vector<1x32xf32>
    %87 = vector.broadcast %86 : vector<1x32xf32> to vector<64x32xf32>
    %88 = arith.addf %84, %87 : vector<64x32xf32>
    %cst_81 = arith.constant 0.000000e+00 : f32
    %89 = vector.broadcast %cst_81 : f32 to vector<64x32xf32>
    %90 = arith.maximumf %88, %89 : vector<64x32xf32>
    %91 = arith.truncf %90 : vector<64x32xf32> to vector<64x32xbf16>
    %c2_82 = arith.constant 2 : index
    %c0_83 = arith.constant 0 : index
    %c0_84 = arith.constant 0 : index
    %92 = vector.load %arg7[%c2_82, %c0_83, %c0_84] : memref<6x32x32xbf16, #tpu.memory_space<vmem>>, vector<1x32x32xbf16>
    %93 = vector.shape_cast %92 : vector<1x32x32xbf16> to vector<32x32xbf16>
    %cst_85 = arith.constant dense<0.000000e+00> : vector<64x32xf32>
    %94 = tpu.matmul %91, %93, %cst_85 {dimension_numbers = #tpu.dot_dimension_numbers<[1], [0], [0], [1], [0, 0, 1, 1], [], []>} : vector<64x32xbf16>, vector<32x32xbf16>, vector<64x32xf32> -> vector<64x32xf32>
    %c2_86 = arith.constant 2 : index
    %c0_87 = arith.constant 0 : index
    %c0_88 = arith.constant 0 : index
    %95 = vector.load %arg8[%c2_86, %c0_87, %c0_88] : memref<6x1x32xf32, #tpu.memory_space<vmem>>, vector<1x1x32xf32>
    %96 = vector.shape_cast %95 : vector<1x1x32xf32> to vector<1x32xf32>
    %97 = vector.broadcast %96 : vector<1x32xf32> to vector<64x32xf32>
    %98 = arith.addf %94, %97 : vector<64x32xf32>
    %99 = arith.addf %73, %98 : vector<64x32xf32>
    %100 = vector.broadcast %4 : vector<64x1xf32> to vector<64x32xf32>
    %101 = arith.mulf %99, %100 : vector<64x32xf32>
    %102 = arith.truncf %101 : vector<64x32xf32> to vector<64x32xbf16>
    %c0_89 = arith.constant 0 : index
    %c0_90 = arith.constant 0 : index
    %c0_91 = arith.constant 0 : index
    %103 = vector.load %arg9[%c0_89, %c0_90, %c0_91] : memref<2x32x128xbf16, #tpu.memory_space<vmem>>, vector<1x32x128xbf16>
    %104 = vector.shape_cast %103 : vector<1x32x128xbf16> to vector<32x128xbf16>
    %cst_92 = arith.constant dense<0.000000e+00> : vector<64x128xf32>
    %105 = tpu.matmul %102, %104, %cst_92 {dimension_numbers = #tpu.dot_dimension_numbers<[1], [0], [0], [1], [0, 0, 1, 1], [], []>} : vector<64x32xbf16>, vector<32x128xbf16>, vector<64x128xf32> -> vector<64x128xf32>
    %c0_93 = arith.constant 0 : index
    %c0_94 = arith.constant 0 : index
    %c0_95 = arith.constant 0 : index
    %106 = vector.load %arg10[%c0_93, %c0_94, %c0_95] : memref<2x1x128xf32, #tpu.memory_space<vmem>>, vector<1x1x128xf32>
    %107 = vector.shape_cast %106 : vector<1x1x128xf32> to vector<1x128xf32>
    %108 = vector.broadcast %107 : vector<1x128xf32> to vector<64x128xf32>
    %109 = arith.addf %105, %108 : vector<64x128xf32>
    %110 = vector.broadcast %4 : vector<64x1xf32> to vector<64x128xf32>
    %111 = arith.mulf %109, %110 : vector<64x128xf32>
    %112 = arith.addf %9, %101 : vector<64x32xf32>
    %113 = arith.addf %10, %111 : vector<64x128xf32>
    %c1_96 = arith.constant 1 : index
    %c0_97 = arith.constant 0 : index
    %c0_98 = arith.constant 0 : index
    %114 = vector.load %arg3[%c1_96, %c0_97, %c0_98] : memref<2x8x32xbf16, #tpu.memory_space<vmem>>, vector<1x8x32xbf16>
    %115 = vector.shape_cast %114 : vector<1x8x32xbf16> to vector<8x32xbf16>
    %cst_99 = arith.constant dense<0.000000e+00> : vector<64x32xf32>
    %116 = tpu.matmul %2, %115, %cst_99 {dimension_numbers = #tpu.dot_dimension_numbers<[1], [0], [0], [1], [0, 0, 1, 1], [], []>} : vector<64x8xbf16>, vector<8x32xbf16>, vector<64x32xf32> -> vector<64x32xf32>
    %c1_100 = arith.constant 1 : index
    %c0_101 = arith.constant 0 : index
    %c0_102 = arith.constant 0 : index
    %117 = vector.load %arg4[%c1_100, %c0_101, %c0_102] : memref<2x1x32xf32, #tpu.memory_space<vmem>>, vector<1x1x32xf32>
    %118 = vector.shape_cast %117 : vector<1x1x32xf32> to vector<1x32xf32>
    %119 = vector.broadcast %118 : vector<1x32xf32> to vector<64x32xf32>
    %120 = arith.addf %116, %119 : vector<64x32xf32>
    %c8_103 = arith.constant 8 : index
    %c0_104 = arith.constant 0 : index
    %121 = vector.load %arg13[%c8_103, %c0_104] : memref<80x32xf32, #tpu.memory_space<vmem>>, vector<64x32xf32>
    tpu.vector_store %arg13[%c8_103, %c0_104], %120 {strides = array<i32>} : memref<80x32xf32, #tpu.memory_space<vmem>>, vector<64x32xf32>,
    %c6_105 = arith.constant 6 : index
    %c0_106 = arith.constant 0 : index
    %122 = vector.load %arg13[%c6_105, %c0_106] : memref<80x32xf32, #tpu.memory_space<vmem>>, vector<64x32xf32>
    %c7_107 = arith.constant 7 : index
    %c0_108 = arith.constant 0 : index
    %123 = vector.load %arg13[%c7_107, %c0_108] : memref<80x32xf32, #tpu.memory_space<vmem>>, vector<64x32xf32>
    %c8_109 = arith.constant 8 : index
    %c0_110 = arith.constant 0 : index
    %124 = vector.load %arg13[%c8_109, %c0_110] : memref<80x32xf32, #tpu.memory_space<vmem>>, vector<64x32xf32>
    %c9_111 = arith.constant 9 : index
    %c0_112 = arith.constant 0 : index
    %125 = vector.load %arg13[%c9_111, %c0_112] : memref<80x32xf32, #tpu.memory_space<vmem>>, vector<64x32xf32>
    %c10_113 = arith.constant 10 : index
    %c0_114 = arith.constant 0 : index
    %126 = vector.load %arg13[%c10_113, %c0_114] : memref<80x32xf32, #tpu.memory_space<vmem>>, vector<64x32xf32>
    %127 = tpu.concatenate %122, %123, %124, %125, %126 in 1 : vector<64x32xf32>, vector<64x32xf32>, vector<64x32xf32>, vector<64x32xf32>, vector<64x32xf32> -> vector<64x160xf32>
    %128 = arith.truncf %127 : vector<64x160xf32> to vector<64x160xbf16>
    %c3 = arith.constant 3 : index
    %c0_115 = arith.constant 0 : index
    %c0_116 = arith.constant 0 : index
    %129 = vector.load %arg5[%c3, %c0_115, %c0_116] : memref<6x160x32xbf16, #tpu.memory_space<vmem>>, vector<1x160x32xbf16>
    %130 = vector.shape_cast %129 : vector<1x160x32xbf16> to vector<160x32xbf16>
    %cst_117 = arith.constant dense<0.000000e+00> : vector<64x32xf32>
    %131 = tpu.matmul %128, %130, %cst_117 {dimension_numbers = #tpu.dot_dimension_numbers<[1], [0], [0], [1], [0, 0, 1, 1], [], []>} : vector<64x160xbf16>, vector<160x32xbf16>, vector<64x32xf32> -> vector<64x32xf32>
    %c3_118 = arith.constant 3 : index
    %c0_119 = arith.constant 0 : index
    %c0_120 = arith.constant 0 : index
    %132 = vector.load %arg6[%c3_118, %c0_119, %c0_120] : memref<6x1x32xf32, #tpu.memory_space<vmem>>, vector<1x1x32xf32>
    %133 = vector.shape_cast %132 : vector<1x1x32xf32> to vector<1x32xf32>
    %134 = vector.broadcast %133 : vector<1x32xf32> to vector<64x32xf32>
    %135 = arith.addf %131, %134 : vector<64x32xf32>
    %cst_121 = arith.constant 0.000000e+00 : f32
    %136 = vector.broadcast %cst_121 : f32 to vector<64x32xf32>
    %137 = arith.maximumf %135, %136 : vector<64x32xf32>
    %138 = arith.truncf %137 : vector<64x32xf32> to vector<64x32xbf16>
    %c3_122 = arith.constant 3 : index
    %c0_123 = arith.constant 0 : index
    %c0_124 = arith.constant 0 : index
    %139 = vector.load %arg7[%c3_122, %c0_123, %c0_124] : memref<6x32x32xbf16, #tpu.memory_space<vmem>>, vector<1x32x32xbf16>
    %140 = vector.shape_cast %139 : vector<1x32x32xbf16> to vector<32x32xbf16>
    %cst_125 = arith.constant dense<0.000000e+00> : vector<64x32xf32>
    %141 = tpu.matmul %138, %140, %cst_125 {dimension_numbers = #tpu.dot_dimension_numbers<[1], [0], [0], [1], [0, 0, 1, 1], [], []>} : vector<64x32xbf16>, vector<32x32xbf16>, vector<64x32xf32> -> vector<64x32xf32>
    %c3_126 = arith.constant 3 : index
    %c0_127 = arith.constant 0 : index
    %c0_128 = arith.constant 0 : index
    %142 = vector.load %arg8[%c3_126, %c0_127, %c0_128] : memref<6x1x32xf32, #tpu.memory_space<vmem>>, vector<1x1x32xf32>
    %143 = vector.shape_cast %142 : vector<1x1x32xf32> to vector<1x32xf32>
    %144 = vector.broadcast %143 : vector<1x32xf32> to vector<64x32xf32>
    %145 = arith.addf %141, %144 : vector<64x32xf32>
    %146 = arith.addf %120, %145 : vector<64x32xf32>
    %147 = vector.broadcast %4 : vector<64x1xf32> to vector<64x32xf32>
    %148 = arith.mulf %146, %147 : vector<64x32xf32>
    %c8_129 = arith.constant 8 : index
    %c0_130 = arith.constant 0 : index
    %149 = vector.load %arg13[%c8_129, %c0_130] : memref<80x32xf32, #tpu.memory_space<vmem>>, vector<64x32xf32>
    tpu.vector_store %arg13[%c8_129, %c0_130], %148 {strides = array<i32>} : memref<80x32xf32, #tpu.memory_space<vmem>>, vector<64x32xf32>,
    %c4_131 = arith.constant 4 : index
    %c0_132 = arith.constant 0 : index
    %150 = vector.load %arg13[%c4_131, %c0_132] : memref<80x32xf32, #tpu.memory_space<vmem>>, vector<64x32xf32>
    %c6_133 = arith.constant 6 : index
    %c0_134 = arith.constant 0 : index
    %151 = vector.load %arg13[%c6_133, %c0_134] : memref<80x32xf32, #tpu.memory_space<vmem>>, vector<64x32xf32>
    %c8_135 = arith.constant 8 : index
    %c0_136 = arith.constant 0 : index
    %152 = vector.load %arg13[%c8_135, %c0_136] : memref<80x32xf32, #tpu.memory_space<vmem>>, vector<64x32xf32>
    %c10_137 = arith.constant 10 : index
    %c0_138 = arith.constant 0 : index
    %153 = vector.load %arg13[%c10_137, %c0_138] : memref<80x32xf32, #tpu.memory_space<vmem>>, vector<64x32xf32>
    %c12_139 = arith.constant 12 : index
    %c0_140 = arith.constant 0 : index
    %154 = vector.load %arg13[%c12_139, %c0_140] : memref<80x32xf32, #tpu.memory_space<vmem>>, vector<64x32xf32>
    %155 = tpu.concatenate %150, %151, %152, %153, %154 in 1 : vector<64x32xf32>, vector<64x32xf32>, vector<64x32xf32>, vector<64x32xf32>, vector<64x32xf32> -> vector<64x160xf32>
    %156 = arith.truncf %155 : vector<64x160xf32> to vector<64x160xbf16>
    %c4_141 = arith.constant 4 : index
    %c0_142 = arith.constant 0 : index
    %c0_143 = arith.constant 0 : index
    %157 = vector.load %arg5[%c4_141, %c0_142, %c0_143] : memref<6x160x32xbf16, #tpu.memory_space<vmem>>, vector<1x160x32xbf16>
    %158 = vector.shape_cast %157 : vector<1x160x32xbf16> to vector<160x32xbf16>
    %cst_144 = arith.constant dense<0.000000e+00> : vector<64x32xf32>
    %159 = tpu.matmul %156, %158, %cst_144 {dimension_numbers = #tpu.dot_dimension_numbers<[1], [0], [0], [1], [0, 0, 1, 1], [], []>} : vector<64x160xbf16>, vector<160x32xbf16>, vector<64x32xf32> -> vector<64x32xf32>
    %c4_145 = arith.constant 4 : index
    %c0_146 = arith.constant 0 : index
    %c0_147 = arith.constant 0 : index
    %160 = vector.load %arg6[%c4_145, %c0_146, %c0_147] : memref<6x1x32xf32, #tpu.memory_space<vmem>>, vector<1x1x32xf32>
    %161 = vector.shape_cast %160 : vector<1x1x32xf32> to vector<1x32xf32>
    %162 = vector.broadcast %161 : vector<1x32xf32> to vector<64x32xf32>
    %163 = arith.addf %159, %162 : vector<64x32xf32>
    %cst_148 = arith.constant 0.000000e+00 : f32
    %164 = vector.broadcast %cst_148 : f32 to vector<64x32xf32>
    %165 = arith.maximumf %163, %164 : vector<64x32xf32>
    %166 = arith.truncf %165 : vector<64x32xf32> to vector<64x32xbf16>
    %c4_149 = arith.constant 4 : index
    %c0_150 = arith.constant 0 : index
    %c0_151 = arith.constant 0 : index
    %167 = vector.load %arg7[%c4_149, %c0_150, %c0_151] : memref<6x32x32xbf16, #tpu.memory_space<vmem>>, vector<1x32x32xbf16>
    %168 = vector.shape_cast %167 : vector<1x32x32xbf16> to vector<32x32xbf16>
    %cst_152 = arith.constant dense<0.000000e+00> : vector<64x32xf32>
    %169 = tpu.matmul %166, %168, %cst_152 {dimension_numbers = #tpu.dot_dimension_numbers<[1], [0], [0], [1], [0, 0, 1, 1], [], []>} : vector<64x32xbf16>, vector<32x32xbf16>, vector<64x32xf32> -> vector<64x32xf32>
    %c4_153 = arith.constant 4 : index
    %c0_154 = arith.constant 0 : index
    %c0_155 = arith.constant 0 : index
    %170 = vector.load %arg8[%c4_153, %c0_154, %c0_155] : memref<6x1x32xf32, #tpu.memory_space<vmem>>, vector<1x1x32xf32>
    %171 = vector.shape_cast %170 : vector<1x1x32xf32> to vector<1x32xf32>
    %172 = vector.broadcast %171 : vector<1x32xf32> to vector<64x32xf32>
    %173 = arith.addf %169, %172 : vector<64x32xf32>
    %174 = arith.addf %148, %173 : vector<64x32xf32>
    %175 = vector.broadcast %4 : vector<64x1xf32> to vector<64x32xf32>
    %176 = arith.mulf %174, %175 : vector<64x32xf32>
    %c8_156 = arith.constant 8 : index
    %c0_157 = arith.constant 0 : index
    %177 = vector.load %arg13[%c8_156, %c0_157] : memref<80x32xf32, #tpu.memory_space<vmem>>, vector<64x32xf32>
    tpu.vector_store %arg13[%c8_156, %c0_157], %176 {strides = array<i32>} : memref<80x32xf32, #tpu.memory_space<vmem>>, vector<64x32xf32>,
    %c0_158 = arith.constant 0 : index
    %c0_159 = arith.constant 0 : index
    %178 = vector.load %arg13[%c0_158, %c0_159] : memref<80x32xf32, #tpu.memory_space<vmem>>, vector<64x32xf32>
    %c4_160 = arith.constant 4 : index
    %c0_161 = arith.constant 0 : index
    %179 = vector.load %arg13[%c4_160, %c0_161] : memref<80x32xf32, #tpu.memory_space<vmem>>, vector<64x32xf32>
    %c8_162 = arith.constant 8 : index
    %c0_163 = arith.constant 0 : index
    %180 = vector.load %arg13[%c8_162, %c0_163] : memref<80x32xf32, #tpu.memory_space<vmem>>, vector<64x32xf32>
    %c12_164 = arith.constant 12 : index
    %c0_165 = arith.constant 0 : index
    %181 = vector.load %arg13[%c12_164, %c0_165] : memref<80x32xf32, #tpu.memory_space<vmem>>, vector<64x32xf32>
    %c16_166 = arith.constant 16 : index
    %c0_167 = arith.constant 0 : index
    %182 = vector.load %arg13[%c16_166, %c0_167] : memref<80x32xf32, #tpu.memory_space<vmem>>, vector<64x32xf32>
    %183 = tpu.concatenate %178, %179, %180, %181, %182 in 1 : vector<64x32xf32>, vector<64x32xf32>, vector<64x32xf32>, vector<64x32xf32>, vector<64x32xf32> -> vector<64x160xf32>
    %184 = arith.truncf %183 : vector<64x160xf32> to vector<64x160xbf16>
    %c5 = arith.constant 5 : index
    %c0_168 = arith.constant 0 : index
    %c0_169 = arith.constant 0 : index
    %185 = vector.load %arg5[%c5, %c0_168, %c0_169] : memref<6x160x32xbf16, #tpu.memory_space<vmem>>, vector<1x160x32xbf16>
    %186 = vector.shape_cast %185 : vector<1x160x32xbf16> to vector<160x32xbf16>
    %cst_170 = arith.constant dense<0.000000e+00> : vector<64x32xf32>
    %187 = tpu.matmul %184, %186, %cst_170 {dimension_numbers = #tpu.dot_dimension_numbers<[1], [0], [0], [1], [0, 0, 1, 1], [], []>} : vector<64x160xbf16>, vector<160x32xbf16>, vector<64x32xf32> -> vector<64x32xf32>
    %c5_171 = arith.constant 5 : index
    %c0_172 = arith.constant 0 : index
    %c0_173 = arith.constant 0 : index
    %188 = vector.load %arg6[%c5_171, %c0_172, %c0_173] : memref<6x1x32xf32, #tpu.memory_space<vmem>>, vector<1x1x32xf32>
    %189 = vector.shape_cast %188 : vector<1x1x32xf32> to vector<1x32xf32>
    %190 = vector.broadcast %189 : vector<1x32xf32> to vector<64x32xf32>
    %191 = arith.addf %187, %190 : vector<64x32xf32>
    %cst_174 = arith.constant 0.000000e+00 : f32
    %192 = vector.broadcast %cst_174 : f32 to vector<64x32xf32>
    %193 = arith.maximumf %191, %192 : vector<64x32xf32>
    %194 = arith.truncf %193 : vector<64x32xf32> to vector<64x32xbf16>
    %c5_175 = arith.constant 5 : index
    %c0_176 = arith.constant 0 : index
    %c0_177 = arith.constant 0 : index
    %195 = vector.load %arg7[%c5_175, %c0_176, %c0_177] : memref<6x32x32xbf16, #tpu.memory_space<vmem>>, vector<1x32x32xbf16>
    %196 = vector.shape_cast %195 : vector<1x32x32xbf16> to vector<32x32xbf16>
    %cst_178 = arith.constant dense<0.000000e+00> : vector<64x32xf32>
    %197 = tpu.matmul %194, %196, %cst_178 {dimension_numbers = #tpu.dot_dimension_numbers<[1], [0], [0], [1], [0, 0, 1, 1], [], []>} : vector<64x32xbf16>, vector<32x32xbf16>, vector<64x32xf32> -> vector<64x32xf32>
    %c5_179 = arith.constant 5 : index
    %c0_180 = arith.constant 0 : index
    %c0_181 = arith.constant 0 : index
    %198 = vector.load %arg8[%c5_179, %c0_180, %c0_181] : memref<6x1x32xf32, #tpu.memory_space<vmem>>, vector<1x1x32xf32>
    %199 = vector.shape_cast %198 : vector<1x1x32xf32> to vector<1x32xf32>
    %200 = vector.broadcast %199 : vector<1x32xf32> to vector<64x32xf32>
    %201 = arith.addf %197, %200 : vector<64x32xf32>
    %202 = arith.addf %176, %201 : vector<64x32xf32>
    %203 = vector.broadcast %4 : vector<64x1xf32> to vector<64x32xf32>
    %204 = arith.mulf %202, %203 : vector<64x32xf32>
    %205 = arith.truncf %204 : vector<64x32xf32> to vector<64x32xbf16>
    %c1_182 = arith.constant 1 : index
    %c0_183 = arith.constant 0 : index
    %c0_184 = arith.constant 0 : index
    %206 = vector.load %arg9[%c1_182, %c0_183, %c0_184] : memref<2x32x128xbf16, #tpu.memory_space<vmem>>, vector<1x32x128xbf16>
    %207 = vector.shape_cast %206 : vector<1x32x128xbf16> to vector<32x128xbf16>
    %cst_185 = arith.constant dense<0.000000e+00> : vector<64x128xf32>
    %208 = tpu.matmul %205, %207, %cst_185 {dimension_numbers = #tpu.dot_dimension_numbers<[1], [0], [0], [1], [0, 0, 1, 1], [], []>} : vector<64x32xbf16>, vector<32x128xbf16>, vector<64x128xf32> -> vector<64x128xf32>
    %c1_186 = arith.constant 1 : index
    %c0_187 = arith.constant 0 : index
    %c0_188 = arith.constant 0 : index
    %209 = vector.load %arg10[%c1_186, %c0_187, %c0_188] : memref<2x1x128xf32, #tpu.memory_space<vmem>>, vector<1x1x128xf32>
    %210 = vector.shape_cast %209 : vector<1x1x128xf32> to vector<1x128xf32>
    %211 = vector.broadcast %210 : vector<1x128xf32> to vector<64x128xf32>
    %212 = arith.addf %208, %211 : vector<64x128xf32>
    %213 = vector.broadcast %4 : vector<64x1xf32> to vector<64x128xf32>
    %214 = arith.mulf %212, %213 : vector<64x128xf32>
    %215 = arith.addf %112, %204 : vector<64x32xf32>
    %216 = arith.addf %113, %214 : vector<64x128xf32>
    %c0_189 = arith.constant 0 : index
    %c0_190 = arith.constant 0 : index
    %c0_191 = arith.constant 0 : index
    %217 = vector.load %arg11[%c0_189, %c0_190, %c0_191] : memref<1x64x32xf32, #tpu.memory_space<vmem>>, vector<1x64x32xf32>
    %218 = vector.shape_cast %217 : vector<1x64x32xf32> to vector<64x32xf32>
    %219 = vector.shape_cast %215 : vector<64x32xf32> to vector<1x64x32xf32>
    tpu.vector_store %arg11[%c0_189, %c0_190, %c0_191], %219 {strides = array<i32>} : memref<1x64x32xf32, #tpu.memory_space<vmem>>, vector<1x64x32xf32>,
    %c0_192 = arith.constant 0 : index
    %c0_193 = arith.constant 0 : index
    %c0_194 = arith.constant 0 : index
    %220 = vector.load %arg12[%c0_192, %c0_193, %c0_194] : memref<1x64x128xf32, #tpu.memory_space<vmem>>, vector<1x64x128xf32>
    %221 = vector.shape_cast %220 : vector<1x64x128xf32> to vector<64x128xf32>
    %222 = vector.shape_cast %216 : vector<64x128xf32> to vector<1x64x128xf32>
    tpu.vector_store %arg12[%c0_192, %c0_193, %c0_194], %222 {strides = array<i32>} : memref<1x64x128xf32, #tpu.memory_space<vmem>>, vector<1x64x128xf32>,
    return
  }
  func.func @transform_0(%arg0: i32) -> (i32, i32, i32) {
    %c0_i32 = arith.constant 0 : i32
    %c0_i32_0 = arith.constant 0 : i32
    %c0_i32_1 = arith.constant 0 : i32
    return %arg0, %c0_i32, %c0_i32_0 : i32, i32, i32
  }
  func.func @transform_1(%arg0: i32) -> (i32, i32, i32) {
    %c0_i32 = arith.constant 0 : i32
    %c0_i32_0 = arith.constant 0 : i32
    %c0_i32_1 = arith.constant 0 : i32
    return %arg0, %c0_i32, %c0_i32_0 : i32, i32, i32
  }
  func.func @transform_2(%arg0: i32) -> (i32, i32, i32) {
    %c0_i32 = arith.constant 0 : i32
    %c0_i32_0 = arith.constant 0 : i32
    %c0_i32_1 = arith.constant 0 : i32
    %c0_i32_2 = arith.constant 0 : i32
    return %c0_i32, %c0_i32_0, %c0_i32_1 : i32, i32, i32
  }
  func.func @transform_3(%arg0: i32) -> (i32, i32, i32) {
    %c0_i32 = arith.constant 0 : i32
    %c0_i32_0 = arith.constant 0 : i32
    %c0_i32_1 = arith.constant 0 : i32
    %c0_i32_2 = arith.constant 0 : i32
    return %c0_i32, %c0_i32_0, %c0_i32_1 : i32, i32, i32
  }
  func.func @transform_4(%arg0: i32) -> (i32, i32, i32) {
    %c0_i32 = arith.constant 0 : i32
    %c0_i32_0 = arith.constant 0 : i32
    %c0_i32_1 = arith.constant 0 : i32
    %c0_i32_2 = arith.constant 0 : i32
    return %c0_i32, %c0_i32_0, %c0_i32_1 : i32, i32, i32
  }
  func.func @transform_5(%arg0: i32) -> (i32, i32, i32) {
    %c0_i32 = arith.constant 0 : i32
    %c0_i32_0 = arith.constant 0 : i32
    %c0_i32_1 = arith.constant 0 : i32
    %c0_i32_2 = arith.constant 0 : i32
    return %c0_i32, %c0_i32_0, %c0_i32_1 : i32, i32, i32
  }
  func.func @transform_6(%arg0: i32) -> (i32, i32, i32) {
    %c0_i32 = arith.constant 0 : i32
    %c0_i32_0 = arith.constant 0 : i32
    %c0_i32_1 = arith.constant 0 : i32
    %c0_i32_2 = arith.constant 0 : i32
    return %c0_i32, %c0_i32_0, %c0_i32_1 : i32, i32, i32
  }
  func.func @transform_7(%arg0: i32) -> (i32, i32, i32) {
    %c0_i32 = arith.constant 0 : i32
    %c0_i32_0 = arith.constant 0 : i32
    %c0_i32_1 = arith.constant 0 : i32
    %c0_i32_2 = arith.constant 0 : i32
    return %c0_i32, %c0_i32_0, %c0_i32_1 : i32, i32, i32
  }
  func.func @transform_8(%arg0: i32) -> (i32, i32, i32) {
    %c0_i32 = arith.constant 0 : i32
    %c0_i32_0 = arith.constant 0 : i32
    %c0_i32_1 = arith.constant 0 : i32
    %c0_i32_2 = arith.constant 0 : i32
    return %c0_i32, %c0_i32_0, %c0_i32_1 : i32, i32, i32
  }
  func.func @transform_9(%arg0: i32) -> (i32, i32, i32) {
    %c0_i32 = arith.constant 0 : i32
    %c0_i32_0 = arith.constant 0 : i32
    %c0_i32_1 = arith.constant 0 : i32
    %c0_i32_2 = arith.constant 0 : i32
    return %c0_i32, %c0_i32_0, %c0_i32_1 : i32, i32, i32
  }
  func.func @transform_10(%arg0: i32) -> (i32, i32, i32) {
    %c0_i32 = arith.constant 0 : i32
    %c0_i32_0 = arith.constant 0 : i32
    %c0_i32_1 = arith.constant 0 : i32
    return %arg0, %c0_i32, %c0_i32_0 : i32, i32, i32
  }
  func.func @transform_11(%arg0: i32) -> (i32, i32, i32) {
    %c0_i32 = arith.constant 0 : i32
    %c0_i32_0 = arith.constant 0 : i32
    %c0_i32_1 = arith.constant 0 : i32
    return %arg0, %c0_i32, %c0_i32_0 : i32, i32, i32
  }
}

</mosaic_0001>

<bundles_post_ra>
// kernel: tower_forward.1
= control target key start
LH: loop header
LB: loop body
LE: loop exit
PB: predicated region body
PF: predicated region fallthrough
CT: control target
= control target key end

     0   :  { %s4798_s17 = smov 0   ;;  %s5959_s0 = inlined_call_operand.vmem [shape: f32[2,64,8], index: 0, kind: input, shape index: {}]   ;;  %s5960_s1 = inlined_call_operand.vmem [shape: f32[2,64,1], index: 1, kind: input, shape index: {}]   ;;  %s5961_s2 = inlined_call_operand.vmem [shape: bf16[2,8,32], index: 2, kind: input, shape index: {}]   ;;  %s5962_s3 = inlined_call_operand.vmem [shape: f32[2,1,32], index: 3, kind: input, shape index: {}]   ;;  %s5963_s4 = inlined_call_operand.vmem [shape: bf16[6,160,32], index: 4, kind: input, shape index: {}]   ;;  %s5964_s5 = inlined_call_operand.vmem [shape: f32[6,1,32], index: 5, kind: input, shape index: {}]   ;;  %s5965_s6 = inlined_call_operand.vmem [shape: bf16[6,32,32], index: 6, kind: input, shape index: {}]   ;;  %s5966_s7 = inlined_call_operand.vmem [shape: f32[6,1,32], index: 7, kind: input, shape index: {}]   ;;  %s5967_s8 = inlined_call_operand.vmem [shape: bf16[2,32,128], index: 8, kind: input, shape index: {}]   ;;  %s5968_s9 = inlined_call_operand.vmem [shape: f32[2,1,128], index: 9, kind: input, shape index: {}]   ;;  %s5969_s10 = inlined_call_operand.vmem [shape: f32[2,64,32], index: 10, kind: output, shape index: {0}]   ;;  %s5970_s11 = inlined_call_operand.vmem [shape: f32[2,64,128], index: 11, kind: output, shape index: {1}]  }
   0x1 LB: > { %s3786_s18 = sadd.s32 4294967295, %s4731_s17   ;;  %p3790_p0 = scmp.ge.s32.totalorder %s4731_s17, 1  ;;  %s4731_s17 = sphi %s4798_s17, %s22_s17  }
   0x2   : > { %p350_p1 = scmp.lt.s32.totalorder %s4731_s17, 3 }
   0x4   : > { %p351_p2 = pnand %p3790_p0, %p350_p1 }
   0x5   : > { %v444_v0 = vld [vmem:[%s5961_s2] sm:$0xf] (!%p351_p2)  ;;  %vm465_vm0 = vcmask (!%p351_p2), 1043456   ;;  %p400_p3 = scmp.lt.s32.totalorder (!%p351_p2), %s3786_s18, 1  ;;  %vm452_vm1 = vcmask (!%p351_p2), 64512   ;;  %vm441_vm2 = vcmask (!%p351_p2), 261120  }
   0x6   : > { %354 = sbr.rel (%p351_p2) target bundleno = 4233 (0x1089), region = 60  ;;  %4272 = vmatprep.subr.msk.bf16.mxu0 (!%p351_p2), %vm465_vm0, %v444_v0  ;;  %v467_v1 = vsel (!%p351_p2), %vm465_vm0, %v444_v0, 0  ;;  %v4733_v14 = vmov (!%p351_p2), 0.0   ;;  %v4649_v15 = vld [vmem:[%s5963_s4] sm:$0xff] (!%p351_p2)   ;;  %v4734_v16 = vmov (!%p351_p2), 0   ;;  %v4650_v17 = vld [vmem:[%s5963_s4 + $0x8] sm:$0xff] (!%p351_p2)  }
   0x7   : > { %4157 = vmatpush3.bf16.msra.mxu0 (!%p351_p2), %v467_v1  ;;  %442 = vst.msk [vmem:[#allocation2] sm:$0xff] (!%p351_p2), %vm441_vm2, %v4733_v14  ;;  %443 = vst.msk [vmem:[#allocation2 + $0x48] sm:$0xff] (!%p351_p2), %vm441_vm2, %v4733_v14  ;;  %811 = vmatprep.subr.bf16.mxu1 (!%p351_p2), %v4734_v16  ;;  %v4651_v18 = vld [vmem:[%s5963_s4 + $0x10] sm:$0xff] (!%p351_p2)   ;;  %v4652_v19 = vld [vmem:[%s5963_s4 + $0x18] sm:$0xff] (!%p351_p2)   ;;  %s4735_s30 = smov (!%p351_p2), 96   ;;  %s4736_s12 = smov (!%p351_p2), 32  }
   0x8   : > { %4348 = vset.pattern.permute.xlu1 (!%p351_p2), %v4734_v16  ;;  %812 = vmatpush1.bf16.msra.mxu1 (!%p351_p2), %v4649_v15  ;;  %v4653_v20 = vld [vmem:[%s5963_s4 + $0x20] sm:$0xff] (!%p351_p2)   ;;  %v4654_v21 = vld [vmem:[%s5963_s4 + $0x28] sm:$0xff] (!%p351_p2)   ;;  %v4655_v22 = vld [vmem:[%s5963_s4 + $0x30] sm:$0xff] (!%p351_p2)   ;;  %s4737_s13 = smov (!%p351_p2), 64   ;;  %vm686_vm3 = vcmask (!%p351_p2), 523264   ;;  %vm695_vm4 = vcmask (!%p351_p2), 785408  }
   0x9   : > { %4347 = vset.pattern.permute.xlu0 (!%p351_p2), %v4734_v16  ;;  %813 = vmatprep.subr.bf16.mxu1 (!%p351_p2), %v4734_v16  ;;  %v4656_v23 = vld [vmem:[%s5963_s4 + $0x38] sm:$0xff] (!%p351_p2)   ;;  %v3799_v24 = vld [vmem:[%s5962_s3] ss:$0 sm:$0xff] (!%p351_p2)  ;;  %v4658_v53 = vld [vmem:[%s5963_s4 + $0x48] sm:$0xff] (!%p351_p2)  }
   0xa   : > { %v4657_v33 = vld [vmem:[%s5963_s4 + $0x40] sm:$0xff] (!%p351_p2)  }
   0xc   : > { %814 = vmatpush1.bf16.msra.mxu1 (!%p351_p2), %v4650_v17 }
   0xd   : > { %s5972_s18 = smov (!%p400_p3, %s3786_s18), 1  ;;  %815 = vmatprep.subr.bf16.mxu1 %v4734_v16 }
   0xe   : > { %s4811_s21 = sshll.u32 %s5972_s18, 6 }
   0xf   : > { %s404_s24 = scalar_lea.vmem %s5959_s0, %s4811_s21  ;;  %s409_s22 = scalar_lea.vmem %s5960_s1, %s4811_s21 }
  0x10   : > { %v421_v2 = vld [vmem:[%s404_s24] sm:$0xff]  ;;  %v422_v3 = vld [vmem:[%s404_s24 + $0x8] sm:$0xff]  ;;  %v423_v4 = vld [vmem:[%s404_s24 + $0x10] sm:$0xff]  ;;  %816 = vmatpush1.bf16.msra.mxu1 %v4651_v18 }
  0x11   : > { %v4817_v5 = vpack.c.bf16 %v422_v3, %v421_v2  ;;  %v424_v6 = vld [vmem:[%s404_s24 + $0x18] sm:$0xff]  ;;  %v425_v7 = vld [vmem:[%s404_s24 + $0x20] sm:$0xff]  ;;  %v426_v8 = vld [vmem:[%s404_s24 + $0x28] sm:$0xff]  ;;  %817 = vmatprep.subr.bf16.mxu1 %v4734_v16 }
  0x12   : > { %v4819_v9 = vpack.c.bf16 %v424_v6, %v423_v4  ;;  %v4821_v10 = vpack.c.bf16 %v426_v8, %v425_v7  ;;  %v427_v11 = vld [vmem:[%s404_s24 + $0x30] sm:$0xff]  ;;  %v428_v12 = vld [vmem:[%s404_s24 + $0x38] sm:$0xff]  ;;  %s5870_s24 = scalar_lea.vmem %s5969_s10, %s4811_s21 }
  0x13   : > { %4158 = vmatprep.mubr.msk.bf16.mxu0 %vm452_vm1, %v4817_v5  ;;  %v4829_v13 = vpack.c.bf16 %v428_v12, %v427_v11 }
  0x14   : > { %4159 = vmatmul.mubr.msk.bf16.vlgmr.msra.gmra.mrb[0].mxu0 %vm452_vm1, %v4819_v9  ;;  %818 = vmatpush1.bf16.msra.mxu1 %v4652_v19 }
  0x15   : > { %4162 = vmatprep.mubr.msk.bf16.mxu0 %vm452_vm1, %v4821_v10  ;;  %819 = vmatprep.subr.bf16.mxu1 %v4734_v16 }
  0x18   : > { %820 = vmatpush1.bf16.msra.mxu1 %v4653_v20 }
  0x19   : > { %821 = vmatprep.subr.bf16.mxu1 %v4734_v16 }
  0x1c   : > { %4163 = vmatmul.mubr.msk.bf16.gmra.mrb[4].mxu0 %vm452_vm1, %v4829_v13  ;;  %822 = vmatpush1.bf16.msra.mxu1 %v4654_v21 }
  0x1d   : > { %823 = vmatprep.subr.bf16.mxu1 %v4734_v16 }
  0x20   : > { %824 = vmatpush1.bf16.msra.mxu1 %v4655_v22 }
  0x21   : > { %825 = vmatprep.subr.bf16.mxu1 %v4734_v16 }
  0x24   : > { %826 = vmatpush1.bf16.msra.mxu1 %v4656_v23 }
  0x25   : > { %827 = vmatprep.subr.bf16.mxu1 %v4734_v16 }
  0x28   : > { %828 = vmatpush1.bf16.msra.mxu1 %v4657_v33 }
  0x29   : > { %829 = vmatprep.subr.bf16.mxu1 %v4734_v16 }
  0x2c   : > { %830 = vmatpush1.bf16.msra.mxu1 %v4658_v53 }
  0xe7   : > { %v4160_v25 = vpop.f32.mrb[0].mxu0 }
  0xe8   : > { %v4873_v26 = vadd.f32 %v4160_v25, %v3799_v24  ;;  %v503_v27 = vpop.f32.mrb[1].mxu0 }
  0xe9   : > { %v4875_v28 = vadd.f32 %v3799_v24, %v503_v27  ;;  %v4161_v29 = vpop.f32.mrb[2].mxu0 }
  0xea   : > { %536 = vst.msk [vmem:[#allocation2 + $0x18] sm:$0xff] %vm441_vm2, %v4873_v26  ;;  %v4879_v30 = vadd.f32 %v4161_v29, %v3799_v24  ;;  %v506_v31 = vpop.f32.mrb[3].mxu0 }
  0xeb   : > { %534 = vst.msk [vmem:[#allocation2 + $0x8] sm:$0xff] %vm441_vm2, %v4875_v28  ;;  %v4883_v32 = vadd.f32 %v3799_v24, %v506_v31 }
  0xec   : > { %537 = vst.msk [vmem:[#allocation2 + $0x20] sm:$0xff] %vm441_vm2, %v4879_v30 }
  0xed   : > { %535 = vst.msk [vmem:[#allocation2 + $0x10] sm:$0xff] %vm441_vm2, %v4883_v32 }
  0xef   : > { %v4164_v34 = vpop.f32.mrb[4].mxu0 }
  0xf0   : > { %v4892_v35 = vadd.f32 %v4164_v34, %v3799_v24  ;;  %v519_v36 = vpop.f32.mrb[5].mxu0 }
  0xf1   : > { %v4894_v37 = vadd.f32 %v3799_v24, %v519_v36  ;;  %v4165_v38 = vpop.f32.mrb[6].mxu0  ;;  %v560_v0 = vld [vmem:[#allocation2 + $0x18] sm:$0xff] }
  0xf2   : > { %540 = vst.msk [vmem:[#allocation2 + $0x38] sm:$0xff] %vm441_vm2, %v4892_v35  ;;  %v4899_v39 = vadd.f32 %v4165_v38, %v3799_v24  ;;  %v522_v40 = vpop.f32.mrb[7].mxu0  ;;  %v550_v48 = vld [vmem:[#allocation2 + $0x7] sm:$0xff] }
  0xf3   : > { %538 = vst.msk [vmem:[#allocation2 + $0x28] sm:$0xff] %vm441_vm2, %v4894_v37  ;;  %v4903_v41 = vadd.f32 %v3799_v24, %v522_v40  ;;  %v553_v52 = vld [vmem:[#allocation2 + $0x1f] sm:$0xff]  ;;  %v558_v56 = vld [vmem:[#allocation2 + $0x8] sm:$0xff] }
  0xf4   : > { %541 = vst.msk [vmem:[#allocation2 + $0x40] sm:$0xff] %vm441_vm2, %v4899_v39  ;;  %v574_v42 = vld [vmem:[#allocation2 + $0xa] sm:$0xff]  ;;  %v575_v43 = vld [vmem:[#allocation2 + $0x12] sm:$0xff]  ;;  %v561_v59 = vld [vmem:[#allocation2 + $0x20] sm:$0xff] }
  0xf5   : > { %539 = vst.msk [vmem:[#allocation2 + $0x30] sm:$0xff] %vm441_vm2, %v4903_v41  ;;  %v566_v44 = vld [vmem:[#allocation2 + $0x9] sm:$0xff]  ;;  %v567_v45 = vld [vmem:[#allocation2 + $0x11] sm:$0xff]  ;;  %v705_v46 = vpack.c.bf16 %v575_v43, %v574_v42  ;;  %v568_v60 = vld [vmem:[#allocation2 + $0x19] sm:$0xff]  ;;  %v4297_v1 = vpack.i.bf16 %v561_v59, %v560_v0 }
  0xf6   : > { %v4302_v47 = vpack.i.bf16 %v567_v45, %v566_v44  ;;  %v551_v49 = vld [vmem:[#allocation2 + $0xf] sm:$0xff]  ;;  %v552_v51 = vld [vmem:[#allocation2 + $0x17] sm:$0xff]  ;;  %v542_v38 = vld [vmem:[#allocation2 + $0x6] sm:$0xff] }
  0xf7   : > { %v4287_v50 = vpack.i.bf16 %v551_v49, %v550_v48  ;;  %3815 = vmatprep.mubr.msk.bf16.mxu1 %vm441_vm2, %v705_v46  ;;  %v559_v54 = vld [vmem:[#allocation2 + $0x10] sm:$0xff]  ;;  %v4307_v55 = vpack.i.bf16 %v553_v52, %v552_v51  ;;  %v576_v51 = vld [vmem:[#allocation2 + $0x1a] sm:$0xff] }
  0xf8   : > { %4303 = vrot.lane.b32.xlu1 %v4302_v47, %s4735_s30  ;;  %v4292_v57 = vpack.i.bf16 %v559_v54, %v558_v56  ;;  %v543_v33 = vld [vmem:[#allocation2 + $0xe] sm:$0xff]  ;;  %v544_v56 = vld [vmem:[#allocation2 + $0x16] sm:$0xff] }
  0xf9   : > { %4288 = vrot.lane.b32.xlu0 %v4287_v50, %s4736_s12  ;;  %v564_v19 = vld [vmem:[#allocation2 + $0x38] sm:$0xff] }
  0xfa   : > { %v569_v58 = vld [vmem:[#allocation2 + $0x21] sm:$0xff] }
  0xfb   : > { %v562_v61 = vld [vmem:[#allocation2 + $0x28] sm:$0xff]  ;;  %v4312_v63 = vpack.i.bf16 %v569_v58, %v568_v60  ;;  %v557_v8 = vld [vmem:[#allocation2 + $0x3f] sm:$0xff] }
  0xfc   : > { %4308 = vrot.lane.b32.xlu1 %v4307_v55, %s4736_s12  ;;  %v563_v62 = vld [vmem:[#allocation2 + $0x30] sm:$0xff]  ;;  %v554_v4 = vld [vmem:[#allocation2 + $0x27] sm:$0xff]  ;;  %v572_v17 = vld [vmem:[#allocation2 + $0x39] sm:$0xff] }
  0xfd   : > { %4293 = vrot.lane.b32.xlu0 %v4292_v57, %s4737_s13  ;;  %v4322_v2 = vpack.i.bf16 %v563_v62, %v562_v61  ;;  %v555_v3 = vld [vmem:[#allocation2 + $0x2f] sm:$0xff]  ;;  %v556_v7 = vld [vmem:[#allocation2 + $0x37] sm:$0xff]  ;;  %v573_v18 = vld [vmem:[#allocation2 + $0x41] sm:$0xff] }
  0xfe   : > { %v4317_v6 = vpack.i.bf16 %v555_v3, %v554_v4  ;;  %v570_v11 = vld [vmem:[#allocation2 + $0x29] sm:$0xff]  ;;  %v571_v12 = vld [vmem:[#allocation2 + $0x31] sm:$0xff]  ;;  %v4337_v14 = vpack.i.bf16 %v557_v8, %v556_v7  ;;  %v565_v20 = vld [vmem:[#allocation2 + $0x40] sm:$0xff]  ;;  %v4342_v21 = vpack.i.bf16 %v573_v18, %v572_v17 }
  0xff   : > { %v4327_v15 = vpack.i.bf16 %v571_v12, %v570_v11  ;;  %v4332_v22 = vpack.i.bf16 %v565_v20, %v564_v19  ;;  %v577_v43 = vld [vmem:[#allocation2 + $0x22] sm:$0xff]  ;;  %v579_v7 = vld [vmem:[#allocation2 + $0x32] sm:$0xff] }
 0x100   : > { %4313 = vrot.lane.b32.xlu1 %v4312_v63, %s4735_s30  ;;  %v545_v55 = vld [vmem:[#allocation2 + $0x1e] sm:$0xff]  ;;  %v707_v60 = vpack.c.bf16 %v577_v43, %v576_v51  ;;  %v546_v17 = vld [vmem:[#allocation2 + $0x26] sm:$0xff]  ;;  %v547_v18 = vld [vmem:[#allocation2 + $0x2e] sm:$0xff] }
 0x101   : > { %4298 = vrot.lane.b32.xlu0 %v4297_v1, %s4737_s13 }
 0x104   : > { %4323 = vrot.lane.b32.xlu1 %v4322_v2, %s4737_s13 }
 0x105   : > { %4318 = vrot.lane.b32.xlu0 %v4317_v6, %s4736_s12  ;;  %v578_v6 = vld [vmem:[#allocation2 + $0x2a] sm:$0xff] }
 0x108   : > { %4338 = vrot.lane.b32.xlu1 %v4337_v14, %s4736_s12 }
 0x109   : > { %4328 = vrot.lane.b32.xlu0 %v4327_v15, %s4735_s30 }
 0x10c   : > { %4343 = vrot.lane.b32.xlu1 %v4342_v21, %s4735_s30 }
 0x10d   : > { %4333 = vrot.lane.b32.xlu0 %v4332_v22, %s4737_s13 }
 0x16a   : > { %v4304_v23 = vpop.permute.xlu1 %4303 }
 0x16b   : > { %v4289_v24 = vpop.permute.xlu0 %4288  ;;  %v4306_v34 = vunpack.i.h.bf16 %v4304_v23  ;;  %v4305_v36 = vunpack.i.l.bf16 %v4304_v23  ;;  %v709_v23 = vpack.c.bf16 %v579_v7, %v578_v6  ;;  %v439_v6 = vld [vmem:[%s409_s22 + $0x30] sm:$0xff]  ;;  %v440_v7 = vld [vmem:[%s409_s22 + $0x38] sm:$0xff] }
 0x16c   : > { %v4291_v25 = vunpack.i.h.bf16 %v4289_v24  ;;  %v4290_v27 = vunpack.i.l.bf16 %v4289_v24 }
 0x16e   : > { %v4309_v29 = vpop.permute.xlu1 %4308  ;;  %v678_v44 = vsel %vm441_vm2, %v542_v38, %v4290_v27  ;;  %v679_v45 = vsel %vm441_vm2, %v543_v33, %v4291_v25 }
 0x16f   : > { %v4294_v31 = vpop.permute.xlu0 %4293  ;;  %v4311_v46 = vunpack.i.h.bf16 %v4309_v29  ;;  %v4310_v47 = vunpack.i.l.bf16 %v4309_v29 }
 0x170   : > { %v4296_v40 = vunpack.i.h.bf16 %v4294_v31  ;;  %v4295_v42 = vunpack.i.l.bf16 %v4294_v31 }
 0x171   : > { %v681_v61 = vsel %vm441_vm2, %v545_v55, %v4311_v46  ;;  %v680_v62 = vsel %vm441_vm2, %v544_v56, %v4310_v47 }
 0x172   : > { %v687_v48 = vsel %vm686_vm3, %v678_v44, %v4295_v42  ;;  %v688_v49 = vsel %vm686_vm3, %v679_v45, %v4296_v40  ;;  %v4314_v50 = vpop.permute.xlu1 %4313  ;;  %v581_v44 = vld [vmem:[#allocation2 + $0x42] sm:$0xff] }
 0x173   : > { %v4299_v52 = vpop.permute.xlu0 %4298  ;;  %v696_v53 = vsel %vm695_vm4, %v687_v48, %v4305_v36  ;;  %v697_v54 = vsel %vm695_vm4, %v688_v49, %v4306_v34  ;;  %v4316_v63 = vunpack.i.h.bf16 %v4314_v50  ;;  %v4315_v0 = vunpack.i.l.bf16 %v4314_v50  ;;  %v580_v36 = vld [vmem:[#allocation2 + $0x3a] sm:$0xff] }
 0x174   : > { %v4301_v57 = vunpack.i.h.bf16 %v4299_v52  ;;  %v4300_v58 = vunpack.i.l.bf16 %v4299_v52  ;;  %v704_v59 = vpack.c.bf16 %v697_v54, %v696_v53  ;;  %v549_v48 = vld [vmem:[#allocation2 + $0x3e] sm:$0xff]  ;;  %v548_v49 = vld [vmem:[#allocation2 + $0x36] sm:$0xff]  ;;  %v711_v51 = vpack.c.bf16 %v581_v44, %v580_v36 }
 0x176   : > { %v690_v1 = vsel %vm686_vm3, %v681_v61, %v4301_v57  ;;  %v689_v2 = vsel %vm686_vm3, %v680_v62, %v4300_v58  ;;  %844 = vmatmul.mubr.bf16.vlgmr.msra.gmra.mrb[0].mxu1 %v704_v59  ;;  %v4324_v3 = vpop.permute.xlu1 %4323  ;;  %v4659_v61 = vld [vmem:[%s5965_s6] sm:$0xff]   ;;  %v4660_v62 = vld [vmem:[%s5965_s6 + $0x8] sm:$0xff]  }
 0x177   : > { %v4319_v4 = vpop.permute.xlu0 %4318  ;;  %3816 = vmatprep.mubr.msk.bf16.mxu1 %vm441_vm2, %v707_v60  ;;  %v698_v12 = vsel %vm695_vm4, %v689_v2, %v4315_v0  ;;  %v699_v14 = vsel %vm695_vm4, %v690_v1, %v4316_v63  ;;  %v4326_v19 = vunpack.i.h.bf16 %v4324_v3  ;;  %v4325_v20 = vunpack.i.l.bf16 %v4324_v3  ;;  %4166 = vmatprep.subr.bf16.mxu0 %v4659_v61  ;;  %v434_v63 = vld [vmem:[%s409_s22 + $0x8] sm:$0xff]  ;;  %v433_v0 = vld [vmem:[%s409_s22] sm:$0xff]  ;;  %v435_v1 = vld [vmem:[%s409_s22 + $0x10] sm:$0xff] }
 0x178   : > { %v4321_v8 = vunpack.i.h.bf16 %v4319_v4  ;;  %v4320_v11 = vunpack.i.l.bf16 %v4319_v4  ;;  %v706_v22 = vpack.c.bf16 %v699_v14, %v698_v12  ;;  %4167 = vmatpush3.bf16.msra.mxu0 %v4659_v61  ;;  %1003 = vperm.xlu1 %4348, %v434_v63   ;;  %v436_v2 = vld [vmem:[%s409_s22 + $0x18] sm:$0xff]  ;;  %v437_v3 = vld [vmem:[%s409_s22 + $0x20] sm:$0xff]  ;;  %v438_v4 = vld [vmem:[%s409_s22 + $0x28] sm:$0xff] }
 0x179   : > { %4168 = vmatprep.subr.bf16.mxu0 %v4660_v62  ;;  %998 = vperm.xlu0 %4347, %v433_v0   ;;  %v4665_v61 = vld [vmem:[%s5963_s4 + $0x70] sm:$0xff]   ;;  %v4667_v63 = vld [vmem:[%s5963_s4 + $0x80] sm:$0xff]   ;;  %v4668_v0 = vld [vmem:[%s5963_s4 + $0x88] sm:$0xff]  }
 0x17a   : > { %v4339_v21 = vpop.permute.xlu1 %4338  ;;  %v683_v24 = vsel %vm441_vm2, %v547_v18, %v4321_v8  ;;  %v682_v25 = vsel %vm441_vm2, %v546_v17, %v4320_v11  ;;  %v3804_v8 = vld [vmem:[%s5964_s5] ss:$0 sm:$0xff] }
 0x17b   : > { %v4329_v15 = vpop.permute.xlu0 %4328  ;;  %v691_v33 = vsel %vm686_vm3, %v682_v25, %v4325_v20  ;;  %v692_v34 = vsel %vm686_vm3, %v683_v24, %v4326_v19  ;;  %v4341_v38 = vunpack.i.h.bf16 %v4339_v21  ;;  %v4340_v40 = vunpack.i.l.bf16 %v4339_v21 }
 0x17c   : > { %v4331_v27 = vunpack.i.h.bf16 %v4329_v15  ;;  %v4330_v29 = vunpack.i.l.bf16 %v4329_v15  ;;  %4169 = vmatpush3.bf16.msra.mxu0 %v4660_v62  ;;  %1008 = vperm.xlu1 %4348, %v435_v1   ;;  %v4666_v62 = vld [vmem:[%s5963_s4 + $0x78] sm:$0xff]  }
 0x17d   : > { %v685_v52 = vsel %vm441_vm2, %v549_v48, %v4341_v38  ;;  %v684_v53 = vsel %vm441_vm2, %v548_v49, %v4340_v40  ;;  %1314 = vmatprep.subr.bf16.mxu0 %v4734_v16  ;;  %1013 = vperm.xlu0 %4347, %v436_v2   ;;  %v3819_v2 = vld [vmem:[%s5966_s7] ss:$0 sm:$0xff] }
 0x17e   : > { %852 = vmatmul.mubr.bf16.gmra.mrb[4].mxu1 %v706_v22  ;;  %v700_v42 = vsel %vm695_vm4, %v691_v33, %v4330_v29  ;;  %v701_v43 = vsel %vm695_vm4, %v692_v34, %v4331_v27  ;;  %v4344_v45 = vpop.permute.xlu1 %4343 }
 0x17f   : > { %v4334_v31 = vpop.permute.xlu0 %4333  ;;  %3817 = vmatprep.mubr.msk.bf16.mxu1 %vm441_vm2, %v709_v23  ;;  %v708_v50 = vpack.c.bf16 %v701_v43, %v700_v42  ;;  %v4346_v54 = vunpack.i.h.bf16 %v4344_v45  ;;  %v4345_v55 = vunpack.i.l.bf16 %v4344_v45 }
 0x180   : > { %v4336_v46 = vunpack.i.h.bf16 %v4334_v31  ;;  %v4335_v47 = vunpack.i.l.bf16 %v4334_v31  ;;  %1018 = vperm.xlu1 %4348, %v437_v3  }
 0x181   : > { %1023 = vperm.xlu0 %4347, %v438_v4  }
 0x182   : > { %v694_v56 = vsel %vm686_vm3, %v685_v52, %v4336_v46  ;;  %v693_v57 = vsel %vm686_vm3, %v684_v53, %v4335_v47 }
 0x183   : > { %v702_v58 = vsel %vm695_vm4, %v693_v57, %v4345_v55  ;;  %v703_v59 = vsel %vm695_vm4, %v694_v56, %v4346_v54  ;;  %v4661_v57 = vld [vmem:[%s5963_s4 + $0x50] sm:$0xff]  }
 0x184   : > { %v710_v60 = vpack.c.bf16 %v703_v59, %v702_v58  ;;  %1028 = vperm.xlu1 %4348, %v439_v6   ;;  %v4662_v58 = vld [vmem:[%s5963_s4 + $0x58] sm:$0xff]   ;;  %v4663_v59 = vld [vmem:[%s5963_s4 + $0x60] sm:$0xff]  }
 0x185   : > { %1033 = vperm.xlu0 %4347, %v440_v7  }
 0x186   : > { %860 = vmatmul.mubr.bf16.gmra.mrb[8].mxu1 %v708_v50 }
 0x187   : > { %3818 = vmatprep.mubr.msk.bf16.mxu1 %vm441_vm2, %v711_v51 }
 0x18e   : > { %868 = vmatmul.mubr.bf16.gmra.mrb[12].mxu1 %v710_v60  ;;  %v4664_v60 = vld [vmem:[%s5963_s4 + $0x68] sm:$0xff]  }
 0x1f7   : > { %v5002_v1 = vpop.permute.xlu1 %1003 }
 0x1f8   : > { %v5007_v3 = vpop.permute.xlu0 %998 }
 0x249   : > { %v845_v11 = vpop.f32.mrb[0].mxu1 }
 0x24a   : > { %v846_v12 = vadd.f32 %v3804_v8, %v845_v11  ;;  %v847_v14 = vpop.f32.mrb[1].mxu1 }
 0x24b   : > { %v848_v15 = vpop.f32.mrb[2].mxu1 }
 0x24c   : > { %v849_v17 = vadd.f32 %v3804_v8, %v848_v15  ;;  %v850_v18 = vpop.f32.mrb[3].mxu1  ;;  %v876_v19 = vmax.f32 %v846_v12, 0.0 }
 0x24e   : > { %v877_v20 = vmax.f32 %v849_v17, 0.0  ;;  %v5010_v17 = vpop.permute.xlu1 %1008 }
 0x250   : > { %v884_v21 = vpack.c.bf16 %v877_v20, %v876_v19 }
 0x251   : > { %v853_v22 = vpop.f32.mrb[4].mxu1 }
 0x252   : > { %v854_v23 = vadd.f32 %v3804_v8, %v853_v22  ;;  %v855_v24 = vpop.f32.mrb[5].mxu1  ;;  %4170 = vmatprep.mubr.msk.bf16.mxu0 %vm441_vm2, %v884_v21  ;;  %v5017_v22 = vpop.permute.xlu0 %1013 }
 0x253   : > { %v856_v25 = vpop.f32.mrb[6].mxu1 }
 0x254   : > { %v857_v27 = vadd.f32 %v3804_v8, %v856_v25  ;;  %v858_v29 = vpop.f32.mrb[7].mxu1  ;;  %v878_v31 = vmax.f32 %v854_v23, 0.0  ;;  %v4670_v25 = vld [vmem:[%s5963_s4 + $0x98] sm:$0xff]  }
 0x256   : > { %v879_v33 = vmax.f32 %v857_v27, 0.0  ;;  %v5046_v27 = vpop.permute.xlu0 %1023 }
 0x258   : > { %v885_v34 = vpack.c.bf16 %v879_v33, %v878_v31 }
 0x259   : > { %v861_v36 = vpop.f32.mrb[8].mxu1 }
 0x25a   : > { %v862_v38 = vadd.f32 %v3804_v8, %v861_v36  ;;  %v863_v40 = vpop.f32.mrb[9].mxu1  ;;  %4171 = vmatmul.mubr.msk.bf16.vlgmr.msra.gmra.mrb[8].mxu0 %vm441_vm2, %v885_v34 }
 0x25b   : > { %v864_v42 = vpop.f32.mrb[10].mxu1  ;;  %1315 = vmatpush1.bf16.msra.mxu0 %v4661_v57 }
 0x25c   : > { %v865_v43 = vadd.f32 %v3804_v8, %v864_v42  ;;  %v866_v44 = vpop.f32.mrb[11].mxu1  ;;  %v880_v45 = vmax.f32 %v862_v38, 0.0  ;;  %1316 = vmatprep.subr.bf16.mxu0 %v4734_v16 }
 0x25e   : > { %v881_v46 = vmax.f32 %v865_v43, 0.0 }
 0x25f   : > { %1317 = vmatpush1.bf16.msra.mxu0 %v4662_v58 }
 0x260   : > { %v886_v47 = vpack.c.bf16 %v881_v46, %v880_v45  ;;  %1318 = vmatprep.subr.bf16.mxu0 %v4734_v16 }
 0x261   : > { %v869_v48 = vpop.f32.mrb[12].mxu1 }
 0x262   : > { %v870_v49 = vadd.f32 %v3804_v8, %v869_v48  ;;  %v871_v50 = vpop.f32.mrb[13].mxu1  ;;  %4174 = vmatprep.mubr.msk.bf16.mxu0 %vm441_vm2, %v886_v47 }
 0x263   : > { %v872_v51 = vpop.f32.mrb[14].mxu1  ;;  %1319 = vmatpush1.bf16.msra.mxu0 %v4663_v59 }
 0x264   : > { %v873_v52 = vadd.f32 %v3804_v8, %v872_v51  ;;  %v874_v53 = vpop.f32.mrb[15].mxu1  ;;  %v882_v54 = vmax.f32 %v870_v49, 0.0  ;;  %1320 = vmatprep.subr.bf16.mxu0 %v4734_v16 }
 0x266   : > { %v883_v55 = vmax.f32 %v873_v52, 0.0 }
 0x267   : > { %1321 = vmatpush1.bf16.msra.mxu0 %v4664_v60  ;;  %v5066_v60 = vpop.permute.xlu0 %1033 }
 0x268   : > { %v887_v56 = vpack.c.bf16 %v883_v55, %v882_v54  ;;  %1322 = vmatprep.subr.bf16.mxu0 %v4734_v16 }
 0x26a   : > { %4175 = vmatmul.mubr.msk.bf16.gmra.mrb[12].mxu0 %vm441_vm2, %v887_v56 }
 0x26b   : > { %1323 = vmatpush1.bf16.msra.mxu0 %v4665_v61 }
 0x26c   : > { %1324 = vmatprep.subr.bf16.mxu0 %v4734_v16 }
 0x26f   : > { %1325 = vmatpush1.bf16.msra.mxu0 %v4666_v62 }
 0x270   : > { %1326 = vmatprep.subr.bf16.mxu0 %v4734_v16 }
 0x273   : > { %1327 = vmatpush1.bf16.msra.mxu0 %v4667_v63 }
 0x274   : > { %1328 = vmatprep.subr.bf16.mxu0 %v4734_v16 }
 0x277   : > { %1329 = vmatpush1.bf16.msra.mxu0 %v4668_v0 }
 0x278   : > { %1330 = vmatprep.subr.bf16.mxu0 %v4734_v16 }
 0x32d   : > { %v4172_v4 = vpop.f32.mrb[8].mxu0 }
 0x32e   : > { %v966_v6 = vadd.f32 %v4172_v4, %v3819_v2  ;;  %v957_v7 = vpop.f32.mrb[9].mxu0 }
 0x32f   : > { %v958_v8 = vadd.f32 %v3819_v2, %v957_v7  ;;  %v4173_v11 = vpop.f32.mrb[10].mxu0 }
 0x330   : > { %v990_v12 = vadd.f32 %v966_v6, %v4873_v26  ;;  %v969_v14 = vadd.f32 %v4173_v11, %v3819_v2  ;;  %v960_v15 = vpop.f32.mrb[11].mxu0 }
 0x331   : > { %v988_v18 = vadd.f32 %v958_v8, %v4875_v28  ;;  %v961_v19 = vadd.f32 %v3819_v2, %v960_v15 }
 0x332   : > { %v5014_v20 = vmul.f32 %v5010_v17, %v990_v12  ;;  %v991_v21 = vadd.f32 %v969_v14, %v4879_v30  ;;  %v4669_v30 = vld [vmem:[%s5963_s4 + $0x90] sm:$0xff]  }
 0x333   : > { %v5020_v23 = vmul.f32 %v5007_v3, %v988_v18  ;;  %v989_v24 = vadd.f32 %v961_v19, %v4883_v32  ;;  %1331 = vmatpush1.bf16.msra.mxu0 %v4669_v30  ;;  %v5041_v32 = vpop.permute.xlu1 %1018 }
 0x334   : > { %1046 = vst.msk [vmem:[#allocation2 + $0x18] sm:$0xff] %vm441_vm2, %v5014_v20  ;;  %v5026_v26 = vmul.f32 %v5017_v22, %v991_v21  ;;  %1332 = vmatprep.subr.bf16.mxu0 %v4734_v16 }
 0x335   : > { %1044 = vst.msk [vmem:[#allocation2 + $0x8] sm:$0xff] %vm441_vm2, %v5020_v23  ;;  %v5031_v28 = vmul.f32 %v5002_v1, %v989_v24 }
 0x336   : > { %1047 = vst.msk [vmem:[#allocation2 + $0x20] sm:$0xff] %vm441_vm2, %v5026_v26 }
 0x337   : > { %1045 = vst.msk [vmem:[#allocation2 + $0x10] sm:$0xff] %vm441_vm2, %v5031_v28  ;;  %1333 = vmatpush1.bf16.msra.mxu0 %v4670_v25  ;;  %v5056_v56 = vpop.permute.xlu1 %1028 }
 0x338   : > { %1758 = vmatprep.subr.bf16.mxu0 %v4734_v16 }
 0x33c   : > { %v1068_v31 = vld [vmem:[#allocation2 + $0x8] sm:$0xff] }
 0x33d   : > { %v4176_v29 = vpop.f32.mrb[12].mxu0  ;;  %v1060_v33 = vld [vmem:[#allocation2 + $0x6] sm:$0xff]  ;;  %v1063_v48 = vld [vmem:[#allocation2 + $0x1e] sm:$0xff] }
 0x33e   : > { %v982_v34 = vadd.f32 %v4176_v29, %v3819_v2  ;;  %v973_v36 = vpop.f32.mrb[13].mxu0  ;;  %v1069_v38 = vld [vmem:[#allocation2 + $0x10] sm:$0xff]  ;;  %v1078_v6 = vld [vmem:[#allocation2 + $0x1a] sm:$0xff] }
 0x33f   : > { %v1061_v40 = vld [vmem:[#allocation2 + $0xe] sm:$0xff]  ;;  %v974_v43 = vadd.f32 %v3819_v2, %v973_v36  ;;  %v4177_v44 = vpop.f32.mrb[14].mxu0  ;;  %v4354_v45 = vpack.i.bf16 %v1069_v38, %v1068_v31  ;;  %v1062_v53 = vld [vmem:[#allocation2 + $0x16] sm:$0xff] }
 0x340   : > { %v5048_v42 = vld [vmem:[#allocation2 + $0xc] sm:$0xff]  ;;  %v4349_v46 = vpack.i.bf16 %v1061_v40, %v1060_v33  ;;  %v5051_v47 = vld [vmem:[#allocation2 + $0x14] sm:$0xff]  ;;  %v994_v49 = vadd.f32 %v982_v34, %v4892_v35  ;;  %v985_v50 = vadd.f32 %v4177_v44, %v3819_v2  ;;  %v976_v51 = vpop.f32.mrb[15].mxu0 }
 0x341   : > { %v1206_v52 = vpack.c.bf16 %v5051_v47, %v5048_v42  ;;  %v1076_v54 = vld [vmem:[#allocation2 + $0xa] sm:$0xff]  ;;  %v1077_v55 = vld [vmem:[#allocation2 + $0x12] sm:$0xff]  ;;  %v992_v57 = vadd.f32 %v974_v43, %v4894_v37  ;;  %v977_v58 = vadd.f32 %v3819_v2, %v976_v51  ;;  %4355 = vrot.lane.b32.xlu0 %v4354_v45, %s4737_s13  ;;  %v4369_v37 = vpack.i.bf16 %v1063_v48, %v1062_v53  ;;  %v1071_v2 = vld [vmem:[#allocation2 + $0x20] sm:$0xff] }
 0x342   : > { %4350 = vrot.lane.b32.xlu1 %v4349_v46, %s4736_s12  ;;  %v5062_v59 = vmul.f32 %v5056_v56, %v994_v49  ;;  %v995_v35 = vadd.f32 %v985_v50, %v4899_v39  ;;  %v4359_v63 = vpack.i.bf16 %v1077_v55, %v1076_v54  ;;  %v4671_v43 = vld [vmem:[%s5965_s6 + $0x10] sm:$0xff]  }
 0x343   : > { %3858 = vmatprep.mubr.msk.bf16.mxu0 %vm441_vm2, %v1206_v52  ;;  %v5069_v61 = vmul.f32 %v5041_v32, %v992_v57  ;;  %v993_v62 = vadd.f32 %v977_v58, %v4903_v41  ;;  %v1070_v41 = vld [vmem:[#allocation2 + $0x18] sm:$0xff]  ;;  %4178 = vmatprep.subr.bf16.mxu1 %v4671_v43  ;;  %v1052_v52 = vld [vmem:[#allocation2 + $0x4] sm:$0xff] }
 0x344   : > { %1050 = vst.msk [vmem:[#allocation2 + $0x38] sm:$0xff] %vm441_vm2, %v5062_v59  ;;  %v5075_v0 = vmul.f32 %v5066_v60, %v995_v35  ;;  %v4364_v4 = vpack.i.bf16 %v1071_v2, %v1070_v41  ;;  %4179 = vmatpush3.bf16.msra.mxu1 %v4671_v43  ;;  %v1055_v41 = vld [vmem:[#allocation2 + $0x1c] sm:$0xff] }
 0x345   : > { %1048 = vst.msk [vmem:[#allocation2 + $0x28] sm:$0xff] %vm441_vm2, %v5069_v61  ;;  %v5080_v39 = vmul.f32 %v5046_v27, %v993_v62  ;;  %4370 = vrot.lane.b32.xlu0 %v4369_v37, %s4736_s12 }
 0x346   : > { %4360 = vrot.lane.b32.xlu1 %v4359_v63, %s4735_s30  ;;  %1051 = vst.msk [vmem:[#allocation2 + $0x40] sm:$0xff] %vm441_vm2, %v5075_v0 }
 0x347   : > { %1049 = vst.msk [vmem:[#allocation2 + $0x30] sm:$0xff] %vm441_vm2, %v5080_v39 }
 0x34a   : > { %4365 = vrot.lane.b32.xlu1 %v4364_v4, %s4737_s13 }
 0x34b   : > { %v1074_v34 = vld [vmem:[#allocation2 + $0x38] sm:$0xff] }
 0x34c   : > { %v1079_v7 = vld [vmem:[#allocation2 + $0x22] sm:$0xff] }
 0x34d   : > { %v4374_v8 = vpack.i.bf16 %v1079_v7, %v1078_v6  ;;  %v1064_v11 = vld [vmem:[#allocation2 + $0x26] sm:$0xff]  ;;  %v1067_v25 = vld [vmem:[#allocation2 + $0x3e] sm:$0xff] }
 0x34e   : > { %v1065_v12 = vld [vmem:[#allocation2 + $0x2e] sm:$0xff]  ;;  %v1066_v30 = vld [vmem:[#allocation2 + $0x36] sm:$0xff]  ;;  %v1075_v31 = vld [vmem:[#allocation2 + $0x40] sm:$0xff] }
 0x34f   : > { %v1073_v14 = vld [vmem:[#allocation2 + $0x30] sm:$0xff]  ;;  %4375 = vrot.lane.b32.xlu0 %v4374_v8, %s4735_s30  ;;  %v4379_v15 = vpack.i.bf16 %v1065_v12, %v1064_v11  ;;  %v1072_v18 = vld [vmem:[#allocation2 + $0x28] sm:$0xff]  ;;  %v4399_v33 = vpack.i.bf16 %v1067_v25, %v1066_v30  ;;  %v1082_v36 = vld [vmem:[#allocation2 + $0x3a] sm:$0xff]  ;;  %v4394_v40 = vpack.i.bf16 %v1075_v31, %v1074_v34 }
 0x350   : > { %v1080_v19 = vld [vmem:[#allocation2 + $0x2a] sm:$0xff]  ;;  %v1081_v21 = vld [vmem:[#allocation2 + $0x32] sm:$0xff]  ;;  %v4384_v24 = vpack.i.bf16 %v1073_v14, %v1072_v18  ;;  %v1083_v38 = vld [vmem:[#allocation2 + $0x42] sm:$0xff] }
 0x351   : > { %4380 = vrot.lane.b32.xlu1 %v4379_v15, %s4736_s12  ;;  %v4389_v29 = vpack.i.bf16 %v1081_v21, %v1080_v19  ;;  %v4404_v44 = vpack.i.bf16 %v1083_v38, %v1082_v36  ;;  %v1056_v37 = vld [vmem:[#allocation2 + $0x24] sm:$0xff]  ;;  %v1057_v30 = vld [vmem:[#allocation2 + $0x2c] sm:$0xff]  ;;  %v1058_v25 = vld [vmem:[#allocation2 + $0x34] sm:$0xff] }
 0x352   : > { %v1208_v8 = vpack.c.bf16 %v1056_v37, %v1055_v41 }
 0x353   : > { %4385 = vrot.lane.b32.xlu0 %v4384_v24, %s4737_s13 }
 0x355   : > { %4390 = vrot.lane.b32.xlu1 %v4389_v29, %s4735_s30 }
 0x357   : > { %4400 = vrot.lane.b32.xlu0 %v4399_v33, %s4736_s12 }
 0x359   : > { %4395 = vrot.lane.b32.xlu1 %v4394_v40, %s4737_s13 }
 0x35b   : > { %4405 = vrot.lane.b32.xlu0 %v4404_v44, %s4735_s30 }
 0x3b3   : > { %v4356_v45 = vpop.permute.xlu0 %4355 }
 0x3b4   : > { %v4351_v46 = vpop.permute.xlu1 %4350  ;;  %v4358_v50 = vunpack.i.h.bf16 %v4356_v45  ;;  %v4357_v51 = vunpack.i.l.bf16 %v4356_v45  ;;  %v1210_v45 = vpack.c.bf16 %v1058_v25, %v1057_v30 }
 0x3b5   : > { %v4353_v48 = vunpack.i.h.bf16 %v4351_v46  ;;  %v4352_v49 = vunpack.i.l.bf16 %v4351_v46 }
 0x3b7   : > { %v1181_v53 = vsel %vm441_vm2, %v1052_v52, %v4352_v49  ;;  %v1182_v54 = vsel %vm441_vm2, %v5048_v42, %v4353_v48  ;;  %v4371_v4 = vpop.permute.xlu0 %4370 }
 0x3b8   : > { %v4361_v55 = vpop.permute.xlu1 %4360  ;;  %v1189_v35 = vsel %vm686_vm3, %v1181_v53, %v4357_v51  ;;  %v1190_v62 = vsel %vm686_vm3, %v1182_v54, %v4358_v50  ;;  %v4373_v11 = vunpack.i.h.bf16 %v4371_v4  ;;  %v4372_v42 = vunpack.i.l.bf16 %v4371_v4 }
 0x3b9   : > { %v4363_v57 = vunpack.i.h.bf16 %v4361_v55  ;;  %v4362_v58 = vunpack.i.l.bf16 %v4361_v55 }
 0x3ba   : > { %v1184_v18 = vsel %vm441_vm2, %v1055_v41, %v4373_v11  ;;  %v1183_v19 = vsel %vm441_vm2, %v5051_v47, %v4372_v42 }
 0x3bb   : > { %v1197_v63 = vsel %vm695_vm4, %v1189_v35, %v4362_v58  ;;  %v1198_v2 = vsel %vm695_vm4, %v1190_v62, %v4363_v57 }
 0x3bc   : > { %v1205_v6 = vpack.c.bf16 %v1198_v2, %v1197_v63  ;;  %v4366_v7 = vpop.permute.xlu1 %4365  ;;  %v1084_v2 = vld [vmem:[#allocation2 + $0x44] sm:$0xff] }
 0x3bd   : > { %v4368_v12 = vunpack.i.h.bf16 %v4366_v7  ;;  %v4367_v14 = vunpack.i.l.bf16 %v4366_v7 }
 0x3be   : > { %1347 = vmatmul.mubr.bf16.vlgmr.msra.gmra.mrb[16].mxu0 %v1205_v6 }
 0x3bf   : > { %3859 = vmatprep.mubr.msk.bf16.mxu0 %vm441_vm2, %v1208_v8  ;;  %v1192_v29 = vsel %vm686_vm3, %v1184_v18, %v4368_v12  ;;  %v1191_v31 = vsel %vm686_vm3, %v1183_v19, %v4367_v14 }
 0x3c1   : > { %v4376_v15 = vpop.permute.xlu0 %4375 }
 0x3c2   : > { %v4378_v21 = vunpack.i.h.bf16 %v4376_v15  ;;  %v4377_v24 = vunpack.i.l.bf16 %v4376_v15 }
 0x3c3   : > { %v4381_v33 = vpop.permute.xlu1 %4380 }
 0x3c4   : > { %v4383_v34 = vunpack.i.h.bf16 %v4381_v33  ;;  %v4382_v36 = vunpack.i.l.bf16 %v4381_v33  ;;  %v1199_v38 = vsel %vm695_vm4, %v1191_v31, %v4377_v24  ;;  %v1200_v40 = vsel %vm695_vm4, %v1192_v29, %v4378_v21 }
 0x3c5   : > { %v4386_v43 = vpop.permute.xlu0 %4385  ;;  %v1207_v44 = vpack.c.bf16 %v1200_v40, %v1199_v38 }
 0x3c6   : > { %v1186_v47 = vsel %vm441_vm2, %v1057_v30, %v4383_v34  ;;  %v1185_v46 = vsel %vm441_vm2, %v1056_v37, %v4382_v36  ;;  %v4388_v48 = vunpack.i.h.bf16 %v4386_v43  ;;  %v4387_v49 = vunpack.i.l.bf16 %v4386_v43  ;;  %v1059_v37 = vld [vmem:[#allocation2 + $0x3c] sm:$0xff] }
 0x3c7   : > { %v4391_v50 = vpop.permute.xlu1 %4390  ;;  %1355 = vmatmul.mubr.bf16.gmra.mrb[20].mxu0 %v1207_v44  ;;  %v1212_v14 = vpack.c.bf16 %v1084_v2, %v1059_v37  ;;  %v4672_v30 = vld [vmem:[%s5965_s6 + $0x18] sm:$0xff]  }
 0x3c8   : > { %v1193_v51 = vsel %vm686_vm3, %v1185_v46, %v4387_v49  ;;  %v1194_v52 = vsel %vm686_vm3, %v1186_v47, %v4388_v48  ;;  %v4393_v53 = vunpack.i.h.bf16 %v4391_v50  ;;  %v4392_v54 = vunpack.i.l.bf16 %v4391_v50  ;;  %3860 = vmatprep.mubr.msk.bf16.mxu0 %vm441_vm2, %v1210_v45  ;;  %4180 = vmatprep.subr.bf16.mxu1 %v4672_v30 }
 0x3c9   : > { %v4401_v55 = vpop.permute.xlu0 %4400  ;;  %4181 = vmatpush3.bf16.msra.mxu1 %v4672_v30  ;;  %v4678_v30 = vld [vmem:[%s5963_s4 + $0xc8] sm:$0xff]  }
 0x3ca   : > { %v4403_v57 = vunpack.i.h.bf16 %v4401_v55  ;;  %v4402_v58 = vunpack.i.l.bf16 %v4401_v55  ;;  %v1201_v35 = vsel %vm695_vm4, %v1193_v51, %v4392_v54  ;;  %v1202_v62 = vsel %vm695_vm4, %v1194_v52, %v4393_v53 }
 0x3cb   : > { %v4396_v63 = vpop.permute.xlu1 %4395  ;;  %v1209_v11 = vpack.c.bf16 %v1202_v62, %v1201_v35 }
 0x3cc   : > { %v1188_v41 = vsel %vm441_vm2, %v1059_v37, %v4403_v57  ;;  %v1187_v4 = vsel %vm441_vm2, %v1058_v25, %v4402_v58  ;;  %v4398_v6 = vunpack.i.h.bf16 %v4396_v63  ;;  %v4397_v7 = vunpack.i.l.bf16 %v4396_v63  ;;  %v3847_v25 = vld [vmem:[%s5964_s5 + $0x1] ss:$0 sm:$0xff] }
 0x3cd   : > { %v4406_v8 = vpop.permute.xlu0 %4405 }
 0x3ce   : > { %v4408_v42 = vunpack.i.h.bf16 %v4406_v8  ;;  %v4407_v12 = vunpack.i.l.bf16 %v4406_v8  ;;  %v1196_v15 = vsel %vm686_vm3, %v1188_v41, %v4398_v6  ;;  %v1195_v18 = vsel %vm686_vm3, %v1187_v4, %v4397_v7 }
 0x3cf   : > { %1363 = vmatmul.mubr.bf16.gmra.mrb[24].mxu0 %v1209_v11 }
 0x3d0   : > { %3861 = vmatprep.mubr.msk.bf16.mxu0 %vm441_vm2, %v1212_v14  ;;  %v1203_v19 = vsel %vm695_vm4, %v1195_v18, %v4407_v12  ;;  %v1204_v21 = vsel %vm695_vm4, %v1196_v15, %v4408_v42  ;;  %v4673_v15 = vld [vmem:[%s5963_s4 + $0xa0] sm:$0xff]   ;;  %v4674_v18 = vld [vmem:[%s5963_s4 + $0xa8] sm:$0xff]  }
 0x3d1   : > { %v1211_v24 = vpack.c.bf16 %v1204_v21, %v1203_v19  ;;  %1759 = vmatpush1.bf16.msra.mxu0 %v4673_v15  ;;  %v4675_v19 = vld [vmem:[%s5963_s4 + $0xb0] sm:$0xff]   ;;  %v4676_v21 = vld [vmem:[%s5963_s4 + $0xb8] sm:$0xff]  }
 0x3d2   : > { %1760 = vmatprep.subr.bf16.mxu0 %v4734_v16 }
 0x3d5   : > { %1761 = vmatpush1.bf16.msra.mxu0 %v4674_v18 }
 0x3d6   : > { %1762 = vmatprep.subr.bf16.mxu0 %v4734_v16 }
 0x3d7   : > { %1371 = vmatmul.mubr.bf16.gmra.mrb[28].mxu0 %v1211_v24  ;;  %v4677_v24 = vld [vmem:[%s5963_s4 + $0xc0] sm:$0xff]  }
 0x3d9   : > { %1763 = vmatpush1.bf16.msra.mxu0 %v4675_v19 }
 0x3da   : > { %1764 = vmatprep.subr.bf16.mxu0 %v4734_v16 }
 0x3dd   : > { %1765 = vmatpush1.bf16.msra.mxu0 %v4676_v21 }
 0x3de   : > { %1766 = vmatprep.subr.bf16.mxu0 %v4734_v16 }
 0x3e1   : > { %1767 = vmatpush1.bf16.msra.mxu0 %v4677_v24 }
 0x3e2   : > { %1768 = vmatprep.subr.bf16.mxu0 %v4734_v16 }
 0x3e5   : > { %1769 = vmatpush1.bf16.msra.mxu0 %v4678_v30 }
 0x3e6   : > { %1770 = vmatprep.subr.bf16.mxu0 %v4734_v16 }
 0x491   : > { %v1348_v29 = vpop.f32.mrb[16].mxu0 }
 0x492   : > { %v1349_v31 = vadd.f32 %v3847_v25, %v1348_v29  ;;  %v1350_v33 = vpop.f32.mrb[17].mxu0  ;;  %v4680_v29 = vld [vmem:[%s5963_s4 + $0xd8] sm:$0xff]  }
 0x493   : > { %v1351_v34 = vpop.f32.mrb[18].mxu0 }
 0x494   : > { %v1352_v36 = vadd.f32 %v3847_v25, %v1351_v34  ;;  %v1353_v38 = vpop.f32.mrb[19].mxu0  ;;  %v1379_v40 = vmax.f32 %v1349_v31, 0.0  ;;  %v3867_v31 = vld [vmem:[%s5966_s7 + $0x1] ss:$0 sm:$0xff] }
 0x496   : > { %v1380_v43 = vmax.f32 %v1352_v36, 0.0 }
 0x498   : > { %v1387_v44 = vpack.c.bf16 %v1380_v43, %v1379_v40 }
 0x49a   : > { %4182 = vmatprep.mubr.msk.bf16.mxu1 %vm441_vm2, %v1387_v44  ;;  %v1356_v45 = vpop.f32.mrb[20].mxu0 }
 0x49b   : > { %v1357_v47 = vadd.f32 %v3847_v25, %v1356_v45  ;;  %v1358_v46 = vpop.f32.mrb[21].mxu0 }
 0x49c   : > { %v1359_v48 = vpop.f32.mrb[22].mxu0 }
 0x49d   : > { %v1360_v49 = vadd.f32 %v3847_v25, %v1359_v48  ;;  %v1361_v50 = vpop.f32.mrb[23].mxu0  ;;  %v1381_v51 = vmax.f32 %v1357_v47, 0.0 }
 0x49f   : > { %v1382_v52 = vmax.f32 %v1360_v49, 0.0 }
 0x4a1   : > { %v1388_v53 = vpack.c.bf16 %v1382_v52, %v1381_v51 }
 0x4a2   : > { %v1364_v54 = vpop.f32.mrb[24].mxu0 }
 0x4a3   : > { %v1365_v55 = vadd.f32 %v3847_v25, %v1364_v54  ;;  %v1366_v57 = vpop.f32.mrb[25].mxu0  ;;  %4183 = vmatmul.mubr.msk.bf16.vlgmr.msra.gmra.mrb[16].mxu1 %vm441_vm2, %v1388_v53 }
 0x4a4   : > { %v1367_v58 = vpop.f32.mrb[26].mxu0 }
 0x4a5   : > { %v1368_v35 = vadd.f32 %v3847_v25, %v1367_v58  ;;  %v1369_v62 = vpop.f32.mrb[27].mxu0  ;;  %v1383_v37 = vmax.f32 %v1365_v55, 0.0 }
 0x4a7   : > { %v1384_v63 = vmax.f32 %v1368_v35, 0.0 }
 0x4a9   : > { %v1389_v2 = vpack.c.bf16 %v1384_v63, %v1383_v37 }
 0x4aa   : > { %v1372_v41 = vpop.f32.mrb[28].mxu0 }
 0x4ab   : > { %v1373_v4 = vadd.f32 %v3847_v25, %v1372_v41  ;;  %v1374_v6 = vpop.f32.mrb[29].mxu0  ;;  %4186 = vmatprep.mubr.msk.bf16.mxu1 %vm441_vm2, %v1389_v2 }
 0x4ac   : > { %v1375_v7 = vpop.f32.mrb[30].mxu0 }
 0x4ad   : > { %v1376_v8 = vadd.f32 %v3847_v25, %v1375_v7  ;;  %v1377_v11 = vpop.f32.mrb[31].mxu0  ;;  %v1385_v42 = vmax.f32 %v1373_v4, 0.0  ;;  %v4679_v25 = vld [vmem:[%s5963_s4 + $0xd0] sm:$0xff]  }
 0x4ae   : > { %1771 = vmatpush1.bf16.msra.mxu0 %v4679_v25 }
 0x4af   : > { %v1386_v12 = vmax.f32 %v1376_v8, 0.0  ;;  %1772 = vmatprep.subr.bf16.mxu0 %v4734_v16 }
 0x4b1   : > { %v1390_v14 = vpack.c.bf16 %v1386_v12, %v1385_v42 }
 0x4b2   : > { %1773 = vmatpush1.bf16.msra.mxu0 %v4680_v29 }
 0x4b3   : > { %4187 = vmatmul.mubr.msk.bf16.gmra.mrb[20].mxu1 %vm441_vm2, %v1390_v14  ;;  %1774 = vmatprep.subr.bf16.mxu0 %v4734_v16 }
 0x576   : > { %v4184_v33 = vpop.f32.mrb[16].mxu1 }
 0x577   : > { %v1471_v34 = vadd.f32 %v4184_v33, %v3867_v31  ;;  %v1462_v36 = vpop.f32.mrb[17].mxu1 }
 0x578   : > { %v1463_v38 = vadd.f32 %v3867_v31, %v1462_v36  ;;  %v4185_v40 = vpop.f32.mrb[18].mxu1 }
 0x579   : > { %v1495_v43 = vadd.f32 %v1471_v34, %v5014_v20  ;;  %v1474_v44 = vadd.f32 %v4185_v40, %v3867_v31  ;;  %v1465_v45 = vpop.f32.mrb[19].mxu1 }
 0x57a   : > { %v1493_v47 = vadd.f32 %v1463_v38, %v5020_v23  ;;  %v1466_v46 = vadd.f32 %v3867_v31, %v1465_v45 }
 0x57b   : > { %v5176_v48 = vmul.f32 %v1495_v43, %v5010_v17  ;;  %v1496_v49 = vadd.f32 %v1474_v44, %v5026_v26  ;;  %v4681_v26 = vld [vmem:[%s5963_s4 + $0xe0] sm:$0xff]  }
 0x57c   : > { %v5180_v50 = vmul.f32 %v1493_v47, %v5007_v3  ;;  %v1494_v51 = vadd.f32 %v1466_v46, %v5031_v28  ;;  %1775 = vmatpush1.bf16.msra.mxu0 %v4681_v26  ;;  %v4682_v28 = vld [vmem:[%s5963_s4 + $0xe8] sm:$0xff]  }
 0x57d   : > { %1511 = vst.msk [vmem:[#allocation2 + $0x18] sm:$0xff] %vm441_vm2, %v5176_v48  ;;  %v5186_v20 = vmul.f32 %v1496_v49, %v5017_v22  ;;  %1776 = vmatprep.subr.bf16.mxu0 %v4734_v16 }
 0x57e   : > { %1509 = vst.msk [vmem:[#allocation2 + $0x8] sm:$0xff] %vm441_vm2, %v5180_v50  ;;  %v5191_v23 = vmul.f32 %v1494_v51, %v5002_v1 }
 0x57f   : > { %1512 = vst.msk [vmem:[#allocation2 + $0x20] sm:$0xff] %vm441_vm2, %v5186_v20 }
 0x580   : > { %1510 = vst.msk [vmem:[#allocation2 + $0x10] sm:$0xff] %vm441_vm2, %v5191_v23  ;;  %1777 = vmatpush1.bf16.msra.mxu0 %v4682_v28  ;;  %v1517_v28 = vld [vmem:[#allocation2] sm:$0xff] }
 0x581   : > { %2436 = vmatprep.subr.bf16.mxu0 %v4734_v16 }
 0x584   : > { %v5204_v53 = vld [vmem:[#allocation2 + $0x18] sm:$0xff] }
 0x585   : > { %v1525_v54 = vld [vmem:[#allocation2 + $0x4] sm:$0xff] }
 0x586   : > { %v4188_v52 = vpop.f32.mrb[20].mxu1  ;;  %v5208_v62 = vld [vmem:[#allocation2 + $0x8] sm:$0xff]  ;;  %v1528_v14 = vld [vmem:[#allocation2 + $0x1c] sm:$0xff] }
 0x587   : > { %v1487_v55 = vadd.f32 %v4188_v52, %v3867_v31  ;;  %v1478_v57 = vpop.f32.mrb[21].mxu1  ;;  %v5206_v58 = vld [vmem:[#allocation2 + $0x10] sm:$0xff]  ;;  %v5233_v30 = vld [vmem:[#allocation2 + $0x20] sm:$0xff] }
 0x588   : > { %v1526_v35 = vld [vmem:[#allocation2 + $0xc] sm:$0xff]  ;;  %v1479_v37 = vadd.f32 %v3867_v31, %v1478_v57  ;;  %v4189_v63 = vpop.f32.mrb[22].mxu1  ;;  %v1650_v2 = vpack.c.bf16 %v5204_v53, %v5206_v58  ;;  %v4414_v4 = vpack.i.bf16 %v5206_v58, %v5208_v62  ;;  %v1527_v11 = vld [vmem:[#allocation2 + $0x14] sm:$0xff] }
 0x589   : > { %v4409_v41 = vpack.i.bf16 %v1526_v35, %v1525_v54  ;;  %v1499_v6 = vadd.f32 %v1487_v55, %v5062_v59  ;;  %v1490_v7 = vadd.f32 %v4189_v63, %v3867_v31  ;;  %v1481_v8 = vpop.f32.mrb[23].mxu1  ;;  %v4419_v21 = vpack.i.bf16 %v1527_v11, %v1526_v35 }
 0x58a   : > { %v1497_v42 = vadd.f32 %v1479_v37, %v5069_v61  ;;  %v1482_v12 = vadd.f32 %v3867_v31, %v1481_v8  ;;  %3906 = vmatprep.mubr.msk.bf16.mxu0 %vm441_vm2, %v1650_v2  ;;  %4415 = vrot.lane.b32.xlu0 %v4414_v4, %s4737_s13  ;;  %v4429_v24 = vpack.i.bf16 %v1528_v14, %v1527_v11 }
 0x58b   : > { %4410 = vrot.lane.b32.xlu1 %v4409_v41, %s4736_s12  ;;  %v5220_v15 = vmul.f32 %v1499_v6, %v5056_v56  ;;  %v1500_v18 = vadd.f32 %v1490_v7, %v5075_v0 }
 0x58c   : > { %v5225_v59 = vmul.f32 %v1497_v42, %v5041_v32  ;;  %v1498_v19 = vadd.f32 %v1482_v12, %v5080_v39  ;;  %v4424_v39 = vpack.i.bf16 %v5233_v30, %v5204_v53 }
 0x58d   : > { %1515 = vst.msk [vmem:[#allocation2 + $0x38] sm:$0xff] %vm441_vm2, %v5220_v15  ;;  %v5231_v61 = vmul.f32 %v1500_v18, %v5066_v60 }
 0x58e   : > { %1513 = vst.msk [vmem:[#allocation2 + $0x28] sm:$0xff] %vm441_vm2, %v5225_v59  ;;  %v5238_v0 = vmul.f32 %v1498_v19, %v5046_v27  ;;  %4430 = vrot.lane.b32.xlu0 %v4429_v24, %s4736_s12 }
 0x58f   : > { %4420 = vrot.lane.b32.xlu1 %v4419_v21, %s4735_s30  ;;  %1516 = vst.msk [vmem:[#allocation2 + $0x40] sm:$0xff] %vm441_vm2, %v5231_v61 }
 0x590   : > { %1514 = vst.msk [vmem:[#allocation2 + $0x30] sm:$0xff] %vm441_vm2, %v5238_v0 }
 0x593   : > { %4425 = vrot.lane.b32.xlu1 %v4424_v39, %s4737_s13 }
 0x594   : > { %v5258_v46 = vld [vmem:[#allocation2 + $0x38] sm:$0xff] }
 0x595   : > { %v1529_v25 = vld [vmem:[#allocation2 + $0x24] sm:$0xff] }
 0x596   : > { %v4434_v29 = vpack.i.bf16 %v1529_v25, %v1528_v14  ;;  %v1522_v36 = vld [vmem:[#allocation2 + $0x28] sm:$0xff]  ;;  %v1532_v43 = vld [vmem:[#allocation2 + $0x3c] sm:$0xff] }
 0x597   : > { %v1530_v31 = vld [vmem:[#allocation2 + $0x2c] sm:$0xff]  ;;  %v1531_v38 = vld [vmem:[#allocation2 + $0x34] sm:$0xff]  ;;  %v5255_v45 = vld [vmem:[#allocation2 + $0x40] sm:$0xff]  ;;  %v1652_v19 = vpack.c.bf16 %v1522_v36, %v5233_v30 }
 0x598   : > { %v5249_v33 = vld [vmem:[#allocation2 + $0x30] sm:$0xff]  ;;  %4435 = vrot.lane.b32.xlu0 %v4434_v29, %s4735_s30  ;;  %v4439_v34 = vpack.i.bf16 %v1530_v31, %v1529_v25  ;;  %v4449_v44 = vpack.i.bf16 %v1531_v38, %v1530_v31  ;;  %v4459_v47 = vpack.i.bf16 %v1532_v43, %v1531_v38  ;;  %v1534_v49 = vld [vmem:[#allocation2 + $0x44] sm:$0xff]  ;;  %v4454_v51 = vpack.i.bf16 %v5255_v45, %v5258_v46 }
 0x599   : > { %v4444_v40 = vpack.i.bf16 %v5249_v33, %v1522_v36  ;;  %v4464_v26 = vpack.i.bf16 %v1534_v49, %v1532_v43 }
 0x59a   : > { %4440 = vrot.lane.b32.xlu1 %v4439_v34, %s4736_s12 }
 0x59c   : > { %4445 = vrot.lane.b32.xlu0 %v4444_v40, %s4737_s13 }
 0x59e   : > { %4450 = vrot.lane.b32.xlu1 %v4449_v44, %s4735_s30 }
 0x5a0   : > { %4460 = vrot.lane.b32.xlu0 %v4459_v47, %s4736_s12 }
 0x5a2   : > { %4455 = vrot.lane.b32.xlu1 %v4454_v51, %s4737_s13 }
 0x5a4   : > { %4465 = vrot.lane.b32.xlu0 %v4464_v26, %s4735_s30 }
 0x5fc   : > { %v4416_v57 = vpop.permute.xlu0 %4415 }
 0x5fd   : > { %v4411_v52 = vpop.permute.xlu1 %4410  ;;  %v4418_v35 = vunpack.i.h.bf16 %v4416_v57  ;;  %v4417_v37 = vunpack.i.l.bf16 %v4416_v57 }
 0x5fe   : > { %v4413_v54 = vunpack.i.h.bf16 %v4411_v52  ;;  %v4412_v55 = vunpack.i.l.bf16 %v4411_v52 }
 0x600   : > { %v1625_v63 = vsel %vm441_vm2, %v1517_v28, %v4412_v55  ;;  %v1626_v2 = vsel %vm441_vm2, %v5208_v62, %v4413_v54  ;;  %v4431_v14 = vpop.permute.xlu0 %4430 }
 0x601   : > { %v4421_v41 = vpop.permute.xlu1 %4420  ;;  %v1633_v7 = vsel %vm686_vm3, %v1625_v63, %v4417_v37  ;;  %v1634_v8 = vsel %vm686_vm3, %v1626_v2, %v4418_v35  ;;  %v4433_v21 = vunpack.i.h.bf16 %v4431_v14  ;;  %v4432_v24 = vunpack.i.l.bf16 %v4431_v14 }
 0x602   : > { %v4423_v4 = vunpack.i.h.bf16 %v4421_v41  ;;  %v4422_v6 = vunpack.i.l.bf16 %v4421_v41 }
 0x603   : > { %v1628_v29 = vsel %vm441_vm2, %v5204_v53, %v4433_v21  ;;  %v1627_v31 = vsel %vm441_vm2, %v5206_v58, %v4432_v24  ;;  %v1654_v53 = vpack.c.bf16 %v5258_v46, %v5249_v33 }
 0x604   : > { %v1641_v11 = vsel %vm695_vm4, %v1633_v7, %v4422_v6  ;;  %v1642_v42 = vsel %vm695_vm4, %v1634_v8, %v4423_v4 }
 0x605   : > { %v1649_v12 = vpack.c.bf16 %v1642_v42, %v1641_v11  ;;  %v4426_v18 = vpop.permute.xlu1 %4425  ;;  %v1535_v11 = vld [vmem:[#allocation2 + $0x48] sm:$0xff] }
 0x606   : > { %v4428_v62 = vunpack.i.h.bf16 %v4426_v18  ;;  %v4427_v39 = vunpack.i.l.bf16 %v4426_v18 }
 0x607   : > { %1791 = vmatmul.mubr.bf16.vlgmr.msra.gmra.mrb[32].mxu0 %v1649_v12 }
 0x608   : > { %3907 = vmatprep.mubr.msk.bf16.mxu0 %vm441_vm2, %v1652_v19  ;;  %v1635_v40 = vsel %vm686_vm3, %v1627_v31, %v4427_v39  ;;  %v1636_v43 = vsel %vm686_vm3, %v1628_v29, %v4428_v62  ;;  %v1656_v39 = vpack.c.bf16 %v1535_v11, %v5255_v45  ;;  %v4684_v45 = vld [vmem:[%s5965_s6 + $0x28] sm:$0xff]  }
 0x60a   : > { %v4436_v25 = vpop.permute.xlu0 %4435 }
 0x60b   : > { %v4438_v34 = vunpack.i.h.bf16 %v4436_v25  ;;  %v4437_v38 = vunpack.i.l.bf16 %v4436_v25 }
 0x60c   : > { %v4441_v44 = vpop.permute.xlu1 %4440 }
 0x60d   : > { %v4443_v47 = vunpack.i.h.bf16 %v4441_v44  ;;  %v4442_v49 = vunpack.i.l.bf16 %v4441_v44  ;;  %v1643_v51 = vsel %vm695_vm4, %v1635_v40, %v4437_v38  ;;  %v1644_v26 = vsel %vm695_vm4, %v1636_v43, %v4438_v34  ;;  %v4683_v34 = vld [vmem:[%s5965_s6 + $0x20] sm:$0xff]  }
 0x60e   : > { %v4446_v28 = vpop.permute.xlu0 %4445  ;;  %v1651_v52 = vpack.c.bf16 %v1644_v26, %v1643_v51  ;;  %4190 = vmatprep.subr.bf16.mxu1 %v4683_v34  ;;  %v3895_v38 = vld [vmem:[%s5964_s5 + $0x2] ss:$0 sm:$0xff] }
 0x60f   : > { %v1630_v58 = vsel %vm441_vm2, %v1522_v36, %v4443_v47  ;;  %v1629_v54 = vsel %vm441_vm2, %v5233_v30, %v4442_v49  ;;  %v4448_v55 = vunpack.i.h.bf16 %v4446_v28  ;;  %v4447_v57 = vunpack.i.l.bf16 %v4446_v28  ;;  %4191 = vmatpush3.bf16.msra.mxu1 %v4683_v34 }
 0x610   : > { %v4451_v35 = vpop.permute.xlu1 %4450  ;;  %1799 = vmatmul.mubr.bf16.gmra.mrb[36].mxu0 %v1651_v52  ;;  %4192 = vmatprep.subr.bf16.mxu1 %v4684_v45 }
 0x611   : > { %v1638_v37 = vsel %vm686_vm3, %v1630_v58, %v4448_v55  ;;  %v1637_v63 = vsel %vm686_vm3, %v1629_v54, %v4447_v57  ;;  %v4453_v2 = vunpack.i.h.bf16 %v4451_v35  ;;  %v4452_v41 = vunpack.i.l.bf16 %v4451_v35  ;;  %3908 = vmatprep.mubr.msk.bf16.mxu0 %vm441_vm2, %v1654_v53 }
 0x612   : > { %v4461_v4 = vpop.permute.xlu0 %4460 }
 0x613   : > { %v4463_v6 = vunpack.i.h.bf16 %v4461_v4  ;;  %v4462_v7 = vunpack.i.l.bf16 %v4461_v4  ;;  %v1645_v36 = vsel %vm695_vm4, %v1637_v63, %v4452_v41  ;;  %v1646_v8 = vsel %vm695_vm4, %v1638_v37, %v4453_v2  ;;  %4193 = vmatpush3.bf16.msra.mxu1 %v4684_v45 }
 0x614   : > { %v4456_v30 = vpop.permute.xlu1 %4455  ;;  %v1653_v21 = vpack.c.bf16 %v1646_v8, %v1645_v36 }
 0x615   : > { %v1632_v42 = vsel %vm441_vm2, %v5258_v46, %v4463_v6  ;;  %v1631_v12 = vsel %vm441_vm2, %v5249_v33, %v4462_v7  ;;  %v4458_v14 = vunpack.i.h.bf16 %v4456_v30  ;;  %v4457_v18 = vunpack.i.l.bf16 %v4456_v30 }
 0x616   : > { %v4466_v19 = vpop.permute.xlu0 %4465 }
 0x617   : > { %v4468_v24 = vunpack.i.h.bf16 %v4466_v19  ;;  %v4467_v62 = vunpack.i.l.bf16 %v4466_v19  ;;  %v1639_v25 = vsel %vm686_vm3, %v1631_v12, %v4457_v18  ;;  %v1640_v29 = vsel %vm686_vm3, %v1632_v42, %v4458_v14 }
 0x618   : > { %1807 = vmatmul.mubr.bf16.gmra.mrb[40].mxu0 %v1653_v21 }
 0x619   : > { %3909 = vmatprep.mubr.msk.bf16.mxu0 %vm441_vm2, %v1656_v39  ;;  %v1647_v46 = vsel %vm695_vm4, %v1639_v25, %v4467_v62  ;;  %v1648_v31 = vsel %vm695_vm4, %v1640_v29, %v4468_v24  ;;  %v4685_v29 = vld [vmem:[%s5967_s8] sm:$0xff]  }
 0x61a   : > { %v1655_v33 = vpack.c.bf16 %v1648_v31, %v1647_v46  ;;  %4202 = vmatprep.subr.bf16.mxu1 %v4685_v29  ;;  %v4686_v46 = vld [vmem:[%s5967_s8 + $0x8] sm:$0xff]   ;;  %v3929_v31 = vld [vmem:[%s5961_s2 + $0x4] sm:$0xf] }
 0x620   : > { %1815 = vmatmul.mubr.bf16.gmra.mrb[44].mxu0 %v1655_v33  ;;  %v3915_v33 = vld [vmem:[%s5966_s7 + $0x2] ss:$0 sm:$0xff] }
 0x6da   : > { %v1792_v40 = vpop.f32.mrb[32].mxu0 }
 0x6db   : > { %v1793_v43 = vadd.f32 %v3895_v38, %v1792_v40  ;;  %v1794_v44 = vpop.f32.mrb[33].mxu0 }
 0x6dc   : > { %v1795_v47 = vpop.f32.mrb[34].mxu0 }
 0x6dd   : > { %v1796_v49 = vadd.f32 %v3895_v38, %v1795_v47  ;;  %v1797_v51 = vpop.f32.mrb[35].mxu0  ;;  %v1823_v26 = vmax.f32 %v1793_v43, 0.0 }
 0x6df   : > { %v1824_v28 = vmax.f32 %v1796_v49, 0.0 }
 0x6e1   : > { %v1831_v52 = vpack.c.bf16 %v1824_v28, %v1823_v26 }
 0x6e3   : > { %4194 = vmatprep.mubr.msk.bf16.mxu1 %vm441_vm2, %v1831_v52  ;;  %v1800_v53 = vpop.f32.mrb[36].mxu0 }
 0x6e4   : > { %v1801_v58 = vadd.f32 %v3895_v38, %v1800_v53  ;;  %v1802_v54 = vpop.f32.mrb[37].mxu0 }
 0x6e5   : > { %v1803_v55 = vpop.f32.mrb[38].mxu0 }
 0x6e6   : > { %v1804_v57 = vadd.f32 %v3895_v38, %v1803_v55  ;;  %v1805_v35 = vpop.f32.mrb[39].mxu0  ;;  %v1825_v37 = vmax.f32 %v1801_v58, 0.0 }
 0x6e8   : > { %v1826_v63 = vmax.f32 %v1804_v57, 0.0 }
 0x6ea   : > { %v1832_v2 = vpack.c.bf16 %v1826_v63, %v1825_v37 }
 0x6eb   : > { %v1808_v41 = vpop.f32.mrb[40].mxu0 }
 0x6ec   : > { %v1809_v4 = vadd.f32 %v3895_v38, %v1808_v41  ;;  %v1810_v6 = vpop.f32.mrb[41].mxu0  ;;  %4195 = vmatmul.mubr.msk.bf16.vlgmr.msra.gmra.mrb[24].mxu1 %vm441_vm2, %v1832_v2 }
 0x6ed   : > { %v1811_v7 = vpop.f32.mrb[42].mxu0  ;;  %4203 = vmatpush3.bf16.msra.mxu1 %v4685_v29 }
 0x6ee   : > { %v1812_v36 = vadd.f32 %v3895_v38, %v1811_v7  ;;  %v1813_v8 = vpop.f32.mrb[43].mxu0  ;;  %v1827_v30 = vmax.f32 %v1809_v4, 0.0  ;;  %4204 = vmatprep.subr.bf16.mxu1 %v4686_v46 }
 0x6f0   : > { %v1828_v11 = vmax.f32 %v1812_v36, 0.0 }
 0x6f1   : > { %4205 = vmatpush3.bf16.msra.mxu1 %v4686_v46 }
 0x6f2   : > { %v1833_v42 = vpack.c.bf16 %v1828_v11, %v1827_v30  ;;  %4273 = vmatprep.subr.msk.bf16.mxu1 %vm465_vm0, %v3929_v31 }
 0x6f3   : > { %v1816_v12 = vpop.f32.mrb[44].mxu0 }
 0x6f4   : > { %v1817_v14 = vadd.f32 %v3895_v38, %v1816_v12  ;;  %v1818_v18 = vpop.f32.mrb[45].mxu0  ;;  %4198 = vmatprep.mubr.msk.bf16.mxu1 %vm441_vm2, %v1833_v42 }
 0x6f5   : > { %v1819_v19 = vpop.f32.mrb[46].mxu0  ;;  %v4694_v18 = vld [vmem:[%s5963_s4 + $0x128] sm:$0xff]  }
 0x6f6   : > { %v1820_v21 = vadd.f32 %v3895_v38, %v1819_v19  ;;  %v1821_v24 = vpop.f32.mrb[47].mxu0  ;;  %v1829_v62 = vmax.f32 %v1817_v14, 0.0  ;;  %v4693_v14 = vld [vmem:[%s5963_s4 + $0x120] sm:$0xff]  }
 0x6f8   : > { %v1830_v39 = vmax.f32 %v1820_v21, 0.0 }
 0x6fa   : > { %v1834_v25 = vpack.c.bf16 %v1830_v39, %v1829_v62 }
 0x6fc   : > { %4199 = vmatmul.mubr.msk.bf16.gmra.mrb[28].mxu1 %vm441_vm2, %v1834_v25 }
 0x7bf   : > { %v4196_v34 = vpop.f32.mrb[24].mxu1 }
 0x7c0   : > { %v1915_v45 = vadd.f32 %v4196_v34, %v3915_v33  ;;  %v1906_v38 = vpop.f32.mrb[25].mxu1 }
 0x7c1   : > { %v1907_v40 = vadd.f32 %v3915_v33, %v1906_v38  ;;  %v4197_v43 = vpop.f32.mrb[26].mxu1 }
 0x7c2   : > { %v1918_v44 = vadd.f32 %v4197_v43, %v3915_v33  ;;  %v1909_v47 = vpop.f32.mrb[27].mxu1  ;;  %v1939_v26 = vadd.f32 %v1915_v45, %v5176_v48 }
 0x7c3   : > { %v1937_v49 = vadd.f32 %v1907_v40, %v5180_v50  ;;  %v1910_v51 = vadd.f32 %v3915_v33, %v1909_v47 }
 0x7c4   : > { %v1940_v28 = vadd.f32 %v1918_v44, %v5186_v20  ;;  %v5342_v55 = vmul.f32 %v1939_v26, %v5010_v17  ;;  %v2092_v20 = vsel %vm465_vm0, %v3929_v31, 0  ;;  %v3931_v31 = vld [vmem:[%s5962_s3 + $0x1] ss:$0 sm:$0xff] }
 0x7c5   : > { %v1938_v52 = vadd.f32 %v1910_v51, %v5191_v23  ;;  %v5336_v58 = vmul.f32 %v1937_v49, %v5007_v3  ;;  %v4695_v49 = vld [vmem:[%s5963_s4 + $0x130] sm:$0xff]  }
 0x7c6   : > { %v5333_v53 = vmul.f32 %v1940_v28, %v5017_v22 }
 0x7c7   : > { %v5339_v54 = vmul.f32 %v1938_v52, %v5002_v1 }
 0x7c8   : > { %v1954_v48 = vpack.c.bf16 %v5333_v53, %v5342_v55 }
 0x7c9   : > { %v1953_v50 = vpack.c.bf16 %v5339_v54, %v5336_v58 }
 0x7cb   : > { %4206 = vmatprep.mubr.msk.bf16.mxu1 %vm441_vm2, %v1953_v50 }
 0x7cc   : > { %4207 = vmatmul.mubr.msk.bf16.vlgmr.msra.gmra.mrb[32].mxu1 %vm441_vm2, %v1954_v48 }
 0x7cd   : > { %4215 = vmatpush3.bf16.msra.mxu1 %v2092_v20 }
 0x7cf   : > { %v4200_v23 = vpop.f32.mrb[28].mxu1 }
 0x7d0   : > { %v1931_v57 = vadd.f32 %v4200_v23, %v3915_v33  ;;  %v1922_v35 = vpop.f32.mrb[29].mxu1 }
 0x7d1   : > { %v1923_v37 = vadd.f32 %v3915_v33, %v1922_v35  ;;  %v4201_v63 = vpop.f32.mrb[30].mxu1 }
 0x7d2   : > { %v1934_v2 = vadd.f32 %v4201_v63, %v3915_v33  ;;  %v1925_v41 = vpop.f32.mrb[31].mxu1  ;;  %v1943_v7 = vadd.f32 %v1931_v57, %v5220_v15 }
 0x7d3   : > { %v1941_v4 = vadd.f32 %v1923_v37, %v5225_v59  ;;  %v1926_v6 = vadd.f32 %v3915_v33, %v1925_v41 }
 0x7d4   : > { %v1944_v36 = vadd.f32 %v1934_v2, %v5231_v61  ;;  %v5365_v12 = vmul.f32 %v1943_v7, %v5056_v56  ;;  %v4687_v61 = vld [vmem:[%s5963_s4 + $0xf0] sm:$0xff]  }
 0x7d5   : > { %v1942_v8 = vadd.f32 %v1926_v6, %v5238_v0  ;;  %v5359_v11 = vmul.f32 %v1941_v4, %v5041_v32  ;;  %2437 = vmatpush1.bf16.msra.mxu0 %v4687_v61  ;;  %v4688_v0 = vld [vmem:[%s5963_s4 + $0xf8] sm:$0xff]  }
 0x7d6   : > { %v5356_v30 = vmul.f32 %v1944_v36, %v5066_v60  ;;  %2438 = vmatprep.subr.bf16.mxu0 %v4734_v16  ;;  %v4696_v61 = vld [vmem:[%s5963_s4 + $0x138] sm:$0xff]  }
 0x7d7   : > { %v5362_v42 = vmul.f32 %v1942_v8, %v5046_v27 }
 0x7d8   : > { %v1956_v15 = vpack.c.bf16 %v5356_v30, %v5365_v12 }
 0x7d9   : > { %v1955_v59 = vpack.c.bf16 %v5362_v42, %v5359_v11  ;;  %2439 = vmatpush1.bf16.msra.mxu0 %v4688_v0 }
 0x7da   : > { %2440 = vmatprep.subr.bf16.mxu0 %v4734_v16 }
 0x7db   : > { %4210 = vmatprep.mubr.msk.bf16.mxu1 %vm441_vm2, %v1955_v59 }
 0x7dc   : > { %4211 = vmatmul.mubr.msk.bf16.gmra.mrb[36].mxu1 %vm441_vm2, %v1956_v15 }
 0x7dd   : > { %4216 = vmatprep.mubr.msk.bf16.mxu1 %vm452_vm1, %v4817_v5  ;;  %v4689_v5 = vld [vmem:[%s5963_s4 + $0x100] sm:$0xff]  }
 0x7de   : > { %2441 = vmatpush1.bf16.msra.mxu0 %v4689_v5 }
 0x7df   : > { %2442 = vmatprep.subr.bf16.mxu0 %v4734_v16 }
 0x7e4   : > { %4217 = vmatmul.mubr.msk.bf16.vlgmr.msra.gmra.mrb[40].mxu1 %vm452_vm1, %v4819_v9  ;;  %v4690_v9 = vld [vmem:[%s5963_s4 + $0x108] sm:$0xff]  }
 0x7e5   : > { %4220 = vmatprep.mubr.msk.bf16.mxu1 %vm452_vm1, %v4821_v10  ;;  %2443 = vmatpush1.bf16.msra.mxu0 %v4690_v9  ;;  %v4691_v10 = vld [vmem:[%s5963_s4 + $0x110] sm:$0xff]  }
 0x7e6   : > { %2444 = vmatprep.subr.bf16.mxu0 %v4734_v16 }
 0x7e9   : > { %2445 = vmatpush1.bf16.msra.mxu0 %v4691_v10 }
 0x7ea   : > { %2446 = vmatprep.subr.bf16.mxu0 %v4734_v16 }
 0x7ec   : > { %4221 = vmatmul.mubr.msk.bf16.gmra.mrb[44].mxu1 %vm452_vm1, %v4829_v13  ;;  %v4692_v13 = vld [vmem:[%s5963_s4 + $0x118] sm:$0xff]  }
 0x7ed   : > { %2447 = vmatpush1.bf16.msra.mxu0 %v4692_v13 }
 0x7ee   : > { %2448 = vmatprep.subr.bf16.mxu0 %v4734_v16 }
 0x7f1   : > { %2449 = vmatpush1.bf16.msra.mxu0 %v4693_v14 }
 0x7f2   : > { %2450 = vmatprep.subr.bf16.mxu0 %v4734_v16 }
 0x7f5   : > { %2451 = vmatpush1.bf16.msra.mxu0 %v4694_v18 }
 0x7f6   : > { %2452 = vmatprep.subr.bf16.mxu0 %v4734_v16 }
 0x7f9   : > { %2453 = vmatpush1.bf16.msra.mxu0 %v4695_v49 }
 0x7fa   : > { %2454 = vmatprep.subr.bf16.mxu0 %v4734_v16 }
 0x7fd   : > { %2455 = vmatpush1.bf16.msra.mxu0 %v4696_v61 }
 0x89f   : > { %v5413_v19 = vpop.f32.mrb[32].mxu1 }
 0x8a0   : > { %v5415_v21 = vpop.f32.mrb[33].mxu1 }
 0x8a1   : > { %v5417_v24 = vpop.f32.mrb[34].mxu1 }
 0x8a2   : > { %v5419_v62 = vpop.f32.mrb[35].mxu1 }
 0x8af   : > { %v5421_v39 = vpop.f32.mrb[36].mxu1 }
 0x8b0   : > { %v5423_v25 = vpop.f32.mrb[37].mxu1 }
 0x8b1   : > { %v5425_v29 = vpop.f32.mrb[38].mxu1 }
 0x8b2   : > { %v5427_v46 = vpop.f32.mrb[39].mxu1 }
 0x8b7   : > { %v4218_v33 = vpop.f32.mrb[40].mxu1 }
 0x8b8   : > { %v5432_v34 = vadd.f32 %v4218_v33, %v3931_v31  ;;  %v2128_v45 = vpop.f32.mrb[41].mxu1 }
 0x8b9   : > { %v5434_v38 = vadd.f32 %v3931_v31, %v2128_v45  ;;  %v4219_v40 = vpop.f32.mrb[42].mxu1 }
 0x8ba   : > { %2161 = vst.msk [vmem:[#allocation2 + $0x18] sm:$0xff] %vm441_vm2, %v5432_v34  ;;  %v5438_v43 = vadd.f32 %v4219_v40, %v3931_v31  ;;  %v2131_v44 = vpop.f32.mrb[43].mxu1 }
 0x8bb   : > { %2159 = vst.msk [vmem:[#allocation2 + $0x8] sm:$0xff] %vm441_vm2, %v5434_v38  ;;  %v5442_v47 = vadd.f32 %v3931_v31, %v2131_v44 }
 0x8bc   : > { %2162 = vst.msk [vmem:[#allocation2 + $0x20] sm:$0xff] %vm441_vm2, %v5438_v43 }
 0x8bd   : > { %2160 = vst.msk [vmem:[#allocation2 + $0x10] sm:$0xff] %vm441_vm2, %v5442_v47 }
 0x8bf   : > { %v4222_v51 = vpop.f32.mrb[44].mxu1 }
 0x8c0   : > { %v5451_v26 = vadd.f32 %v4222_v51, %v3931_v31  ;;  %v2144_v28 = vpop.f32.mrb[45].mxu1 }
 0x8c1   : > { %v5454_v52 = vadd.f32 %v3931_v31, %v2144_v28  ;;  %v4223_v50 = vpop.f32.mrb[46].mxu1  ;;  %v2185_v33 = vld [vmem:[#allocation2 + $0x18] sm:$0xff] }
 0x8c2   : > { %2165 = vst.msk [vmem:[#allocation2 + $0x38] sm:$0xff] %vm441_vm2, %v5451_v26  ;;  %v5458_v48 = vadd.f32 %v4223_v50, %v3931_v31  ;;  %v2147_v20 = vpop.f32.mrb[47].mxu1  ;;  %v2183_v57 = vld [vmem:[#allocation2 + $0x8] sm:$0xff] }
 0x8c3   : > { %2163 = vst.msk [vmem:[#allocation2 + $0x28] sm:$0xff] %vm441_vm2, %v5454_v52  ;;  %v5462_v23 = vadd.f32 %v3931_v31, %v2147_v20  ;;  %v2175_v4 = vld [vmem:[#allocation2 + $0x7] sm:$0xff]  ;;  %v2178_v8 = vld [vmem:[#allocation2 + $0x1f] sm:$0xff] }
 0x8c4   : > { %2166 = vst.msk [vmem:[#allocation2 + $0x40] sm:$0xff] %vm441_vm2, %v5458_v48  ;;  %v2199_v35 = vld [vmem:[#allocation2 + $0xa] sm:$0xff]  ;;  %v2200_v37 = vld [vmem:[#allocation2 + $0x12] sm:$0xff]  ;;  %v2186_v10 = vld [vmem:[#allocation2 + $0x20] sm:$0xff] }
 0x8c5   : > { %v2184_v63 = vld [vmem:[#allocation2 + $0x10] sm:$0xff]  ;;  %2164 = vst.msk [vmem:[#allocation2 + $0x30] sm:$0xff] %vm441_vm2, %v5462_v23  ;;  %v2328_v2 = vpack.c.bf16 %v2200_v37, %v2199_v35  ;;  %v2193_v13 = vld [vmem:[#allocation2 + $0x19] sm:$0xff]  ;;  %v4484_v45 = vpack.i.bf16 %v2186_v10, %v2185_v33 }
 0x8c6   : > { %v4474_v41 = vpack.i.bf16 %v2184_v63, %v2183_v57  ;;  %v2176_v6 = vld [vmem:[#allocation2 + $0xf] sm:$0xff]  ;;  %v2177_v36 = vld [vmem:[#allocation2 + $0x17] sm:$0xff] }
 0x8c7   : > { %v4469_v7 = vpack.i.bf16 %v2176_v6, %v2175_v4  ;;  %3968 = vmatprep.mubr.msk.bf16.mxu0 %vm441_vm2, %v2328_v2  ;;  %v2191_v59 = vld [vmem:[#allocation2 + $0x9] sm:$0xff]  ;;  %v2192_v15 = vld [vmem:[#allocation2 + $0x11] sm:$0xff]  ;;  %v4489_v0 = vpack.i.bf16 %v2178_v8, %v2177_v36 }
 0x8c8   : > { %4475 = vrot.lane.b32.xlu0 %v4474_v41, %s4737_s13  ;;  %v4479_v5 = vpack.i.bf16 %v2192_v15, %v2191_v59 }
 0x8c9   : > { %4470 = vrot.lane.b32.xlu1 %v4469_v7, %s4736_s12  ;;  %v2189_v41 = vld [vmem:[#allocation2 + $0x38] sm:$0xff] }
 0x8ca   : > { %v2194_v9 = vld [vmem:[#allocation2 + $0x21] sm:$0xff] }
 0x8cb   : > { %v2187_v14 = vld [vmem:[#allocation2 + $0x28] sm:$0xff]  ;;  %v4494_v31 = vpack.i.bf16 %v2194_v9, %v2193_v13  ;;  %v2182_v50 = vld [vmem:[#allocation2 + $0x3f] sm:$0xff] }
 0x8cc   : > { %4490 = vrot.lane.b32.xlu0 %v4489_v0, %s4736_s12  ;;  %v2188_v18 = vld [vmem:[#allocation2 + $0x30] sm:$0xff]  ;;  %v2179_v49 = vld [vmem:[#allocation2 + $0x27] sm:$0xff]  ;;  %v2197_v63 = vld [vmem:[#allocation2 + $0x39] sm:$0xff] }
 0x8cd   : > { %4480 = vrot.lane.b32.xlu1 %v4479_v5, %s4735_s30  ;;  %v4504_v40 = vpack.i.bf16 %v2188_v18, %v2187_v14  ;;  %v2180_v44 = vld [vmem:[#allocation2 + $0x2f] sm:$0xff]  ;;  %v2181_v28 = vld [vmem:[#allocation2 + $0x37] sm:$0xff]  ;;  %v2198_v2 = vld [vmem:[#allocation2 + $0x41] sm:$0xff] }
 0x8ce   : > { %v4499_v51 = vpack.i.bf16 %v2180_v44, %v2179_v49  ;;  %v2195_v20 = vld [vmem:[#allocation2 + $0x29] sm:$0xff]  ;;  %v2196_v57 = vld [vmem:[#allocation2 + $0x31] sm:$0xff]  ;;  %v4519_v35 = vpack.i.bf16 %v2182_v50, %v2181_v28  ;;  %v2190_v4 = vld [vmem:[#allocation2 + $0x40] sm:$0xff]  ;;  %v4524_v6 = vpack.i.bf16 %v2198_v2, %v2197_v63 }
 0x8cf   : > { %v4509_v37 = vpack.i.bf16 %v2196_v57, %v2195_v20  ;;  %v4514_v7 = vpack.i.bf16 %v2190_v4, %v2189_v41  ;;  %v2167_v5 = vld [vmem:[#allocation2 + $0x6] sm:$0xff]  ;;  %v2168_v9 = vld [vmem:[#allocation2 + $0xe] sm:$0xff]  ;;  %v2201_v57 = vld [vmem:[#allocation2 + $0x1a] sm:$0xff] }
 0x8d0   : > { %4495 = vrot.lane.b32.xlu0 %v4494_v31, %s4735_s30  ;;  %v2169_v2 = vld [vmem:[#allocation2 + $0x16] sm:$0xff]  ;;  %v2170_v41 = vld [vmem:[#allocation2 + $0x1e] sm:$0xff] }
 0x8d1   : > { %4485 = vrot.lane.b32.xlu1 %v4484_v45, %s4737_s13  ;;  %v2202_v45 = vld [vmem:[#allocation2 + $0x22] sm:$0xff] }
 0x8d2   : > { %v2330_v63 = vpack.c.bf16 %v2202_v45, %v2201_v57 }
 0x8d4   : > { %4505 = vrot.lane.b32.xlu0 %v4504_v40, %s4737_s13 }
 0x8d5   : > { %4500 = vrot.lane.b32.xlu1 %v4499_v51, %s4736_s12 }
 0x8d8   : > { %4520 = vrot.lane.b32.xlu0 %v4519_v35, %s4736_s12 }
 0x8d9   : > { %4510 = vrot.lane.b32.xlu1 %v4509_v37, %s4735_s30 }
 0x8dc   : > { %4525 = vrot.lane.b32.xlu0 %v4524_v6, %s4735_s30 }
 0x8dd   : > { %4515 = vrot.lane.b32.xlu1 %v4514_v7, %s4737_s13 }
 0x93a   : > { %v4476_v36 = vpop.permute.xlu0 %4475 }
 0x93b   : > { %v4471_v8 = vpop.permute.xlu1 %4470  ;;  %v4478_v61 = vunpack.i.h.bf16 %v4476_v36  ;;  %v4477_v0 = vunpack.i.l.bf16 %v4476_v36 }
 0x93c   : > { %v4473_v59 = vunpack.i.h.bf16 %v4471_v8  ;;  %v4472_v15 = vunpack.i.l.bf16 %v4471_v8 }
 0x93e   : > { %v2303_v10 = vsel %vm441_vm2, %v2167_v5, %v4472_v15  ;;  %v2304_v13 = vsel %vm441_vm2, %v2168_v9, %v4473_v59  ;;  %v4491_v14 = vpop.permute.xlu0 %4490 }
 0x93f   : > { %v4481_v18 = vpop.permute.xlu1 %4480  ;;  %v4493_v40 = vunpack.i.h.bf16 %v4491_v14  ;;  %v4492_v44 = vunpack.i.l.bf16 %v4491_v14  ;;  %v2311_v49 = vsel %vm686_vm3, %v2303_v10, %v4477_v0  ;;  %v2312_v51 = vsel %vm686_vm3, %v2304_v13, %v4478_v61 }
 0x940   : > { %v4483_v31 = vunpack.i.h.bf16 %v4481_v18  ;;  %v4482_v33 = vunpack.i.l.bf16 %v4481_v18  ;;  %v2203_v18 = vld [vmem:[#allocation2 + $0x2a] sm:$0xff] }
 0x941   : > { %v2306_v8 = vsel %vm441_vm2, %v2170_v41, %v4493_v40  ;;  %v2305_v59 = vsel %vm441_vm2, %v2169_v2, %v4492_v44  ;;  %v2171_v40 = vld [vmem:[#allocation2 + $0x26] sm:$0xff]  ;;  %v2172_v44 = vld [vmem:[#allocation2 + $0x2e] sm:$0xff] }
 0x942   : > { %v2319_v28 = vsel %vm695_vm4, %v2311_v49, %v4482_v33  ;;  %v2320_v50 = vsel %vm695_vm4, %v2312_v51, %v4483_v31  ;;  %v4496_v20 = vpop.permute.xlu0 %4495  ;;  %v2204_v31 = vld [vmem:[#allocation2 + $0x32] sm:$0xff] }
 0x943   : > { %v2327_v35 = vpack.c.bf16 %v2320_v50, %v2319_v28  ;;  %v4486_v37 = vpop.permute.xlu1 %4485  ;;  %v4498_v4 = vunpack.i.h.bf16 %v4496_v20  ;;  %v4497_v6 = vunpack.i.l.bf16 %v4496_v20  ;;  %v2332_v50 = vpack.c.bf16 %v2204_v31, %v2203_v18 }
 0x944   : > { %v4488_v7 = vunpack.i.h.bf16 %v4486_v37  ;;  %v4487_v36 = vunpack.i.l.bf16 %v4486_v37 }
 0x945   : > { %2469 = vmatmul.mubr.bf16.vlgmr.msra.gmra.mrb[48].mxu0 %v2327_v35 }
 0x946   : > { %v2314_v15 = vsel %vm686_vm3, %v2306_v8, %v4488_v7  ;;  %v2313_v61 = vsel %vm686_vm3, %v2305_v59, %v4487_v36  ;;  %3969 = vmatprep.mubr.msk.bf16.mxu0 %vm441_vm2, %v2330_v63  ;;  %v4506_v0 = vpop.permute.xlu0 %4505  ;;  %v2205_v8 = vld [vmem:[#allocation2 + $0x3a] sm:$0xff]  ;;  %v2206_v59 = vld [vmem:[#allocation2 + $0x42] sm:$0xff] }
 0x947   : > { %v4501_v5 = vpop.permute.xlu1 %4500  ;;  %v2321_v13 = vsel %vm695_vm4, %v2313_v61, %v4497_v6  ;;  %v2322_v14 = vsel %vm695_vm4, %v2314_v15, %v4498_v4  ;;  %v4508_v33 = vunpack.i.h.bf16 %v4506_v0  ;;  %v4507_v45 = vunpack.i.l.bf16 %v4506_v0 }
 0x948   : > { %v4503_v9 = vunpack.i.h.bf16 %v4501_v5  ;;  %v4502_v10 = vunpack.i.l.bf16 %v4501_v5  ;;  %v2329_v28 = vpack.c.bf16 %v2322_v14, %v2321_v13  ;;  %v2173_v5 = vld [vmem:[#allocation2 + $0x36] sm:$0xff]  ;;  %v2334_v13 = vpack.c.bf16 %v2206_v59, %v2205_v8 }
 0x94a   : > { %v4521_v49 = vpop.permute.xlu0 %4520  ;;  %v2308_v20 = vsel %vm441_vm2, %v2172_v44, %v4503_v9  ;;  %v2307_v57 = vsel %vm441_vm2, %v2171_v40, %v4502_v10  ;;  %v2174_v9 = vld [vmem:[#allocation2 + $0x3e] sm:$0xff] }
 0x94b   : > { %v4511_v51 = vpop.permute.xlu1 %4510  ;;  %v2315_v2 = vsel %vm686_vm3, %v2307_v57, %v4507_v45  ;;  %v2316_v41 = vsel %vm686_vm3, %v2308_v20, %v4508_v33  ;;  %v4523_v4 = vunpack.i.h.bf16 %v4521_v49  ;;  %v4522_v6 = vunpack.i.l.bf16 %v4521_v49  ;;  %v3957_v20 = vld [vmem:[%s5964_s5 + $0x3] ss:$0 sm:$0xff] }
 0x94c   : > { %v4513_v35 = vunpack.i.h.bf16 %v4511_v51  ;;  %v4512_v37 = vunpack.i.l.bf16 %v4511_v51 }
 0x94d   : > { %2477 = vmatmul.mubr.bf16.gmra.mrb[52].mxu0 %v2329_v28  ;;  %v2310_v14 = vsel %vm441_vm2, %v2174_v9, %v4523_v4  ;;  %v2309_v18 = vsel %vm441_vm2, %v2173_v5, %v4522_v6  ;;  %v4697_v28 = vld [vmem:[%s5965_s6 + $0x30] sm:$0xff]  }
 0x94e   : > { %3970 = vmatprep.mubr.msk.bf16.mxu0 %vm441_vm2, %v2332_v50  ;;  %v2323_v7 = vsel %vm695_vm4, %v2315_v2, %v4512_v37  ;;  %v2324_v36 = vsel %vm695_vm4, %v2316_v41, %v4513_v35  ;;  %v4526_v15 = vpop.permute.xlu0 %4525  ;;  %4224 = vmatprep.subr.bf16.mxu1 %v4697_v28  ;;  %v4698_v50 = vld [vmem:[%s5965_s6 + $0x38] sm:$0xff]  }
 0x94f   : > { %v4516_v63 = vpop.permute.xlu1 %4515  ;;  %v2331_v10 = vpack.c.bf16 %v2324_v36, %v2323_v7  ;;  %v4528_v31 = vunpack.i.h.bf16 %v4526_v15  ;;  %v4527_v33 = vunpack.i.l.bf16 %v4526_v15  ;;  %4225 = vmatpush3.bf16.msra.mxu1 %v4697_v28 }
 0x950   : > { %v4518_v61 = vunpack.i.h.bf16 %v4516_v63  ;;  %v4517_v0 = vunpack.i.l.bf16 %v4516_v63  ;;  %4226 = vmatprep.subr.bf16.mxu1 %v4698_v50 }
 0x952   : > { %v2318_v45 = vsel %vm686_vm3, %v2310_v14, %v4518_v61  ;;  %v2317_v40 = vsel %vm686_vm3, %v2309_v18, %v4517_v0 }
 0x953   : > { %v2325_v44 = vsel %vm695_vm4, %v2317_v40, %v4527_v33  ;;  %v2326_v49 = vsel %vm695_vm4, %v2318_v45, %v4528_v31  ;;  %4227 = vmatpush3.bf16.msra.mxu1 %v4698_v50 }
 0x954   : > { %v2333_v51 = vpack.c.bf16 %v2326_v49, %v2325_v44  ;;  %2901 = vmatprep.subr.bf16.mxu1 %v4734_v16 }
 0x955   : > { %2485 = vmatmul.mubr.bf16.gmra.mrb[56].mxu0 %v2331_v10 }
 0x956   : > { %3971 = vmatprep.mubr.msk.bf16.mxu0 %vm441_vm2, %v2334_v13 }
 0x95d   : > { %2493 = vmatmul.mubr.bf16.gmra.mrb[60].mxu0 %v2333_v51 }
 0xa18   : > { %v2470_v57 = vpop.f32.mrb[48].mxu0 }
 0xa19   : > { %v2471_v35 = vadd.f32 %v3957_v20, %v2470_v57  ;;  %v2472_v37 = vpop.f32.mrb[49].mxu0 }
 0xa1a   : > { %v2473_v63 = vpop.f32.mrb[50].mxu0 }
 0xa1b   : > { %v2474_v2 = vadd.f32 %v3957_v20, %v2473_v63  ;;  %v2475_v41 = vpop.f32.mrb[51].mxu0  ;;  %v2501_v4 = vmax.f32 %v2471_v35, 0.0 }
 0xa1d   : > { %v2502_v6 = vmax.f32 %v2474_v2, 0.0 }
 0xa1f   : > { %v2509_v7 = vpack.c.bf16 %v2502_v6, %v2501_v4  ;;  %v4699_v4 = vld [vmem:[%s5963_s4 + $0x140] sm:$0xff]   ;;  %v4700_v6 = vld [vmem:[%s5963_s4 + $0x148] sm:$0xff]  }
 0xa20   : > { %v2478_v36 = vpop.f32.mrb[52].mxu0 }
 0xa21   : > { %v2479_v8 = vadd.f32 %v3957_v20, %v2478_v36  ;;  %v2480_v59 = vpop.f32.mrb[53].mxu0  ;;  %4228 = vmatprep.mubr.msk.bf16.mxu1 %vm441_vm2, %v2509_v7  ;;  %v4702_v7 = vld [vmem:[%s5963_s4 + $0x158] sm:$0xff]   ;;  %v4703_v36 = vld [vmem:[%s5963_s4 + $0x160] sm:$0xff]  }
 0xa22   : > { %v2481_v15 = vpop.f32.mrb[54].mxu0  ;;  %v4705_v59 = vld [vmem:[%s5963_s4 + $0x170] sm:$0xff]  }
 0xa23   : > { %v2482_v61 = vadd.f32 %v3957_v20, %v2481_v15  ;;  %v2483_v0 = vpop.f32.mrb[55].mxu0  ;;  %v2503_v5 = vmax.f32 %v2479_v8, 0.0  ;;  %v4704_v8 = vld [vmem:[%s5963_s4 + $0x168] sm:$0xff]   ;;  %v4706_v15 = vld [vmem:[%s5963_s4 + $0x178] sm:$0xff]  }
 0xa25   : > { %v2504_v9 = vmax.f32 %v2482_v61, 0.0  ;;  %v3977_v61 = vld [vmem:[%s5966_s7 + $0x3] ss:$0 sm:$0xff] }
 0xa27   : > { %v2510_v10 = vpack.c.bf16 %v2504_v9, %v2503_v5 }
 0xa28   : > { %v2486_v13 = vpop.f32.mrb[56].mxu0 }
 0xa29   : > { %v2487_v14 = vadd.f32 %v3957_v20, %v2486_v13  ;;  %v2488_v18 = vpop.f32.mrb[57].mxu0  ;;  %4229 = vmatmul.mubr.msk.bf16.vlgmr.msra.gmra.mrb[48].mxu1 %vm441_vm2, %v2510_v10 }
 0xa2a   : > { %v2489_v31 = vpop.f32.mrb[58].mxu0  ;;  %2902 = vmatpush1.bf16.msra.mxu1 %v4699_v4 }
 0xa2b   : > { %v2490_v33 = vadd.f32 %v3957_v20, %v2489_v31  ;;  %v2491_v45 = vpop.f32.mrb[59].mxu0  ;;  %v2505_v40 = vmax.f32 %v2487_v14, 0.0  ;;  %2903 = vmatprep.subr.bf16.mxu1 %v4734_v16 }
 0xa2d   : > { %v2506_v44 = vmax.f32 %v2490_v33, 0.0 }
 0xa2e   : > { %2904 = vmatpush1.bf16.msra.mxu1 %v4700_v6 }
 0xa2f   : > { %v2511_v49 = vpack.c.bf16 %v2506_v44, %v2505_v40  ;;  %2905 = vmatprep.subr.bf16.mxu1 %v4734_v16 }
 0xa30   : > { %v2494_v51 = vpop.f32.mrb[60].mxu0 }
 0xa31   : > { %v2495_v28 = vadd.f32 %v3957_v20, %v2494_v51  ;;  %v2496_v50 = vpop.f32.mrb[61].mxu0  ;;  %4232 = vmatprep.mubr.msk.bf16.mxu1 %vm441_vm2, %v2511_v49 }
 0xa32   : > { %v2497_v57 = vpop.f32.mrb[62].mxu0 }
 0xa33   : > { %v2498_v35 = vadd.f32 %v3957_v20, %v2497_v57  ;;  %v2499_v37 = vpop.f32.mrb[63].mxu0  ;;  %v2507_v63 = vmax.f32 %v2495_v28, 0.0  ;;  %v4701_v20 = vld [vmem:[%s5963_s4 + $0x150] sm:$0xff]  }
 0xa34   : > { %2906 = vmatpush1.bf16.msra.mxu1 %v4701_v20 }
 0xa35   : > { %v2508_v2 = vmax.f32 %v2498_v35, 0.0  ;;  %2907 = vmatprep.subr.bf16.mxu1 %v4734_v16 }
 0xa37   : > { %v2512_v41 = vpack.c.bf16 %v2508_v2, %v2507_v63 }
 0xa38   : > { %2908 = vmatpush1.bf16.msra.mxu1 %v4702_v7 }
 0xa39   : > { %4233 = vmatmul.mubr.msk.bf16.gmra.mrb[52].mxu1 %vm441_vm2, %v2512_v41  ;;  %2909 = vmatprep.subr.bf16.mxu1 %v4734_v16 }
 0xa3c   : > { %2910 = vmatpush1.bf16.msra.mxu1 %v4703_v36 }
 0xa3d   : > { %2911 = vmatprep.subr.bf16.mxu1 %v4734_v16 }
 0xa40   : > { %2912 = vmatpush1.bf16.msra.mxu1 %v4704_v8 }
 0xa41   : > { %2913 = vmatprep.subr.bf16.mxu1 %v4734_v16 }
 0xa44   : > { %2914 = vmatpush1.bf16.msra.mxu1 %v4705_v59 }
 0xa45   : > { %2915 = vmatprep.subr.bf16.mxu1 %v4734_v16 }
 0xa48   : > { %2916 = vmatpush1.bf16.msra.mxu1 %v4706_v15 }
 0xa49   : > { %2917 = vmatprep.subr.bf16.mxu1 %v4734_v16 }
 0xafc   : > { %v4230_v0 = vpop.f32.mrb[48].mxu1 }
 0xafd   : > { %v2593_v5 = vadd.f32 %v4230_v0, %v3977_v61  ;;  %v2584_v9 = vpop.f32.mrb[49].mxu1 }
 0xafe   : > { %v2585_v10 = vadd.f32 %v3977_v61, %v2584_v9  ;;  %v4231_v13 = vpop.f32.mrb[50].mxu1 }
 0xaff   : > { %v2617_v14 = vadd.f32 %v2593_v5, %v5432_v34  ;;  %v2596_v18 = vadd.f32 %v4231_v13, %v3977_v61  ;;  %v2587_v31 = vpop.f32.mrb[51].mxu1 }
 0xb00   : > { %v2615_v33 = vadd.f32 %v2585_v10, %v5434_v38  ;;  %v2588_v45 = vadd.f32 %v3977_v61, %v2587_v31 }
 0xb01   : > { %v5563_v40 = vmul.f32 %v2617_v14, %v5010_v17  ;;  %v2618_v44 = vadd.f32 %v2596_v18, %v5438_v43  ;;  %v4707_v43 = vld [vmem:[%s5963_s4 + $0x180] sm:$0xff]  }
 0xb02   : > { %v5567_v49 = vmul.f32 %v2615_v33, %v5007_v3  ;;  %v2616_v51 = vadd.f32 %v2588_v45, %v5442_v47  ;;  %2918 = vmatpush1.bf16.msra.mxu1 %v4707_v43  ;;  %v4708_v47 = vld [vmem:[%s5963_s4 + $0x188] sm:$0xff]  }
 0xb03   : > { %2633 = vst.msk [vmem:[#allocation2 + $0x18] sm:$0xff] %vm441_vm2, %v5563_v40  ;;  %v5573_v34 = vmul.f32 %v2618_v44, %v5017_v22  ;;  %2919 = vmatprep.subr.bf16.mxu1 %v4734_v16 }
 0xb04   : > { %2631 = vst.msk [vmem:[#allocation2 + $0x8] sm:$0xff] %vm441_vm2, %v5567_v49  ;;  %v5578_v38 = vmul.f32 %v2616_v51, %v5002_v1 }
 0xb05   : > { %2634 = vst.msk [vmem:[#allocation2 + $0x20] sm:$0xff] %vm441_vm2, %v5573_v34 }
 0xb06   : > { %2632 = vst.msk [vmem:[#allocation2 + $0x10] sm:$0xff] %vm441_vm2, %v5578_v38  ;;  %2920 = vmatpush1.bf16.msra.mxu1 %v4708_v47 }
 0xb0b   : > { %v2655_v50 = vld [vmem:[#allocation2 + $0x8] sm:$0xff] }
 0xb0c   : > { %v4234_v28 = vpop.f32.mrb[52].mxu1  ;;  %v2647_v57 = vld [vmem:[#allocation2 + $0x6] sm:$0xff]  ;;  %v2650_v8 = vld [vmem:[#allocation2 + $0x1e] sm:$0xff] }
 0xb0d   : > { %v2609_v35 = vadd.f32 %v4234_v28, %v3977_v61  ;;  %v2600_v37 = vpop.f32.mrb[53].mxu1  ;;  %v2656_v63 = vld [vmem:[#allocation2 + $0x10] sm:$0xff]  ;;  %v2665_v47 = vld [vmem:[#allocation2 + $0x1a] sm:$0xff] }
 0xb0e   : > { %v2648_v2 = vld [vmem:[#allocation2 + $0xe] sm:$0xff]  ;;  %v2601_v4 = vadd.f32 %v3977_v61, %v2600_v37  ;;  %v4235_v6 = vpop.f32.mrb[54].mxu1  ;;  %v4534_v20 = vpack.i.bf16 %v2656_v63, %v2655_v50  ;;  %v2649_v9 = vld [vmem:[#allocation2 + $0x16] sm:$0xff] }
 0xb0f   : > { %v5591_v41 = vld [vmem:[#allocation2 + $0xc] sm:$0xff]  ;;  %v4529_v7 = vpack.i.bf16 %v2648_v2, %v2647_v57  ;;  %v5593_v36 = vld [vmem:[#allocation2 + $0x14] sm:$0xff]  ;;  %v2621_v59 = vadd.f32 %v2609_v35, %v5451_v26  ;;  %v2612_v15 = vadd.f32 %v4235_v6, %v3977_v61  ;;  %v2603_v0 = vpop.f32.mrb[55].mxu1  ;;  %v4549_v44 = vpack.i.bf16 %v2650_v8, %v2649_v9 }
 0xb10   : > { %v2793_v5 = vpack.c.bf16 %v5593_v36, %v5591_v41  ;;  %v2663_v10 = vld [vmem:[#allocation2 + $0xa] sm:$0xff]  ;;  %v2664_v13 = vld [vmem:[#allocation2 + $0x12] sm:$0xff]  ;;  %v2619_v14 = vadd.f32 %v2601_v4, %v5454_v52  ;;  %v2604_v18 = vadd.f32 %v3977_v61, %v2603_v0  ;;  %4535 = vrot.lane.b32.xlu0 %v4534_v20, %s4737_s13  ;;  %v2658_v61 = vld [vmem:[#allocation2 + $0x20] sm:$0xff] }
 0xb11   : > { %4530 = vrot.lane.b32.xlu1 %v4529_v7, %s4736_s12  ;;  %v5602_v31 = vmul.f32 %v2621_v59, %v5056_v56  ;;  %v2622_v26 = vadd.f32 %v2612_v15, %v5458_v48  ;;  %v4539_v51 = vpack.i.bf16 %v2664_v13, %v2663_v10 }
 0xb12   : > { %4016 = vmatprep.mubr.msk.bf16.mxu1 %vm441_vm2, %v2793_v5  ;;  %v5607_v33 = vmul.f32 %v2619_v14, %v5041_v32  ;;  %v2620_v45 = vadd.f32 %v2604_v18, %v5462_v23  ;;  %v2657_v23 = vld [vmem:[#allocation2 + $0x18] sm:$0xff]  ;;  %v4709_v14 = vld [vmem:[%s5965_s6 + $0x40] sm:$0xff]  }
 0xb13   : > { %2637 = vst.msk [vmem:[#allocation2 + $0x38] sm:$0xff] %vm441_vm2, %v5602_v31  ;;  %v5613_v52 = vmul.f32 %v2622_v26, %v5066_v60  ;;  %v4544_v43 = vpack.i.bf16 %v2658_v61, %v2657_v23  ;;  %4236 = vmatprep.subr.bf16.mxu0 %v4709_v14 }
 0xb14   : > { %2635 = vst.msk [vmem:[#allocation2 + $0x28] sm:$0xff] %vm441_vm2, %v5607_v33  ;;  %v5618_v48 = vmul.f32 %v2620_v45, %v5046_v27  ;;  %4550 = vrot.lane.b32.xlu0 %v4549_v44, %s4736_s12  ;;  %4237 = vmatpush3.bf16.msra.mxu0 %v4709_v14 }
 0xb15   : > { %4540 = vrot.lane.b32.xlu1 %v4539_v51, %s4735_s30  ;;  %2638 = vst.msk [vmem:[#allocation2 + $0x40] sm:$0xff] %vm441_vm2, %v5613_v52 }
 0xb16   : > { %2636 = vst.msk [vmem:[#allocation2 + $0x30] sm:$0xff] %vm441_vm2, %v5618_v48 }
 0xb19   : > { %4545 = vrot.lane.b32.xlu1 %v4544_v43, %s4737_s13  ;;  %v2639_v43 = vld [vmem:[#allocation2 + $0x4] sm:$0xff] }
 0xb1a   : > { %v2661_v5 = vld [vmem:[#allocation2 + $0x38] sm:$0xff] }
 0xb1b   : > { %v2666_v28 = vld [vmem:[#allocation2 + $0x22] sm:$0xff] }
 0xb1c   : > { %v4554_v50 = vpack.i.bf16 %v2666_v28, %v2665_v47  ;;  %v2651_v57 = vld [vmem:[#allocation2 + $0x26] sm:$0xff]  ;;  %v2654_v8 = vld [vmem:[#allocation2 + $0x3e] sm:$0xff] }
 0xb1d   : > { %v2652_v35 = vld [vmem:[#allocation2 + $0x2e] sm:$0xff]  ;;  %v2653_v7 = vld [vmem:[#allocation2 + $0x36] sm:$0xff]  ;;  %v2662_v15 = vld [vmem:[#allocation2 + $0x40] sm:$0xff] }
 0xb1e   : > { %v2660_v37 = vld [vmem:[#allocation2 + $0x30] sm:$0xff]  ;;  %4555 = vrot.lane.b32.xlu0 %v4554_v50, %s4735_s30  ;;  %v4559_v63 = vpack.i.bf16 %v2652_v35, %v2651_v57  ;;  %v2659_v2 = vld [vmem:[#allocation2 + $0x28] sm:$0xff]  ;;  %v4579_v0 = vpack.i.bf16 %v2654_v8, %v2653_v7  ;;  %v2669_v9 = vld [vmem:[#allocation2 + $0x3a] sm:$0xff]  ;;  %v4574_v13 = vpack.i.bf16 %v2662_v15, %v2661_v5 }
 0xb1f   : > { %v2667_v4 = vld [vmem:[#allocation2 + $0x2a] sm:$0xff]  ;;  %v2668_v6 = vld [vmem:[#allocation2 + $0x32] sm:$0xff]  ;;  %v4564_v20 = vpack.i.bf16 %v2660_v37, %v2659_v2  ;;  %v2670_v10 = vld [vmem:[#allocation2 + $0x42] sm:$0xff] }
 0xb20   : > { %4560 = vrot.lane.b32.xlu1 %v4559_v63, %s4736_s12  ;;  %v4569_v59 = vpack.i.bf16 %v2668_v6, %v2667_v4  ;;  %v4584_v18 = vpack.i.bf16 %v2670_v10, %v2669_v9  ;;  %v2643_v2 = vld [vmem:[#allocation2 + $0x24] sm:$0xff] }
 0xb22   : > { %4565 = vrot.lane.b32.xlu0 %v4564_v20, %s4737_s13  ;;  %v2642_v20 = vld [vmem:[#allocation2 + $0x1c] sm:$0xff] }
 0xb23   : > { %v2795_v15 = vpack.c.bf16 %v2643_v2, %v2642_v20 }
 0xb24   : > { %4570 = vrot.lane.b32.xlu1 %v4569_v59, %s4735_s30 }
 0xb26   : > { %4580 = vrot.lane.b32.xlu0 %v4579_v0, %s4736_s12 }
 0xb28   : > { %4575 = vrot.lane.b32.xlu1 %v4574_v13, %s4737_s13 }
 0xb2a   : > { %4585 = vrot.lane.b32.xlu0 %v4584_v18, %s4735_s30 }
 0xb82   : > { %v4536_v26 = vpop.permute.xlu0 %4535 }
 0xb83   : > { %v4531_v45 = vpop.permute.xlu1 %4530  ;;  %v4538_v61 = vunpack.i.h.bf16 %v4536_v26  ;;  %v4537_v23 = vunpack.i.l.bf16 %v4536_v26 }
 0xb84   : > { %v4533_v44 = vunpack.i.h.bf16 %v4531_v45  ;;  %v4532_v51 = vunpack.i.l.bf16 %v4531_v45  ;;  %v2644_v45 = vld [vmem:[#allocation2 + $0x2c] sm:$0xff] }
 0xb86   : > { %v2768_v47 = vsel %vm441_vm2, %v2639_v43, %v4532_v51  ;;  %v2769_v28 = vsel %vm441_vm2, %v5591_v41, %v4533_v44  ;;  %v4551_v7 = vpop.permute.xlu0 %4550  ;;  %v2645_v44 = vld [vmem:[#allocation2 + $0x34] sm:$0xff] }
 0xb87   : > { %v4541_v50 = vpop.permute.xlu1 %4540  ;;  %v2776_v37 = vsel %vm686_vm3, %v2768_v47, %v4537_v23  ;;  %v2777_v63 = vsel %vm686_vm3, %v2769_v28, %v4538_v61  ;;  %v4553_v0 = vunpack.i.h.bf16 %v4551_v7  ;;  %v4552_v41 = vunpack.i.l.bf16 %v4551_v7 }
 0xb88   : > { %v4543_v57 = vunpack.i.h.bf16 %v4541_v50  ;;  %v4542_v35 = vunpack.i.l.bf16 %v4541_v50 }
 0xb89   : > { %v2771_v13 = vsel %vm441_vm2, %v2642_v20, %v4553_v0  ;;  %v2770_v14 = vsel %vm441_vm2, %v5593_v36, %v4552_v41 }
 0xb8a   : > { %v2784_v4 = vsel %vm695_vm4, %v2776_v37, %v4542_v35  ;;  %v2785_v6 = vsel %vm695_vm4, %v2777_v63, %v4543_v57  ;;  %v2797_v37 = vpack.c.bf16 %v2645_v44, %v2644_v45 }
 0xb8b   : > { %v2792_v8 = vpack.c.bf16 %v2785_v6, %v2784_v4  ;;  %v4546_v59 = vpop.permute.xlu1 %4545 }
 0xb8c   : > { %v4548_v5 = vunpack.i.h.bf16 %v4546_v59  ;;  %v4547_v9 = vunpack.i.l.bf16 %v4546_v59 }
 0xb8d   : > { %2934 = vmatmul.mubr.bf16.vlgmr.msra.gmra.mrb[56].mxu1 %v2792_v8 }
 0xb8e   : > { %4017 = vmatprep.mubr.msk.bf16.mxu1 %vm441_vm2, %v2795_v15  ;;  %v2779_v51 = vsel %vm686_vm3, %v2771_v13, %v4548_v5  ;;  %v2778_v61 = vsel %vm686_vm3, %v2770_v14, %v4547_v9  ;;  %v2671_v14 = vld [vmem:[#allocation2 + $0x44] sm:$0xff] }
 0xb90   : > { %v4556_v10 = vpop.permute.xlu0 %4555 }
 0xb91   : > { %v4558_v18 = vunpack.i.h.bf16 %v4556_v10  ;;  %v4557_v26 = vunpack.i.l.bf16 %v4556_v10 }
 0xb92   : > { %v4561_v23 = vpop.permute.xlu1 %4560 }
 0xb93   : > { %v4563_v43 = vunpack.i.h.bf16 %v4561_v23  ;;  %v4562_v47 = vunpack.i.l.bf16 %v4561_v23  ;;  %v2786_v28 = vsel %vm695_vm4, %v2778_v61, %v4557_v26  ;;  %v2787_v50 = vsel %vm695_vm4, %v2779_v51, %v4558_v18 }
 0xb94   : > { %v4566_v57 = vpop.permute.xlu0 %4565  ;;  %v2794_v35 = vpack.c.bf16 %v2787_v50, %v2786_v28 }
 0xb95   : > { %v2773_v36 = vsel %vm441_vm2, %v2644_v45, %v4563_v43  ;;  %v2772_v63 = vsel %vm441_vm2, %v2643_v2, %v4562_v47  ;;  %v4568_v4 = vunpack.i.h.bf16 %v4566_v57  ;;  %v4567_v6 = vunpack.i.l.bf16 %v4566_v57  ;;  %v2646_v2 = vld [vmem:[#allocation2 + $0x3c] sm:$0xff] }
 0xb96   : > { %v4571_v20 = vpop.permute.xlu1 %4570  ;;  %2942 = vmatmul.mubr.bf16.gmra.mrb[60].mxu1 %v2794_v35  ;;  %v2799_v28 = vpack.c.bf16 %v2671_v14, %v2646_v2 }
 0xb97   : > { %v2780_v7 = vsel %vm686_vm3, %v2772_v63, %v4567_v6  ;;  %v2781_v8 = vsel %vm686_vm3, %v2773_v36, %v4568_v4  ;;  %v4573_v59 = vunpack.i.h.bf16 %v4571_v20  ;;  %v4572_v15 = vunpack.i.l.bf16 %v4571_v20  ;;  %4018 = vmatprep.mubr.msk.bf16.mxu1 %vm441_vm2, %v2797_v37  ;;  %v4005_v63 = vld [vmem:[%s5964_s5 + $0x4] ss:$0 sm:$0xff] }
 0xb98   : > { %v4581_v0 = vpop.permute.xlu0 %4580 }
 0xb99   : > { %v4583_v41 = vunpack.i.h.bf16 %v4581_v0  ;;  %v4582_v5 = vunpack.i.l.bf16 %v4581_v0  ;;  %v2788_v9 = vsel %vm695_vm4, %v2780_v7, %v4572_v15  ;;  %v2789_v10 = vsel %vm695_vm4, %v2781_v8, %v4573_v59 }
 0xb9a   : > { %v4576_v13 = vpop.permute.xlu1 %4575  ;;  %v2796_v23 = vpack.c.bf16 %v2789_v10, %v2788_v9 }
 0xb9b   : > { %v2775_v18 = vsel %vm441_vm2, %v2646_v2, %v4583_v41  ;;  %v2774_v26 = vsel %vm441_vm2, %v2645_v44, %v4582_v5  ;;  %v4578_v45 = vunpack.i.h.bf16 %v4576_v13  ;;  %v4577_v51 = vunpack.i.l.bf16 %v4576_v13  ;;  %v4710_v44 = vld [vmem:[%s5965_s6 + $0x48] sm:$0xff]  }
 0xb9c   : > { %v4586_v61 = vpop.permute.xlu0 %4585  ;;  %4238 = vmatprep.subr.bf16.mxu0 %v4710_v44 }
 0xb9d   : > { %v4588_v43 = vunpack.i.h.bf16 %v4586_v61  ;;  %v4587_v47 = vunpack.i.l.bf16 %v4586_v61  ;;  %v2783_v50 = vsel %vm686_vm3, %v2775_v18, %v4578_v45  ;;  %v2782_v57 = vsel %vm686_vm3, %v2774_v26, %v4577_v51  ;;  %4239 = vmatpush3.bf16.msra.mxu0 %v4710_v44 }
 0xb9e   : > { %2950 = vmatmul.mubr.bf16.gmra.mrb[64].mxu1 %v2796_v23  ;;  %3345 = vmatprep.subr.bf16.mxu0 %v4734_v16 }
 0xb9f   : > { %4019 = vmatprep.mubr.msk.bf16.mxu1 %vm441_vm2, %v2799_v28  ;;  %v2790_v35 = vsel %vm695_vm4, %v2782_v57, %v4587_v47  ;;  %v2791_v37 = vsel %vm695_vm4, %v2783_v50, %v4588_v43 }
 0xba0   : > { %v2798_v36 = vpack.c.bf16 %v2791_v37, %v2790_v35 }
 0xba6   : > { %2958 = vmatmul.mubr.bf16.gmra.mrb[68].mxu1 %v2798_v36 }
 0xc60   : > { %v2935_v4 = vpop.f32.mrb[56].mxu1 }
 0xc61   : > { %v2936_v6 = vadd.f32 %v4005_v63, %v2935_v4  ;;  %v2937_v20 = vpop.f32.mrb[57].mxu1 }
 0xc62   : > { %v2938_v7 = vpop.f32.mrb[58].mxu1 }
 0xc63   : > { %v2939_v8 = vadd.f32 %v4005_v63, %v2938_v7  ;;  %v2940_v59 = vpop.f32.mrb[59].mxu1  ;;  %v2966_v15 = vmax.f32 %v2936_v6, 0.0 }
 0xc65   : > { %v2967_v0 = vmax.f32 %v2939_v8, 0.0 }
 0xc67   : > { %v2974_v41 = vpack.c.bf16 %v2967_v0, %v2966_v15  ;;  %v4711_v15 = vld [vmem:[%s5963_s4 + $0x190] sm:$0xff]   ;;  %v4712_v0 = vld [vmem:[%s5963_s4 + $0x198] sm:$0xff]  }
 0xc69   : > { %4240 = vmatprep.mubr.msk.bf16.mxu0 %vm441_vm2, %v2974_v41  ;;  %v2943_v5 = vpop.f32.mrb[60].mxu1  ;;  %v4714_v41 = vld [vmem:[%s5963_s4 + $0x1a8] sm:$0xff]  }
 0xc6a   : > { %v2944_v9 = vadd.f32 %v4005_v63, %v2943_v5  ;;  %v2945_v10 = vpop.f32.mrb[61].mxu1  ;;  %v4715_v5 = vld [vmem:[%s5963_s4 + $0x1b0] sm:$0xff]  }
 0xc6b   : > { %v2946_v2 = vpop.f32.mrb[62].mxu1  ;;  %v4717_v10 = vld [vmem:[%s5963_s4 + $0x1c0] sm:$0xff]  }
 0xc6c   : > { %v2947_v13 = vadd.f32 %v4005_v63, %v2946_v2  ;;  %v2948_v14 = vpop.f32.mrb[63].mxu1  ;;  %v2968_v18 = vmax.f32 %v2944_v9, 0.0  ;;  %v4716_v9 = vld [vmem:[%s5963_s4 + $0x1b8] sm:$0xff]   ;;  %v4718_v2 = vld [vmem:[%s5963_s4 + $0x1c8] sm:$0xff]  }
 0xc6e   : > { %v2969_v26 = vmax.f32 %v2947_v13, 0.0  ;;  %v4025_v13 = vld [vmem:[%s5966_s7 + $0x4] ss:$0 sm:$0xff] }
 0xc70   : > { %v2975_v45 = vpack.c.bf16 %v2969_v26, %v2968_v18 }
 0xc71   : > { %v2951_v51 = vpop.f32.mrb[64].mxu1 }
 0xc72   : > { %v2952_v61 = vadd.f32 %v4005_v63, %v2951_v51  ;;  %v2953_v23 = vpop.f32.mrb[65].mxu1  ;;  %4241 = vmatmul.mubr.msk.bf16.vlgmr.msra.gmra.mrb[64].mxu0 %vm441_vm2, %v2975_v45 }
 0xc73   : > { %v2954_v43 = vpop.f32.mrb[66].mxu1  ;;  %3346 = vmatpush1.bf16.msra.mxu0 %v4711_v15 }
 0xc74   : > { %v2955_v47 = vadd.f32 %v4005_v63, %v2954_v43  ;;  %v2956_v28 = vpop.f32.mrb[67].mxu1  ;;  %v2970_v50 = vmax.f32 %v2952_v61, 0.0  ;;  %3347 = vmatprep.subr.bf16.mxu0 %v4734_v16 }
 0xc76   : > { %v2971_v57 = vmax.f32 %v2955_v47, 0.0 }
 0xc77   : > { %3348 = vmatpush1.bf16.msra.mxu0 %v4712_v0 }
 0xc78   : > { %v2976_v35 = vpack.c.bf16 %v2971_v57, %v2970_v50  ;;  %3349 = vmatprep.subr.bf16.mxu0 %v4734_v16 }
 0xc79   : > { %v2959_v37 = vpop.f32.mrb[68].mxu1 }
 0xc7a   : > { %v2960_v36 = vadd.f32 %v4005_v63, %v2959_v37  ;;  %v2961_v44 = vpop.f32.mrb[69].mxu1  ;;  %4244 = vmatprep.mubr.msk.bf16.mxu0 %vm441_vm2, %v2976_v35 }
 0xc7b   : > { %v2962_v4 = vpop.f32.mrb[70].mxu1 }
 0xc7c   : > { %v2963_v6 = vadd.f32 %v4005_v63, %v2962_v4  ;;  %v2964_v20 = vpop.f32.mrb[71].mxu1  ;;  %v2972_v7 = vmax.f32 %v2960_v36, 0.0  ;;  %v4713_v63 = vld [vmem:[%s5963_s4 + $0x1a0] sm:$0xff]  }
 0xc7d   : > { %3350 = vmatpush1.bf16.msra.mxu0 %v4713_v63 }
 0xc7e   : > { %v2973_v8 = vmax.f32 %v2963_v6, 0.0  ;;  %3351 = vmatprep.subr.bf16.mxu0 %v4734_v16 }
 0xc80   : > { %v2977_v59 = vpack.c.bf16 %v2973_v8, %v2972_v7 }
 0xc81   : > { %3352 = vmatpush1.bf16.msra.mxu0 %v4714_v41 }
 0xc82   : > { %4245 = vmatmul.mubr.msk.bf16.gmra.mrb[68].mxu0 %vm441_vm2, %v2977_v59  ;;  %3353 = vmatprep.subr.bf16.mxu0 %v4734_v16 }
 0xc85   : > { %3354 = vmatpush1.bf16.msra.mxu0 %v4715_v5 }
 0xc86   : > { %3355 = vmatprep.subr.bf16.mxu0 %v4734_v16 }
 0xc89   : > { %3356 = vmatpush1.bf16.msra.mxu0 %v4716_v9 }
 0xc8a   : > { %3357 = vmatprep.subr.bf16.mxu0 %v4734_v16 }
 0xc8d   : > { %3358 = vmatpush1.bf16.msra.mxu0 %v4717_v10 }
 0xc8e   : > { %3359 = vmatprep.subr.bf16.mxu0 %v4734_v16 }
 0xc91   : > { %3360 = vmatpush1.bf16.msra.mxu0 %v4718_v2 }
 0xc92   : > { %3361 = vmatprep.subr.bf16.mxu0 %v4734_v16 }
 0xd45   : > { %v4242_v14 = vpop.f32.mrb[64].mxu0 }
 0xd46   : > { %v3058_v18 = vadd.f32 %v4242_v14, %v4025_v13  ;;  %v3049_v26 = vpop.f32.mrb[65].mxu0 }
 0xd47   : > { %v3050_v45 = vadd.f32 %v4025_v13, %v3049_v26  ;;  %v4243_v51 = vpop.f32.mrb[66].mxu0 }
 0xd48   : > { %v3082_v61 = vadd.f32 %v3058_v18, %v5563_v40  ;;  %v3061_v23 = vadd.f32 %v4243_v51, %v4025_v13  ;;  %v3052_v43 = vpop.f32.mrb[67].mxu0 }
 0xd49   : > { %v3080_v47 = vadd.f32 %v3050_v45, %v5567_v49  ;;  %v3053_v28 = vadd.f32 %v4025_v13, %v3052_v43 }
 0xd4a   : > { %v5715_v50 = vmul.f32 %v3082_v61, %v5010_v17  ;;  %v3083_v57 = vadd.f32 %v3061_v23, %v5573_v34  ;;  %v4719_v34 = vld [vmem:[%s5963_s4 + $0x1d0] sm:$0xff]  }
 0xd4b   : > { %v5719_v35 = vmul.f32 %v3080_v47, %v5007_v3  ;;  %v3081_v37 = vadd.f32 %v3053_v28, %v5578_v38  ;;  %3362 = vmatpush1.bf16.msra.mxu0 %v4719_v34  ;;  %v4720_v38 = vld [vmem:[%s5963_s4 + $0x1d8] sm:$0xff]  }
 0xd4c   : > { %3098 = vst.msk [vmem:[#allocation2 + $0x18] sm:$0xff] %vm441_vm2, %v5715_v50  ;;  %v5725_v40 = vmul.f32 %v3083_v57, %v5017_v22  ;;  %3363 = vmatprep.subr.bf16.mxu0 %v4734_v16 }
 0xd4d   : > { %3096 = vst.msk [vmem:[#allocation2 + $0x8] sm:$0xff] %vm441_vm2, %v5719_v35  ;;  %v5730_v49 = vmul.f32 %v3081_v37, %v5002_v1 }
 0xd4e   : > { %3099 = vst.msk [vmem:[#allocation2 + $0x20] sm:$0xff] %vm441_vm2, %v5725_v40 }
 0xd4f   : > { %3097 = vst.msk [vmem:[#allocation2 + $0x10] sm:$0xff] %vm441_vm2, %v5730_v49  ;;  %3364 = vmatpush1.bf16.msra.mxu0 %v4720_v38 }
 0xd53   : > { %v5743_v44 = vld [vmem:[#allocation2 + $0x18] sm:$0xff] }
 0xd54   : > { %v3112_v4 = vld [vmem:[#allocation2 + $0x4] sm:$0xff] }
 0xd55   : > { %v4246_v36 = vpop.f32.mrb[68].mxu0  ;;  %v5747_v59 = vld [vmem:[#allocation2 + $0x8] sm:$0xff]  ;;  %v3115_v26 = vld [vmem:[#allocation2 + $0x1c] sm:$0xff] }
 0xd56   : > { %v3074_v6 = vadd.f32 %v4246_v36, %v4025_v13  ;;  %v3065_v20 = vpop.f32.mrb[69].mxu0  ;;  %v5745_v7 = vld [vmem:[#allocation2 + $0x10] sm:$0xff]  ;;  %v5771_v43 = vld [vmem:[#allocation2 + $0x20] sm:$0xff] }
 0xd57   : > { %v3113_v8 = vld [vmem:[#allocation2 + $0xc] sm:$0xff]  ;;  %v3066_v15 = vadd.f32 %v4025_v13, %v3065_v20  ;;  %v4247_v0 = vpop.f32.mrb[70].mxu0  ;;  %v3237_v16 = vpack.c.bf16 %v5743_v44, %v5745_v7  ;;  %v4594_v41 = vpack.i.bf16 %v5745_v7, %v5747_v59  ;;  %v3114_v2 = vld [vmem:[#allocation2 + $0x14] sm:$0xff] }
 0xd58   : > { %v4589_v63 = vpack.i.bf16 %v3113_v8, %v3112_v4  ;;  %v3086_v5 = vadd.f32 %v3074_v6, %v5602_v31  ;;  %v3077_v9 = vadd.f32 %v4247_v0, %v4025_v13  ;;  %v3068_v10 = vpop.f32.mrb[71].mxu0  ;;  %v4599_v23 = vpack.i.bf16 %v3114_v2, %v3113_v8 }
 0xd59   : > { %v3084_v14 = vadd.f32 %v3066_v15, %v5607_v33  ;;  %v3069_v18 = vadd.f32 %v4025_v13, %v3068_v10  ;;  %4064 = vmatprep.mubr.msk.bf16.mxu0 %vm441_vm2, %v3237_v16  ;;  %4595 = vrot.lane.b32.xlu0 %v4594_v41, %s4737_s13  ;;  %v4609_v13 = vpack.i.bf16 %v3115_v26, %v3114_v2  ;;  %v4721_v41 = vld [vmem:[%s5965_s6 + $0x50] sm:$0xff]  }
 0xd5a   : > { %4590 = vrot.lane.b32.xlu1 %v4589_v63, %s4736_s12  ;;  %v5758_v45 = vmul.f32 %v3086_v5, %v5056_v56  ;;  %v3087_v51 = vadd.f32 %v3077_v9, %v5613_v52  ;;  %4248 = vmatprep.subr.bf16.mxu1 %v4721_v41  ;;  %v3104_v9 = vld [vmem:[#allocation2] sm:$0xff] }
 0xd5b   : > { %v5763_v31 = vmul.f32 %v3084_v14, %v5041_v32  ;;  %v3085_v61 = vadd.f32 %v3069_v18, %v5618_v48  ;;  %v4604_v48 = vpack.i.bf16 %v5771_v43, %v5743_v44  ;;  %4249 = vmatpush3.bf16.msra.mxu1 %v4721_v41 }
 0xd5c   : > { %3102 = vst.msk [vmem:[#allocation2 + $0x38] sm:$0xff] %vm441_vm2, %v5758_v45  ;;  %v5769_v33 = vmul.f32 %v3087_v51, %v5066_v60 }
 0xd5d   : > { %3100 = vst.msk [vmem:[#allocation2 + $0x28] sm:$0xff] %vm441_vm2, %v5763_v31  ;;  %v5776_v52 = vmul.f32 %v3085_v61, %v5046_v27  ;;  %4610 = vrot.lane.b32.xlu0 %v4609_v13, %s4736_s12 }
 0xd5e   : > { %4600 = vrot.lane.b32.xlu1 %v4599_v23, %s4735_s30  ;;  %3103 = vst.msk [vmem:[#allocation2 + $0x40] sm:$0xff] %vm441_vm2, %v5769_v33 }
 0xd5f   : > { %3101 = vst.msk [vmem:[#allocation2 + $0x30] sm:$0xff] %vm441_vm2, %v5776_v52 }
 0xd62   : > { %4605 = vrot.lane.b32.xlu1 %v4604_v48, %s4737_s13 }
 0xd63   : > { %v5796_v0 = vld [vmem:[#allocation2 + $0x38] sm:$0xff] }
 0xd64   : > { %v3116_v47 = vld [vmem:[#allocation2 + $0x24] sm:$0xff] }
 0xd65   : > { %v4614_v28 = vpack.i.bf16 %v3116_v47, %v3115_v26  ;;  %v3109_v38 = vld [vmem:[#allocation2 + $0x28] sm:$0xff]  ;;  %v3119_v6 = vld [vmem:[#allocation2 + $0x3c] sm:$0xff] }
 0xd66   : > { %v3117_v57 = vld [vmem:[#allocation2 + $0x2c] sm:$0xff]  ;;  %v3118_v36 = vld [vmem:[#allocation2 + $0x34] sm:$0xff]  ;;  %v5793_v8 = vld [vmem:[#allocation2 + $0x40] sm:$0xff] }
 0xd67   : > { %v5787_v37 = vld [vmem:[#allocation2 + $0x30] sm:$0xff]  ;;  %4615 = vrot.lane.b32.xlu0 %v4614_v28, %s4735_s30  ;;  %v4619_v34 = vpack.i.bf16 %v3117_v57, %v3116_v47  ;;  %v4629_v20 = vpack.i.bf16 %v3118_v36, %v3117_v57  ;;  %v4634_v15 = vpack.i.bf16 %v3119_v6, %v3118_v36  ;;  %v3121_v16 = vld [vmem:[#allocation2 + $0x44] sm:$0xff]  ;;  %v4639_v63 = vpack.i.bf16 %v5793_v8, %v5796_v0 }
 0xd68   : > { %v4624_v4 = vpack.i.bf16 %v5787_v37, %v3109_v38  ;;  %v4644_v5 = vpack.i.bf16 %v3121_v16, %v3119_v6 }
 0xd69   : > { %4620 = vrot.lane.b32.xlu1 %v4619_v34, %s4736_s12 }
 0xd6b   : > { %4625 = vrot.lane.b32.xlu0 %v4624_v4, %s4737_s13 }
 0xd6d   : > { %4630 = vrot.lane.b32.xlu1 %v4629_v20, %s4735_s30 }
 0xd6f   : > { %4635 = vrot.lane.b32.xlu0 %v4634_v15, %s4736_s12  ;;  %v3239_v15 = vpack.c.bf16 %v3109_v38, %v5771_v43 }
 0xd71   : > { %4640 = vrot.lane.b32.xlu1 %v4639_v63, %s4737_s13  ;;  %s5929_s13 = scalar_lea.vmem %s5970_s11, %s4811_s21 }
 0xd73   : > { %4645 = vrot.lane.b32.xlu0 %v4644_v5, %s4735_s30 }
 0xdcb   : > { %v4596_v18 = vpop.permute.xlu0 %4595 }
 0xdcc   : > { %v4591_v10 = vpop.permute.xlu1 %4590  ;;  %v4598_v26 = vunpack.i.h.bf16 %v4596_v18  ;;  %v4597_v51 = vunpack.i.l.bf16 %v4596_v18 }
 0xdcd   : > { %v4593_v2 = vunpack.i.h.bf16 %v4591_v10  ;;  %v4592_v14 = vunpack.i.l.bf16 %v4591_v10 }
 0xdcf   : > { %v3212_v61 = vsel %vm441_vm2, %v3104_v9, %v4592_v14  ;;  %v3213_v23 = vsel %vm441_vm2, %v5747_v59, %v4593_v2  ;;  %v4611_v6 = vpop.permute.xlu0 %4610 }
 0xdd0   : > { %v4601_v13 = vpop.permute.xlu1 %4600  ;;  %v3220_v28 = vsel %vm686_vm3, %v3212_v61, %v4597_v51  ;;  %v3221_v57 = vsel %vm686_vm3, %v3213_v23, %v4598_v26  ;;  %v4613_v16 = vunpack.i.h.bf16 %v4611_v6  ;;  %v4612_v63 = vunpack.i.l.bf16 %v4611_v6 }
 0xdd1   : > { %v4603_v48 = vunpack.i.h.bf16 %v4601_v13  ;;  %v4602_v47 = vunpack.i.l.bf16 %v4601_v13 }
 0xdd2   : > { %v3215_v9 = vsel %vm441_vm2, %v5743_v44, %v4613_v16  ;;  %v3214_v10 = vsel %vm441_vm2, %v5745_v7, %v4612_v63  ;;  %v3241_v44 = vpack.c.bf16 %v5796_v0, %v5787_v37 }
 0xdd3   : > { %v3228_v34 = vsel %vm695_vm4, %v3220_v28, %v4602_v47  ;;  %v3229_v36 = vsel %vm695_vm4, %v3221_v57, %v4603_v48 }
 0xdd4   : > { %v3236_v4 = vpack.c.bf16 %v3229_v36, %v3228_v34  ;;  %v4606_v20 = vpop.permute.xlu1 %4605 }
 0xdd5   : > { %v4608_v59 = vunpack.i.h.bf16 %v4606_v20  ;;  %v4607_v41 = vunpack.i.l.bf16 %v4606_v20 }
 0xdd6   : > { %3378 = vmatmul.mubr.bf16.vlgmr.msra.gmra.mrb[72].mxu0 %v3236_v4 }
 0xdd7   : > { %4065 = vmatprep.mubr.msk.bf16.mxu0 %vm441_vm2, %v3239_v15  ;;  %v3222_v18 = vsel %vm686_vm3, %v3214_v10, %v4607_v41  ;;  %v3223_v26 = vsel %vm686_vm3, %v3215_v9, %v4608_v59 }
 0xdd9   : > { %v4616_v5 = vpop.permute.xlu0 %4615 }
 0xdda   : > { %v4618_v2 = vunpack.i.h.bf16 %v4616_v5  ;;  %v4617_v14 = vunpack.i.l.bf16 %v4616_v5 }
 0xddb   : > { %v4621_v51 = vpop.permute.xlu1 %4620 }
 0xddc   : > { %v4623_v61 = vunpack.i.h.bf16 %v4621_v51  ;;  %v4622_v23 = vunpack.i.l.bf16 %v4621_v51  ;;  %v3230_v13 = vsel %vm695_vm4, %v3222_v18, %v4617_v14  ;;  %v3231_v48 = vsel %vm695_vm4, %v3223_v26, %v4618_v2 }
 0xddd   : > { %v4626_v47 = vpop.permute.xlu0 %4625  ;;  %v3238_v28 = vpack.c.bf16 %v3231_v48, %v3230_v13 }
 0xdde   : > { %v3217_v7 = vsel %vm441_vm2, %v3109_v38, %v4623_v61  ;;  %v3216_v57 = vsel %vm441_vm2, %v5771_v43, %v4622_v23  ;;  %v4628_v34 = vunpack.i.h.bf16 %v4626_v47  ;;  %v4627_v36 = vunpack.i.l.bf16 %v4626_v47  ;;  %v3122_v43 = vld [vmem:[#allocation2 + $0x48] sm:$0xff] }
 0xddf   : > { %v4631_v4 = vpop.permute.xlu1 %4630  ;;  %3386 = vmatmul.mubr.bf16.gmra.mrb[76].mxu0 %v3238_v28  ;;  %v3243_v61 = vpack.c.bf16 %v3122_v43, %v5793_v8  ;;  %v4053_v8 = vld [vmem:[%s5964_s5 + $0x5] ss:$0 sm:$0xff] }
 0xde0   : > { %v3225_v6 = vsel %vm686_vm3, %v3217_v7, %v4628_v34  ;;  %v3224_v20 = vsel %vm686_vm3, %v3216_v57, %v4627_v36  ;;  %v4633_v15 = vunpack.i.h.bf16 %v4631_v4  ;;  %v4632_v16 = vunpack.i.l.bf16 %v4631_v4  ;;  %4066 = vmatprep.mubr.msk.bf16.mxu0 %vm441_vm2, %v3241_v44  ;;  %v4722_v44 = vld [vmem:[%s5965_s6 + $0x58] sm:$0xff]  }
 0xde1   : > { %v4636_v63 = vpop.permute.xlu0 %4635  ;;  %4250 = vmatprep.subr.bf16.mxu1 %v4722_v44 }
 0xde2   : > { %v4638_v59 = vunpack.i.h.bf16 %v4636_v63  ;;  %v4637_v41 = vunpack.i.l.bf16 %v4636_v63  ;;  %v3232_v38 = vsel %vm695_vm4, %v3224_v20, %v4632_v16  ;;  %v3233_v5 = vsel %vm695_vm4, %v3225_v6, %v4633_v15  ;;  %4251 = vmatpush3.bf16.msra.mxu1 %v4722_v44 }
 0xde3   : > { %v4641_v9 = vpop.permute.xlu1 %4640  ;;  %v3240_v51 = vpack.c.bf16 %v3233_v5, %v3232_v38 }
 0xde4   : > { %v3219_v10 = vsel %vm441_vm2, %v5796_v0, %v4638_v59  ;;  %v3218_v2 = vsel %vm441_vm2, %v5787_v37, %v4637_v41  ;;  %v4643_v14 = vunpack.i.h.bf16 %v4641_v9  ;;  %v4642_v18 = vunpack.i.l.bf16 %v4641_v9 }
 0xde5   : > { %v4646_v26 = vpop.permute.xlu0 %4645 }
 0xde6   : > { %v4648_v23 = vunpack.i.h.bf16 %v4646_v26  ;;  %v4647_v13 = vunpack.i.l.bf16 %v4646_v26  ;;  %v3226_v48 = vsel %vm686_vm3, %v3218_v2, %v4642_v18  ;;  %v3227_v47 = vsel %vm686_vm3, %v3219_v10, %v4643_v14 }
 0xde7   : > { %3394 = vmatmul.mubr.bf16.gmra.mrb[80].mxu0 %v3240_v51 }
 0xde8   : > { %4067 = vmatprep.mubr.msk.bf16.mxu0 %vm441_vm2, %v3243_v61  ;;  %v3234_v0 = vsel %vm695_vm4, %v3226_v48, %v4647_v13  ;;  %v3235_v28 = vsel %vm695_vm4, %v3227_v47, %v4648_v23 }
 0xde9   : > { %v3242_v37 = vpack.c.bf16 %v3235_v28, %v3234_v0 }
 0xdef   : > { %3402 = vmatmul.mubr.bf16.gmra.mrb[84].mxu0 %v3242_v37 }
 0xea9   : > { %v3379_v7 = vpop.f32.mrb[72].mxu0 }
 0xeaa   : > { %v3380_v57 = vadd.f32 %v4053_v8, %v3379_v7  ;;  %v3381_v34 = vpop.f32.mrb[73].mxu0 }
 0xeab   : > { %v3382_v36 = vpop.f32.mrb[74].mxu0 }
 0xeac   : > { %v3383_v4 = vadd.f32 %v4053_v8, %v3382_v36  ;;  %v3384_v6 = vpop.f32.mrb[75].mxu0  ;;  %v3410_v20 = vmax.f32 %v3380_v57, 0.0 }
 0xead   : > { %v4723_v6 = vld [vmem:[%s5967_s8 + $0x10] sm:$0xff]  }
 0xeae   : > { %v3411_v15 = vmax.f32 %v3383_v4, 0.0  ;;  %4260 = vmatprep.subr.bf16.mxu1 %v4723_v6 }
 0xeb0   : > { %v3418_v16 = vpack.c.bf16 %v3411_v15, %v3410_v20  ;;  %v4724_v20 = vld [vmem:[%s5967_s8 + $0x18] sm:$0xff]  }
 0xeb2   : > { %4252 = vmatprep.mubr.msk.bf16.mxu1 %vm441_vm2, %v3418_v16  ;;  %v3387_v63 = vpop.f32.mrb[76].mxu0 }
 0xeb3   : > { %v3388_v59 = vadd.f32 %v4053_v8, %v3387_v63  ;;  %v3389_v41 = vpop.f32.mrb[77].mxu0 }
 0xeb4   : > { %v3390_v38 = vpop.f32.mrb[78].mxu0 }
 0xeb5   : > { %v3391_v5 = vadd.f32 %v4053_v8, %v3390_v38  ;;  %v3392_v43 = vpop.f32.mrb[79].mxu0  ;;  %v3412_v9 = vmax.f32 %v3388_v59, 0.0 }
 0xeb7   : > { %v3413_v10 = vmax.f32 %v3391_v5, 0.0 }
 0xeb9   : > { %v3419_v2 = vpack.c.bf16 %v3413_v10, %v3412_v9 }
 0xeba   : > { %v3395_v14 = vpop.f32.mrb[80].mxu0 }
 0xebb   : > { %v3396_v18 = vadd.f32 %v4053_v8, %v3395_v14  ;;  %v3397_v26 = vpop.f32.mrb[81].mxu0  ;;  %4253 = vmatmul.mubr.msk.bf16.vlgmr.msra.gmra.mrb[72].mxu1 %vm441_vm2, %v3419_v2 }
 0xebc   : > { %v3398_v51 = vpop.f32.mrb[82].mxu0  ;;  %4261 = vmatpush3.bf16.msra.mxu1 %v4723_v6 }
 0xebd   : > { %v3399_v61 = vadd.f32 %v4053_v8, %v3398_v51  ;;  %v3400_v23 = vpop.f32.mrb[83].mxu0  ;;  %v3414_v13 = vmax.f32 %v3396_v18, 0.0  ;;  %4262 = vmatprep.subr.bf16.mxu1 %v4724_v20 }
 0xebf   : > { %v3415_v48 = vmax.f32 %v3399_v61, 0.0 }
 0xec0   : > { %4263 = vmatpush3.bf16.msra.mxu1 %v4724_v20 }
 0xec1   : > { %v3420_v47 = vpack.c.bf16 %v3415_v48, %v3414_v13 }
 0xec2   : > { %v3403_v0 = vpop.f32.mrb[84].mxu0 }
 0xec3   : > { %v3404_v28 = vadd.f32 %v4053_v8, %v3403_v0  ;;  %v3405_v37 = vpop.f32.mrb[85].mxu0  ;;  %4256 = vmatprep.mubr.msk.bf16.mxu1 %vm441_vm2, %v3420_v47 }
 0xec4   : > { %v3406_v44 = vpop.f32.mrb[86].mxu0 }
 0xec5   : > { %v3407_v7 = vadd.f32 %v4053_v8, %v3406_v44  ;;  %v3408_v57 = vpop.f32.mrb[87].mxu0  ;;  %v3416_v34 = vmax.f32 %v3404_v28, 0.0  ;;  %v4073_v8 = vld [vmem:[%s5966_s7 + $0x5] ss:$0 sm:$0xff] }
 0xec7   : > { %v3417_v36 = vmax.f32 %v3407_v7, 0.0 }
 0xec9   : > { %v3421_v4 = vpack.c.bf16 %v3417_v36, %v3416_v34 }
 0xecb   : > { %4257 = vmatmul.mubr.msk.bf16.gmra.mrb[76].mxu1 %vm441_vm2, %v3421_v4 }
 0xf8e   : > { %v4254_v15 = vpop.f32.mrb[72].mxu1 }
 0xf8f   : > { %v3502_v16 = vadd.f32 %v4254_v15, %v4073_v8  ;;  %v3493_v63 = vpop.f32.mrb[73].mxu1 }
 0xf90   : > { %v3494_v59 = vadd.f32 %v4073_v8, %v3493_v63  ;;  %v4255_v41 = vpop.f32.mrb[74].mxu1 }
 0xf91   : > { %v3526_v38 = vadd.f32 %v3502_v16, %v5715_v50  ;;  %v3505_v5 = vadd.f32 %v4255_v41, %v4073_v8  ;;  %v3496_v43 = vpop.f32.mrb[75].mxu1 }
 0xf92   : > { %v3524_v9 = vadd.f32 %v3494_v59, %v5719_v35  ;;  %v3497_v10 = vadd.f32 %v4073_v8, %v3496_v43 }
 0xf93   : > { %v3534_v2 = vmul.f32 %v3526_v38, %v5010_v17  ;;  %v3527_v14 = vadd.f32 %v3505_v5, %v5725_v40 }
 0xf94   : > { %v3532_v50 = vmul.f32 %v3524_v9, %v5007_v3  ;;  %v3525_v18 = vadd.f32 %v3497_v10, %v5730_v49 }
 0xf95   : > { %v3656_v35 = vadd.f32 %v3534_v2, %v5342_v55  ;;  %v3535_v26 = vmul.f32 %v3527_v14, %v5017_v22 }
 0xf96   : > { %v3654_v51 = vadd.f32 %v3532_v50, %v5336_v58  ;;  %v3533_v40 = vmul.f32 %v3525_v18, %v5002_v1 }
 0xf97   : > { %3672 = vst.msk [vmem:[%s5870_s24 + $0x10] sm:$0xff] %vm441_vm2, %v3656_v35  ;;  %v3541_v61 = vpack.c.bf16 %v3535_v26, %v3534_v2  ;;  %v3657_v23 = vadd.f32 %v3535_v26, %v5333_v53 }
 0xf98   : > { %3670 = vst.msk [vmem:[%s5870_s24] sm:$0xff] %vm441_vm2, %v3654_v51  ;;  %v3540_v13 = vpack.c.bf16 %v3533_v40, %v3532_v50  ;;  %v3655_v48 = vadd.f32 %v3533_v40, %v5339_v54 }
 0xf99   : > { %3673 = vst.msk [vmem:[%s5870_s24 + $0x18] sm:$0xff] %vm441_vm2, %v3657_v23 }
 0xf9a   : > { %3671 = vst.msk [vmem:[%s5870_s24 + $0x8] sm:$0xff] %vm441_vm2, %v3655_v48  ;;  %4264 = vmatprep.mubr.msk.bf16.mxu1 %vm441_vm2, %v3540_v13 }
 0xf9b   : > { %4265 = vmatmul.mubr.msk.bf16.vlgmr.msra.gmra.mrb[80].mxu1 %vm441_vm2, %v3541_v61 }
 0xf9e   : > { %v4258_v58 = vpop.f32.mrb[76].mxu1 }
 0xf9f   : > { %v3518_v55 = vadd.f32 %v4258_v58, %v4073_v8  ;;  %v3509_v49 = vpop.f32.mrb[77].mxu1 }
 0xfa0   : > { %v3510_v47 = vadd.f32 %v4073_v8, %v3509_v49  ;;  %v4259_v0 = vpop.f32.mrb[78].mxu1 }
 0xfa1   : > { %v3530_v53 = vadd.f32 %v3518_v55, %v5758_v45  ;;  %v3521_v28 = vadd.f32 %v4259_v0, %v4073_v8  ;;  %v3512_v37 = vpop.f32.mrb[79].mxu1 }
 0xfa2   : > { %v3528_v54 = vadd.f32 %v3510_v47, %v5763_v31  ;;  %v3513_v44 = vadd.f32 %v4073_v8, %v3512_v37 }
 0xfa3   : > { %v3538_v7 = vmul.f32 %v3530_v53, %v5056_v56  ;;  %v3531_v57 = vadd.f32 %v3521_v28, %v5769_v33 }
 0xfa4   : > { %v3536_v34 = vmul.f32 %v3528_v54, %v5041_v32  ;;  %v3529_v36 = vadd.f32 %v3513_v44, %v5776_v52 }
 0xfa5   : > { %v3660_v4 = vadd.f32 %v3538_v7, %v5365_v12  ;;  %v3539_v45 = vmul.f32 %v3531_v57, %v5066_v60 }
 0xfa6   : > { %v3658_v6 = vadd.f32 %v3536_v34, %v5359_v11  ;;  %v3537_v20 = vmul.f32 %v3529_v36, %v5046_v27  ;;  %v3922_v11 = vld [vmem:[%s5968_s9] ss:$0 sm:$0xff] }
 0xfa7   : > { %3676 = vst.msk [vmem:[%s5870_s24 + $0x30] sm:$0xff] %vm441_vm2, %v3660_v4  ;;  %v3543_v31 = vpack.c.bf16 %v3539_v45, %v3538_v7  ;;  %v3661_v8 = vadd.f32 %v3539_v45, %v5356_v30  ;;  %v4085_v30 = vld [vmem:[%s5968_s9 + $0x1] ss:$0 sm:$0xff]  ;;  %v2035_v12 = vadd.f32 %v5413_v19, %v3922_v11  ;;  %v2038_v16 = vadd.f32 %v5417_v24, %v3922_v11 }
 0xfa8   : > { %3674 = vst.msk [vmem:[%s5870_s24 + $0x20] sm:$0xff] %vm441_vm2, %v3658_v6  ;;  %v3542_v33 = vpack.c.bf16 %v3537_v20, %v3536_v34  ;;  %v3659_v15 = vadd.f32 %v3537_v20, %v5362_v42  ;;  %v2027_v42 = vadd.f32 %v3922_v11, %v5415_v21  ;;  %v2030_v41 = vadd.f32 %v3922_v11, %v5419_v62 }
 0xfa9   : > { %3677 = vst.msk [vmem:[%s5870_s24 + $0x38] sm:$0xff] %vm441_vm2, %v3661_v8  ;;  %v2059_v43 = vmul.f32 %v2035_v12, %v5010_v17  ;;  %v2060_v24 = vmul.f32 %v2038_v16, %v5017_v22  ;;  %v2051_v40 = vadd.f32 %v5421_v39, %v3922_v11  ;;  %v2054_v23 = vadd.f32 %v5425_v29, %v3922_v11 }
 0xfaa   : > { %3675 = vst.msk [vmem:[%s5870_s24 + $0x28] sm:$0xff] %vm441_vm2, %v3659_v15  ;;  %4268 = vmatprep.mubr.msk.bf16.mxu1 %vm441_vm2, %v3542_v33  ;;  %v2057_v14 = vmul.f32 %v2027_v42, %v5007_v3  ;;  %v2058_v50 = vmul.f32 %v2030_v41, %v5002_v1  ;;  %v2046_v48 = vadd.f32 %v3922_v11, %v5427_v46 }
 0xfab   : > { %4269 = vmatmul.mubr.msk.bf16.gmra.mrb[84].mxu1 %vm441_vm2, %v3543_v31  ;;  %v2063_v55 = vmul.f32 %v2051_v40, %v5056_v56  ;;  %v2064_v53 = vmul.f32 %v2054_v23, %v5066_v60 }
 0xfac   : > { %v2062_v37 = vmul.f32 %v2046_v48, %v5046_v27 }
0x106e   : > { %v4266_v52 = vpop.f32.mrb[80].mxu1 }
0x106f   : > { %v3624_v63 = vadd.f32 %v4266_v52, %v4085_v30  ;;  %v3615_v59 = vpop.f32.mrb[81].mxu1 }
0x1070   : > { %v3616_v38 = vadd.f32 %v4085_v30, %v3615_v59  ;;  %v4267_v5 = vpop.f32.mrb[82].mxu1 }
0x1071   : > { %v3648_v9 = vmul.f32 %v3624_v63, %v5010_v17  ;;  %v3627_v10 = vadd.f32 %v4267_v5, %v4085_v30  ;;  %v3618_v2 = vpop.f32.mrb[83].mxu1 }
0x1072   : > { %v3646_v19 = vmul.f32 %v3616_v38, %v5007_v3  ;;  %v3619_v21 = vadd.f32 %v4085_v30, %v3618_v2  ;;  %v2043_v3 = vadd.f32 %v3922_v11, %v5423_v25 }
0x1073   : > { %v3664_v62 = vadd.f32 %v3648_v9, %v2059_v43  ;;  %v3649_v17 = vmul.f32 %v3627_v10, %v5017_v22 }
0x1074   : > { %v3662_v18 = vadd.f32 %v3646_v19, %v2057_v14  ;;  %v3647_v35 = vmul.f32 %v3619_v21, %v5002_v1  ;;  %v2061_v25 = vmul.f32 %v2043_v3, %v5041_v32 }
0x1075   : > { %3680 = vst [vmem:[%s5929_s13 + $0x10] sm:$0xff] %v3664_v62  ;;  %v3665_v26 = vadd.f32 %v3649_v17, %v2060_v24 }
0x1076   : > { %3678 = vst [vmem:[%s5929_s13] sm:$0xff] %v3662_v18  ;;  %v3663_v51 = vadd.f32 %v3647_v35, %v2058_v50 }
0x1077   : > { %3681 = vst [vmem:[%s5929_s13 + $0x18] sm:$0xff] %v3665_v26 }
0x1078   : > { %3679 = vst [vmem:[%s5929_s13 + $0x8] sm:$0xff] %v3663_v51 }
0x107e   : > { %v4270_v61 = vpop.f32.mrb[84].mxu1 }
0x107f   : > { %v3640_v13 = vadd.f32 %v4270_v61, %v4085_v30  ;;  %v3631_v22 = vpop.f32.mrb[85].mxu1 }
0x1080   : > { %v3632_v58 = vadd.f32 %v4085_v30, %v3631_v22  ;;  %v4271_v1 = vpop.f32.mrb[86].mxu1 }
0x1081   : > { %v3652_v49 = vmul.f32 %v3640_v13, %v5056_v56  ;;  %v3643_v47 = vadd.f32 %v4271_v1, %v4085_v30  ;;  %v3634_v39 = vpop.f32.mrb[87].mxu1 }
0x1082   : > { %v3650_v29 = vmul.f32 %v3632_v58, %v5041_v32  ;;  %v3635_v0 = vadd.f32 %v4085_v30, %v3634_v39 }
0x1083   : > { %v3668_v46 = vadd.f32 %v3652_v49, %v2063_v55  ;;  %v3653_v28 = vmul.f32 %v3643_v47, %v5066_v60 }
0x1084   : > { %v3666_v54 = vadd.f32 %v3650_v29, %v2061_v25  ;;  %v3651_v44 = vmul.f32 %v3635_v0, %v5046_v27 }
0x1085   : > { %3684 = vst [vmem:[%s5929_s13 + $0x30] sm:$0xff] %v3668_v46  ;;  %v3669_v56 = vadd.f32 %v3653_v28, %v2064_v53 }
0x1086   : > { %3682 = vst [vmem:[%s5929_s13 + $0x20] sm:$0xff] %v3666_v54  ;;  %v3667_v7 = vadd.f32 %v3651_v44, %v2062_v37 }
0x1087   : > { %3685 = vst [vmem:[%s5929_s13 + $0x38] sm:$0xff] %v3669_v56 }
0x1088   : > { %3683 = vst [vmem:[%s5929_s13 + $0x28] sm:$0xff] %v3667_v7 }
0x1089 PF: > { %s22_s17 = sadd.s32 1, %s4731_s17  }
0x108a   : > { %p19_p4 = scmp.ge.s32.totalorder %s22_s17, 4  }
0x108c   :  { %21 = sbr.rel (!%p19_p4) target bundleno = 1 (0x1), region = 129 }

</bundles_post_ra>
